<compile_context>
chip_gen: v6e
topology: v6e:2x2x1
jax: 0.10.0
libtpu: 0.0.40
codegen_flags: <defaults>
</compile_context>

<pallas_src>
import functools

import jax
import jax.numpy as jnp
from jax.experimental import pallas as pl
from jax.experimental.pallas import tpu as pltpu


def _vq_encode_kernel(patches_ref, wmat_ref, bias_ref, cbt_ref, cb_ref, esq_ref,
                      zq_ref, idx_ref):
    # patches_ref: (TM, Kp)  bf16  im2col rows for this tile (K zero-padded to Kp)
    # wmat_ref:    (Kp, D)   bf16  conv weight as matmul operand      (resident)
    # bias_ref:    (1, D)    f32                                      (resident)
    # cbt_ref:     (D, Kc)   bf16  codebook, pre-transposed for dots  (resident)
    # cb_ref:      (Kc, D)   f32   codebook for the exact gather      (resident)
    # esq_ref:     (1, Kc)   f32   precomputed ||e_k||^2              (resident)
    # zq_ref:      (TM, D)   f32
    # idx_ref:     (1, TM)   i32   lane-dense index tile

    # Encoder: conv (as matmul on im2col patches) + bias + swish.
    # bf16 MXU matmul, f32 accumulation; elementwise math in f32 (v5e VPU/EUP
    # have no bf16 path).
    z = jnp.dot(patches_ref[...], wmat_ref[...],
                preferred_element_type=jnp.float32) + bias_ref[...]
    z = z * jax.nn.sigmoid(z)                                   # swish

    # Vector quantization.  argmin_k ||z - e_k||^2 == argmin_k (||e_k||^2 - 2 z.e_k);
    # the per-row ||z||^2 term is dropped since it never affects the argmin and
    # the distance values are not returned.
    dots = jnp.dot(z.astype(jnp.bfloat16), cbt_ref[...],
                   preferred_element_type=jnp.float32)          # (TM, Kc)
    dist = esq_ref[...] - 2.0 * dots

    idx = jnp.argmin(dist, axis=-1).astype(jnp.int32)           # (TM,)
    idx_ref[...] = idx[None, :]                                 # lane-dense store

    # Gather codebook rows via one-hot matmul (MXU-friendly gather), kept in f32
    # so z_q stays (near-)exact codebook rows.  Equality against idx (not against
    # the row-min) keeps "first index wins" tie handling with a single winner.
    onehot = (jax.lax.broadcasted_iota(jnp.int32, dist.shape, 1)
              == idx[:, None]).astype(jnp.float32)
    zq_ref[...] = jnp.dot(onehot, cb_ref[...],
                          preferred_element_type=jnp.float32).astype(zq_ref.dtype)


def _im2col_3x3_same(x_nhwc):
    """(N, H, W, C) -> (N*H*W, 9*C) patch matrix for a 3x3 / stride 1 / pad 1 conv."""
    n, h, w, c = x_nhwc.shape
    xp = jnp.pad(x_nhwc, ((0, 0), (1, 1), (1, 1), (0, 0)))
    cols = [xp[:, i:i + h, j:j + w, :] for i in range(3) for j in range(3)]
    patches = jnp.stack(cols, axis=-2)              # (N, H, W, 9, C)
    return patches.reshape(n * h * w, 9 * c)
# TODO(synk): for realistic (large H, W) inputs, fold the 3x3 conv into the kernel
# as 9 shifted (TM, C_in) x (C_in, D) accumulating matmuls to avoid the 9x im2col
# HBM expansion; kept as XLA glue here since the demo image is tiny.


@functools.partial(jax.jit, static_argnames=("tm",))
def vq_encode(x_nchw, conv_w, conv_b, codebook, *, tm=512):
    """Synthetic vq_model.encode(x).

    x_nchw:   (N, C_in, H, W) float32
    conv_w:   (D, C_in, 3, 3) float32   (PyTorch Conv2d weight layout)
    conv_b:   (D,)            float32
    codebook: (Kc, D)         float32
    Returns (z_q, indices) with z_q: (N, D, H, W) f32, indices: (N, H, W) int32.
    """
    n, c_in, h, w = x_nchw.shape
    d = conv_w.shape[0]
    kc = codebook.shape[0]

    # Glue: NCHW -> NHWC -> im2col (plain XLA).
    x_nhwc = jnp.transpose(x_nchw, (0, 2, 3, 1))
    patches = _im2col_3x3_same(x_nhwc).astype(jnp.float32)   # (M, K), K = 9*C_in
    m, k = patches.shape

    # Conv weight (D, C, kh, kw) -> (kh*kw*C, D), matching the patch order.
    wmat = jnp.transpose(conv_w, (2, 3, 1, 0)).reshape(k, d).astype(jnp.float32)

    # Pad contraction dim to a layout-friendly multiple of 8 (27 -> 32 here).
    kp = -(-k // 8) * 8
    if kp != k:
        patches = jnp.pad(patches, ((0, 0), (0, kp - k)))
        wmat = jnp.pad(wmat, ((0, kp - k), (0, 0)))

    # Pad rows so the row tile divides M; padded rows are discarded after the call.
    mp = -(-m // tm) * tm
    if mp != m:
        patches = jnp.pad(patches, ((0, mp - m), (0, 0)))
    num_tiles = mp // tm

    # bf16 inputs for the MXU matmuls (f32 accumulation in-kernel); f32 codebook
    # for the exact gather; codebook norms hoisted out of the grid loop.
    patches_bf = patches.astype(jnp.bfloat16)
    wmat_bf = wmat.astype(jnp.bfloat16)
    cb_f32 = codebook.astype(jnp.float32)
    cbt_bf = cb_f32.T.astype(jnp.bfloat16)               # (D, Kc)
    e_sq = jnp.sum(cb_f32 * cb_f32, axis=-1)[None, :]    # (1, Kc)
    bias = conv_b.reshape(1, d).astype(jnp.float32)

    z_q, idx = pl.pallas_call(
        _vq_encode_kernel,
        out_shape=(
            jax.ShapeDtypeStruct((mp, d), jnp.float32),
            jax.ShapeDtypeStruct((1, mp), jnp.int32),
        ),
        grid_spec=pltpu.PrefetchScalarGridSpec(
            num_scalar_prefetch=0,
            grid=(num_tiles,),
            in_specs=[
                pl.BlockSpec((tm, kp), lambda i: (i, 0)),   # patches: streamed per tile
                pl.BlockSpec((kp, d), lambda i: (0, 0)),    # conv weight: resident
                pl.BlockSpec((1, d), lambda i: (0, 0)),     # bias: resident
                pl.BlockSpec((d, kc), lambda i: (0, 0)),    # codebook^T (bf16): resident
                pl.BlockSpec((kc, d), lambda i: (0, 0)),    # codebook (f32): resident
                pl.BlockSpec((1, kc), lambda i: (0, 0)),    # ||e_k||^2: resident
            ],
            out_specs=[
                pl.BlockSpec((tm, d), lambda i: (i, 0)),    # z_q tile
                pl.BlockSpec((1, tm), lambda i: (0, i)),    # indices: lane-dense row
            ],
        ),
        compiler_params=pltpu.CompilerParams(
            dimension_semantics=("parallel",),
            vmem_limit_bytes=32 * 1024 * 1024),
    )(patches_bf, wmat_bf, bias, cbt_bf, cb_f32, e_sq)

    z_q_nchw = jnp.transpose(z_q[:m].reshape(n, h, w, d), (0, 3, 1, 2))
    indices = idx[0, :m].reshape(n, h, w)
    return z_q_nchw, indices


if __name__ == "__main__":
    # Small, deterministic configuration.
    N, C_IN, H, W = 2, 3, 16, 16         # input image, NCHW
    D = 32                                # latent / embedding dim
    KC = 256                              # codebook size

    key = jax.random.PRNGKey(0)
    k_x, k_w, k_b, k_cb = jax.random.split(key, 4)

    x = jax.random.normal(k_x, (N, C_IN, H, W), dtype=jnp.float32)
    conv_w = 0.1 * jax.random.normal(k_w, (D, C_IN, 3, 3), dtype=jnp.float32)
    conv_b = 0.01 * jax.random.normal(k_b, (D,), dtype=jnp.float32)
    codebook = jax.random.normal(k_cb, (KC, D), dtype=jnp.float32)

    # tm=256 at this tiny M=512 keeps >=2 grid steps (megacore-shardable on v7x);
    # realistic image sizes should use the default tm=512 (or larger).
    z_q, indices = vq_encode(x, conv_w, conv_b, codebook, tm=256)
    jax.block_until_ready((z_q, indices))

    assert z_q.shape == (N, D, H, W) and z_q.dtype == jnp.float32
    assert indices.shape == (N, H, W) and indices.dtype == jnp.int32
    print("KERNEL_OK")
</pallas_src>

<mosaic_0001>
module attributes {stable_mosaic.version = 11 : i64} {
  func.func @_vq_encode_kernel(%arg0: i32, %arg1: memref<256x32xbf16, #tpu.memory_space<vmem>>, %arg2: memref<32x32xbf16, #tpu.memory_space<vmem>>, %arg3: memref<1x32xf32, #tpu.memory_space<vmem>>, %arg4: memref<32x256xbf16, #tpu.memory_space<vmem>>, %arg5: memref<256x32xf32, #tpu.memory_space<vmem>>, %arg6: memref<1x256xf32, #tpu.memory_space<vmem>>, %arg7: memref<256x32xf32, #tpu.memory_space<vmem>>, %arg8: memref<1x256xi32, #tpu.memory_space<vmem>>) attributes {dimension_semantics = [#tpu.dimension_semantics<parallel>], iteration_bounds = array<i64: 2>, scalar_prefetch = 0 : i64, scratch_operands = 0 : i64, tpu.core_type = #tpu.core_type<tc>, window_params = [{transform_indices = @transform_0, window_bounds = array<i64: 256, 32>}, {pipeline_mode = #tpu.pipeline_mode<synchronous>, transform_indices = @transform_1, window_bounds = array<i64: 32, 32>}, {pipeline_mode = #tpu.pipeline_mode<synchronous>, transform_indices = @transform_2, window_bounds = array<i64: 1, 32>}, {pipeline_mode = #tpu.pipeline_mode<synchronous>, transform_indices = @transform_3, window_bounds = array<i64: 32, 256>}, {pipeline_mode = #tpu.pipeline_mode<synchronous>, transform_indices = @transform_4, window_bounds = array<i64: 256, 32>}, {pipeline_mode = #tpu.pipeline_mode<synchronous>, transform_indices = @transform_5, window_bounds = array<i64: 1, 256>}, {transform_indices = @transform_6, window_bounds = array<i64: 256, 32>}, {transform_indices = @transform_7, window_bounds = array<i64: 1, 256>}]} {
    %c0 = arith.constant 0 : index
    %c0_0 = arith.constant 0 : index
    %0 = vector.load %arg1[%c0, %c0_0] : memref<256x32xbf16, #tpu.memory_space<vmem>>, vector<256x32xbf16>
    %c0_1 = arith.constant 0 : index
    %c0_2 = arith.constant 0 : index
    %1 = vector.load %arg2[%c0_1, %c0_2] : memref<32x32xbf16, #tpu.memory_space<vmem>>, vector<32x32xbf16>
    %cst = arith.constant dense<0.000000e+00> : vector<256x32xf32>
    %2 = tpu.matmul %0, %1, %cst {dimension_numbers = #tpu.dot_dimension_numbers<[1], [0], [0], [1], [0, 0, 1, 1], [], []>} : vector<256x32xbf16>, vector<32x32xbf16>, vector<256x32xf32> -> vector<256x32xf32>
    %c0_3 = arith.constant 0 : index
    %c0_4 = arith.constant 0 : index
    %3 = vector.load %arg3[%c0_3, %c0_4] : memref<1x32xf32, #tpu.memory_space<vmem>>, vector<1x32xf32>
    %4 = vector.broadcast %3 : vector<1x32xf32> to vector<256x32xf32>
    %5 = arith.addf %2, %4 : vector<256x32xf32>
    %6 = arith.negf %5 : vector<256x32xf32>
    %7 = math.exp %6 : vector<256x32xf32>
    %cst_5 = arith.constant 1.000000e+00 : f32
    %8 = vector.broadcast %cst_5 : f32 to vector<256x32xf32>
    %9 = arith.addf %8, %7 : vector<256x32xf32>
    %10 = arith.divf %8, %9 : vector<256x32xf32>
    %11 = arith.mulf %5, %10 : vector<256x32xf32>
    %12 = arith.truncf %11 : vector<256x32xf32> to vector<256x32xbf16>
    %c0_6 = arith.constant 0 : index
    %c0_7 = arith.constant 0 : index
    %13 = vector.load %arg4[%c0_6, %c0_7] : memref<32x256xbf16, #tpu.memory_space<vmem>>, vector<32x256xbf16>
    %cst_8 = arith.constant dense<0.000000e+00> : vector<256x256xf32>
    %14 = tpu.matmul %12, %13, %cst_8 {dimension_numbers = #tpu.dot_dimension_numbers<[1], [0], [0], [1], [0, 0, 1, 1], [], []>} : vector<256x32xbf16>, vector<32x256xbf16>, vector<256x256xf32> -> vector<256x256xf32>
    %c0_9 = arith.constant 0 : index
    %c0_10 = arith.constant 0 : index
    %15 = vector.load %arg6[%c0_9, %c0_10] : memref<1x256xf32, #tpu.memory_space<vmem>>, vector<1x256xf32>
    %cst_11 = arith.constant 2.000000e+00 : f32
    %16 = vector.broadcast %cst_11 : f32 to vector<256x256xf32>
    %17 = arith.mulf %16, %14 : vector<256x256xf32>
    %18 = vector.broadcast %15 : vector<1x256xf32> to vector<256x256xf32>
    %19 = arith.subf %18, %17 : vector<256x256xf32>
    %20 = tpu.reduce_index %19 {axis = 1 : i32, kind = #tpu.reduction_kind<arg_min>} : vector<256x256xf32> -> vector<256xi32>
    %21 = vector.shape_cast %20 : vector<256xi32> to vector<1x256xi32>
    %c0_12 = arith.constant 0 : index
    %c0_13 = arith.constant 0 : index
    %22 = vector.load %arg8[%c0_12, %c0_13] : memref<1x256xi32, #tpu.memory_space<vmem>>, vector<1x256xi32>
    tpu.vector_store %arg8[%c0_12, %c0_13], %21 {strides = array<i32>} : memref<1x256xi32, #tpu.memory_space<vmem>>, vector<1x256xi32>,
    %23 = tpu.iota {dimensions = array<i32: 1>} : vector<256x256xi32>
    %24 = vector.shape_cast %20 : vector<256xi32> to vector<256x1xi32>
    %25 = vector.broadcast %24 : vector<256x1xi32> to vector<256x256xi32>
    %26 = arith.cmpi eq, %23, %25 : vector<256x256xi32>
    %27 = arith.extui %26 : vector<256x256xi1> to vector<256x256xi32>
    %28 = arith.sitofp %27 : vector<256x256xi32> to vector<256x256xf32>
    %c0_14 = arith.constant 0 : index
    %c0_15 = arith.constant 0 : index
    %29 = vector.load %arg5[%c0_14, %c0_15] : memref<256x32xf32, #tpu.memory_space<vmem>>, vector<256x32xf32>
    %cst_16 = arith.constant dense<0.000000e+00> : vector<256x32xf32>
    %30 = tpu.matmul %28, %29, %cst_16 {dimension_numbers = #tpu.dot_dimension_numbers<[1], [0], [0], [1], [0, 0, 1, 1], [], []>} : vector<256x256xf32>, vector<256x32xf32>, vector<256x32xf32> -> vector<256x32xf32>
    %c0_17 = arith.constant 0 : index
    %c0_18 = arith.constant 0 : index
    %31 = vector.load %arg7[%c0_17, %c0_18] : memref<256x32xf32, #tpu.memory_space<vmem>>, vector<256x32xf32>
    tpu.vector_store %arg7[%c0_17, %c0_18], %30 {strides = array<i32>} : memref<256x32xf32, #tpu.memory_space<vmem>>, vector<256x32xf32>,
    return
  }
  func.func @transform_0(%arg0: i32) -> (i32, i32) {
    %c0_i32 = arith.constant 0 : i32
    %c0_i32_0 = arith.constant 0 : i32
    return %arg0, %c0_i32 : i32, i32
  }
  func.func @transform_1(%arg0: i32) -> (i32, i32) {
    %c0_i32 = arith.constant 0 : i32
    %c0_i32_0 = arith.constant 0 : i32
    %c0_i32_1 = arith.constant 0 : i32
    return %c0_i32, %c0_i32_0 : i32, i32
  }
  func.func @transform_2(%arg0: i32) -> (i32, i32) {
    %c0_i32 = arith.constant 0 : i32
    %c0_i32_0 = arith.constant 0 : i32
    %c0_i32_1 = arith.constant 0 : i32
    return %c0_i32, %c0_i32_0 : i32, i32
  }
  func.func @transform_3(%arg0: i32) -> (i32, i32) {
    %c0_i32 = arith.constant 0 : i32
    %c0_i32_0 = arith.constant 0 : i32
    %c0_i32_1 = arith.constant 0 : i32
    return %c0_i32, %c0_i32_0 : i32, i32
  }
  func.func @transform_4(%arg0: i32) -> (i32, i32) {
    %c0_i32 = arith.constant 0 : i32
    %c0_i32_0 = arith.constant 0 : i32
    %c0_i32_1 = arith.constant 0 : i32
    return %c0_i32, %c0_i32_0 : i32, i32
  }
  func.func @transform_5(%arg0: i32) -> (i32, i32) {
    %c0_i32 = arith.constant 0 : i32
    %c0_i32_0 = arith.constant 0 : i32
    %c0_i32_1 = arith.constant 0 : i32
    return %c0_i32, %c0_i32_0 : i32, i32
  }
  func.func @transform_6(%arg0: i32) -> (i32, i32) {
    %c0_i32 = arith.constant 0 : i32
    %c0_i32_0 = arith.constant 0 : i32
    return %arg0, %c0_i32 : i32, i32
  }
  func.func @transform_7(%arg0: i32) -> (i32, i32) {
    %c0_i32 = arith.constant 0 : i32
    %c0_i32_0 = arith.constant 0 : i32
    return %c0_i32, %arg0 : i32, i32
  }
}

</mosaic_0001>

<bundles_post_ra>
// kernel: squeeze.1
= control target key start
LH: loop header
LB: loop body
LE: loop exit
PB: predicated region body
PF: predicated region fallthrough
CT: control target
= control target key end

     0   :  { %s125_s0 = inlined_call_operand.vmem [shape: s32[512], index: 0, kind: input, shape index: {}]   ;;  %s126_s1 = inlined_call_operand.hbm [shape: s32[2,16,16], index: 1, kind: output, shape index: {}]  }
   0x1   :  { %v6_v0 = vld [vmem:[%s125_s0] sm:$0xf] }
   0x2   :  { %7 = vst [vmem:[#allocation2] sm:$0xf] %v6_v0 }
   0x3   :  { %2 = vsyncpa [#allocation1], 0  ;;  %s93_s0 = smov 112   ;;  %s94_s8 = smov 80   ;;  %vm9_vm0 = vcmask 130048  }
   0x4   :  { %s95_s9 = smov 96   ;;  %s96_s10 = smov 64  }
   0x5   :  { %s97_s11 = smov 48   ;;  %s98_s12 = smov 32  }
   0x6   :  { %s99_s13 = smov 16   ;;  %s100_s14 = smov [#allocation0]  }
   0x7   :  { %s57_s15 = sshll.u32 %s100_s14, 4  ;;  %s58_s15 = int_to_ptr.vmem [resolvable:$true] %s57_s15 }
   0x8   :  { %s71_s16 = scalar_lea.vmem %s58_s15, 512  ;;  %p76_p1 = scmp.lt.s32.totalorder %s58_s15, %s58_s15 }
   0x9   :  { %v11_v1 = vld [vmem:[#allocation2] sm:$0xf]   ;;  %p72_p0 = scmp.ne.s32.totalorder %s58_s15, %s71_s16  ;;  %p77_p2 = scmp.lt.s32.totalorder %s71_s16, %s71_s16 }
   0xa   :  { %v23_v2 = vld [vmem:[#allocation2] sm:$0xf]   ;;  %12 = vrot.lane.b32.xlu0 %v11_v1, %s93_s0 }
   0xb   :  { %24 = vrot.lane.b32.xlu1 %v23_v2, %s94_s8  ;;  %v17_v3 = vld [vmem:[#allocation2] sm:$0xf]   ;;  %p78_p3 = por %p77_p2, %p76_p1 }
   0xc   :  { %v29_v4 = vld [vmem:[#allocation2] sm:$0xf]  }
   0xd   :  { %v8_v5 = vld [vmem:[#allocation2] sm:$0xf]   ;;  %p79_p4 = pnand %p78_p3, %p72_p0 }
   0xe   :  { %10 = vst.msk [vmem:[#allocation0] ss:$8 sm:$0xf] %vm9_vm0, %v8_v5   ;;  %18 = vrot.lane.b32.xlu0 %v17_v3, %s95_s9  ;;  %v35_v6 = vld [vmem:[#allocation2] sm:$0xf]  }
   0xf   :  { %30 = vrot.lane.b32.xlu1 %v29_v4, %s96_s10  ;;  %v41_v7 = vld [vmem:[#allocation2] sm:$0xf]  }
  0x10   :  { %v47_v8 = vld [vmem:[#allocation2] sm:$0xf]  }
  0x12   :  { %36 = vrot.lane.b32.xlu0 %v35_v6, %s97_s11 }
  0x13   :  { %42 = vrot.lane.b32.xlu1 %v41_v7, %s98_s12 }
  0x16   :  { %48 = vrot.lane.b32.xlu0 %v47_v8, %s99_s13 }
  0x7c   :  { %v13_v9 = vpop.permute.xlu0 %12  }
  0x7d   :  { %v25_v10 = vpop.permute.xlu1 %24   ;;  %16 = vst.msk [vmem:[#allocation0 + $0x1] ss:$8 sm:$0xf] %vm9_vm0, %v13_v9  }
  0x7e   :  { %28 = vst.msk [vmem:[#allocation0 + $0x3] ss:$8 sm:$0xf] %vm9_vm0, %v25_v10  }
  0x80   :  { %v19_v11 = vpop.permute.xlu0 %18  }
  0x81   :  { %v31_v12 = vpop.permute.xlu1 %30   ;;  %22 = vst.msk [vmem:[#allocation0 + $0x2] ss:$8 sm:$0xf] %vm9_vm0, %v19_v11  }
  0x82   :  { %34 = vst.msk [vmem:[#allocation0 + $0x4] ss:$8 sm:$0xf] %vm9_vm0, %v31_v12  }
  0x84   :  { %v37_v13 = vpop.permute.xlu0 %36  }
  0x85   :  { %v43_v14 = vpop.permute.xlu1 %42   ;;  %40 = vst.msk [vmem:[#allocation0 + $0x5] ss:$8 sm:$0xf] %vm9_vm0, %v37_v13  }
  0x86   :  { %46 = vst.msk [vmem:[#allocation0 + $0x6] ss:$8 sm:$0xf] %vm9_vm0, %v43_v14  }
  0x88   :  { %v49_v15 = vpop.permute.xlu0 %48  }
  0x89   :  { %52 = vst.msk [vmem:[#allocation0 + $0x7] ss:$8 sm:$0xf] %vm9_vm0, %v49_v15  }
  0x8a   :  { %82 = shalt.err (!%p79_p4)
}
  0x8b   :  { %60 = dma.vmem_to_hbm [thread:$0]  %s58_s15, 512, %s126_s1, [#allocation1]  }
  0x8c   :  { %91 = dma.done.wait [#allocation1], 512  }
  0x8d   :  { %92 = vsyncadd [#allocation1], 4294966784 }
  0x8e   :  { %62 = vsyncpa [#allocation1], 1 }

// kernel: vq_encode.1
= control target key start
LH: loop header
LB: loop body
LE: loop exit
PB: predicated region body
PF: predicated region fallthrough
CT: control target
= control target key end

     0   :  { %13 = vsyncpa [#allocation3], 0  ;;  %s7902_s0 = inlined_call_operand.vmem [shape: bf16[512,32], index: 0, kind: input, shape index: {}]   ;;  %s7903_s1 = inlined_call_operand.vmem [shape: bf16[32,32], index: 1, kind: input, shape index: {}]   ;;  %s7904_s2 = inlined_call_operand.vmem [shape: f32[1,32], index: 2, kind: input, shape index: {}]   ;;  %s7905_s3 = inlined_call_operand.vmem [shape: bf16[32,256], index: 3, kind: input, shape index: {}]   ;;  %s7906_s4 = inlined_call_operand.vmem [shape: f32[256,32], index: 4, kind: input, shape index: {}]   ;;  %s7907_s5 = inlined_call_operand.vmem [shape: f32[1,256], index: 5, kind: input, shape index: {}]   ;;  %s7908_s6 = inlined_call_operand.hbm [shape: f32[512,32], index: 6, kind: output, shape index: {0}]   ;;  %s7909_s7 = inlined_call_operand.vmem [shape: s32[1,512], index: 7, kind: output, shape index: {1}]  }
   0x1   :  { %15 = vsyncpa [#allocation3 + $0x1], 0  ;;  %s5710_s24 = smov 0   ;;  %s5712_s25 = smov 0  }
   0x2   :  { %s5714_s26 = smov 0   ;;  %s5716_s27 = smov 0  }
   0x3 LB: > { %s5731_s28 = sadd.s32 4294967295, %s5661_s27   ;;  %s5023_s29 = sadd.s32 4294967294, %s5661_s27   ;;  %s5661_s27 = sphi %s5716_s27, %s8034_s27   ;;  %s5657_s26 = sphi %s5714_s26, %s8033_s26   ;;  %s5653_s25 = sphi %s5712_s25, %s8032_s25   ;;  %s5649_s24 = sphi %s5710_s24, %s8031_s24  }
   0x4   : > { %s5735_s30 = sadd.s32 1, %s5661_s27   ;;  %s159_s8 = sadd.s32 1, %s5657_s26 }
   0x5   : > { %s156_s9 = ssub.s32 %s5661_s27, %s5735_s30  ;;  %p169_p0 = scmp.ne.s32.totalorder %s5657_s26, %s5653_s25 }
   0x6   : > { %p157_p1 = scmp.eq.s32.totalorder %s156_s9, 0  ;;  %p170_p2 = scmp.eq.s32.totalorder %s5731_s28, 1 }
   0x7   : > { %p175_p3 = scmp.ne.s32.totalorder %s5653_s25, %s5649_s24  ;;  %p176_p4 = scmp.eq.s32.totalorder %s5023_s29, 1 }
   0x8   : > { %s5746_s10 = scalar_select %p157_p1, %s5657_s26, %s159_s8  }
   0x9   : > { %p5748_p5 = por %p170_p2, %p169_p0  ;;  %p5752_p6 = por %p176_p4, %p175_p3 }
   0xa   : > { %p5026_p7 = scmp.ge.s32.totalorder %s5661_s27, 1  ;;  %p244_p8 = scmp.lt.s32.totalorder %s5661_s27, 3 }
   0xc   : > { %p245_p9 = pnand %p5026_p7, %p244_p8 }
   0xe   : > { %248 = sbr.rel (%p245_p9) target bundleno = 1284 (0x504), region = 44 }
  0x13   : > { %v5449_v0 = vld [vmem:[%s7903_s1 + $0x8] sm:$0xff]   ;;  %s5028_s15 = sshll.u32 %s5731_s28, 5  ;;  %v5450_v1 = vld [vmem:[%s7903_s1] sm:$0xff]   ;;  %vm7910_vm0 = vcmask 261120   ;;  %v5467_v18 = vld [vmem:[%s7905_s3 + $0x14] ss:$8 sps:$4 sm:$0xff]  }
  0x14   : > { %p281_p10 = scmp.lt.s32.totalorder %s5028_s15, 63  ;;  %5270 = vmatprep.subr.bf16.mxu0 %v5449_v0  ;;  %v5469_v19 = vld [vmem:[%s7905_s3 + $0x10] ss:$8 sps:$4 sm:$0xff]   ;;  %962 = vmatprep.subr.bf16.mxu1 %v5467_v18  ;;  %v5470_v20 = vld [vmem:[%s7905_s3 + $0x4] ss:$8 sps:$4 sm:$0xff]   ;;  %v7918_v22 = vmov 0  }
  0x15   : > { %5271 = vmatpush3.bf16.msra.mxu0 %v5449_v0  ;;  %963 = vmatpush1.bf16.msra.mxu1 %v5469_v19  ;;  %v5472_v21 = vld [vmem:[%s7905_s3] ss:$8 sps:$4 sm:$0xff]   ;;  %s271_s14 = sand.u32 1, %s5653_s25   ;;  %s5030_s17 = sshll.u32 %s5731_s28, 1 }
  0x16   : > { %s8036_s15 = smov (!%p281_p10, %s5028_s15), 63  ;;  %5272 = vmatprep.subr.bf16.mxu0 %v5450_v1  ;;  %964 = vmatprep.subr.bf16.mxu1 %v5470_v20  ;;  %v5818_v24 = vld [vmem:[%s7904_s2] ss:$0 sm:$0xff]  ;;  %p288_p11 = scmp.lt.s32.totalorder %s5030_s17, 3 }
  0x17   : > { %s5029_s18 = sshll.u32 %s8036_s15, 2  ;;  %982 = vmatprep.mubr.bf16.mxu1 %v7918_v22  ;;  %s5027_s15 = sshll.u32 %s271_s14, 8 }
  0x18   : > { %s5768_s21 = scalar_lea.vmem %s7902_s0, %s5029_s18  ;;  %s7287_s16 = scalar_lea.vmem [#allocation2], %s5027_s15 }
  0x19   : > { %5273 = vmatpush3.bf16.msra.mxu0 %v5450_v1  ;;  %v5451_v2 = vld [vmem:[%s5768_s21] sm:$0xff]   ;;  %v5452_v3 = vld [vmem:[%s5768_s21 + $0x8] sm:$0xff]   ;;  %v5453_v4 = vld [vmem:[%s5768_s21 + $0x10] sm:$0xff]   ;;  %965 = vmatpush1.bf16.msra.mxu1 %v5472_v21  ;;  %s8038_s17 = smov (!%p288_p11, %s5030_s17), 3  ;;  %s4937_s22 = sshll.u32 %s7287_s16, 4  ;;  %s7856_s22 = int_to_ptr.vmem [resolvable:$true] %s4937_s22 }
  0x1a   : > { %5274 = vmatprep.mubr.msk.bf16.mxu0 %vm7910_vm0, %v5451_v2  ;;  %v5454_v5 = vld [vmem:[%s5768_s21 + $0x18] sm:$0xff]   ;;  %v5455_v6 = vld [vmem:[%s5768_s21 + $0x20] sm:$0xff]   ;;  %v5456_v7 = vld [vmem:[%s5768_s21 + $0x28] sm:$0xff]   ;;  %s290_s20 = scalar_lea.vmem %s7909_s7, %s8038_s17  ;;  %s7862_s9 = scalar_lea.sflag [#allocation3], %s271_s14 }
  0x1b   : > { %v5457_v8 = vld [vmem:[%s5768_s21 + $0x30] sm:$0xff]   ;;  %v5458_v9 = vld [vmem:[%s5768_s21 + $0x38] sm:$0xff]   ;;  %v5459_v10 = vld [vmem:[%s5768_s21 + $0x40] sm:$0xff]   ;;  %s5601_s13 = scalar_lea.vmem %s7856_s22, 4096 }
  0x1c   : > { %5275 = vmatmul.mubr.msk.bf16.vlgmr.msra.gmra.mxu0 %vm7910_vm0, %v5452_v3  ;;  %v5460_v11 = vld [vmem:[%s5768_s21 + $0x48] sm:$0xff]   ;;  %v5461_v12 = vld [vmem:[%s5768_s21 + $0x50] sm:$0xff]   ;;  %v5462_v13 = vld [vmem:[%s5768_s21 + $0x58] sm:$0xff]   ;;  %p5602_p12 = scmp.ne.s32.totalorder %s7856_s22, %s5601_s13 }
  0x1d   : > { %5278 = vmatprep.mubr.msk.bf16.mxu0 %vm7910_vm0, %v5453_v4  ;;  %v5463_v14 = vld [vmem:[%s5768_s21 + $0x60] sm:$0xff]   ;;  %v5464_v15 = vld [vmem:[%s5768_s21 + $0x68] sm:$0xff]   ;;  %v5465_v16 = vld [vmem:[%s5768_s21 + $0x70] sm:$0xff]  }
  0x1e   : > { %v5466_v17 = vld [vmem:[%s5768_s21 + $0x78] sm:$0xff]   ;;  %s5251_s21 = sshll.u32 %s5731_s28, 12  ;;  %p5603_p13 = pnand %p5602_p12, %p5748_p5 }
  0x1f   : > { %s7854_s8 = scalar_lea.hbm %s7908_s6, %s5251_s21  ;;  %s5667_s28 = smov [#allocation2]  }
  0x20   : > { %p5604_p0 = pneg %p5603_p13  ;;  %s5605_s15 = sshll.u32 %s5667_s28, 4  ;;  %s5606_s15 = int_to_ptr.vmem [resolvable:$false] %s5605_s15 }
  0x21   : > { %s5607_s17 = scalar_lea.vmem %s5606_s15, 8192  ;;  %p5608_p1 = scmp.lt.s32.totalorder %s7856_s22, %s5606_s15 }
  0x22   : > { %p5609_p2 = scmp.lt.s32.totalorder %s5607_s17, %s5601_s13 }
  0x24   : > { %5279 = vmatmul.mubr.msk.bf16.gmra.mxu0 %vm7910_vm0, %v5454_v5  ;;  %p5610_p3 = por %p5609_p2, %p5608_p1 }
  0x25   : > { %5282 = vmatprep.mubr.msk.bf16.mxu0 %vm7910_vm0, %v5455_v6 }
  0x26   : > { %p5611_p4 = pnand %p5610_p3, %p5604_p0 }
  0x2c   : > { %5283 = vmatmul.mubr.msk.bf16.gmra.mxu0 %vm7910_vm0, %v5456_v7 }
  0x2d   : > { %5286 = vmatprep.mubr.msk.bf16.mxu0 %vm7910_vm0, %v5457_v8 }
  0x34   : > { %5287 = vmatmul.mubr.msk.bf16.gmra.mxu0 %vm7910_vm0, %v5458_v9 }
  0x35   : > { %5290 = vmatprep.mubr.msk.bf16.mxu0 %vm7910_vm0, %v5459_v10 }
  0x3c   : > { %5291 = vmatmul.mubr.msk.bf16.gmra.mxu0 %vm7910_vm0, %v5460_v11 }
  0x3d   : > { %5294 = vmatprep.mubr.msk.bf16.mxu0 %vm7910_vm0, %v5461_v12 }
  0x44   : > { %5295 = vmatmul.mubr.msk.bf16.gmra.mxu0 %vm7910_vm0, %v5462_v13 }
  0x45   : > { %5298 = vmatprep.mubr.msk.bf16.mxu0 %vm7910_vm0, %v5463_v14 }
  0x4c   : > { %5299 = vmatmul.mubr.msk.bf16.gmra.mxu0 %vm7910_vm0, %v5464_v15 }
  0x4d   : > { %5302 = vmatprep.mubr.msk.bf16.mxu0 %vm7910_vm0, %v5465_v16 }
  0x54   : > { %5303 = vmatmul.mubr.msk.bf16.gmra.mxu0 %vm7910_vm0, %v5466_v17 }
  0xdc   : > { %v5276_v23 = vpop.f32.mrf.mxu0 }
  0xdd   : > { %v5824_v28 = vadd.f32 %v5276_v23, %v5818_v24 }
  0xde   : > { %v511_v25 = vpop.f32.mrf.mxu0 }
  0xdf   : > { %v5821_v26 = vadd.f32 %v5818_v24, %v511_v25  ;;  %v5068_v35 = vmul.f32 -1.442695, %v5824_v28 }
  0xe0   : > { %v5277_v27 = vpop.f32.mrf.mxu0 }
  0xe1   : > { %v5066_v29 = vmul.f32 -1.442695, %v5821_v26  ;;  %v5828_v30 = vadd.f32 %v5277_v27, %v5818_v24 }
  0xe2   : > { %v514_v31 = vpop.f32.mrf.mxu0 }
  0xe3   : > { %5473 = vpow2.f32 %v5066_v29  ;;  %v5069_v32 = vmul.f32 -1.442695, %v5828_v30  ;;  %v515_v33 = vadd.f32 %v5818_v24, %v514_v31 }
  0xe4   : > { %v5280_v34 = vpop.f32.mrf.mxu0 }
  0xe5   : > { %v5067_v36 = vmul.f32 -1.442695, %v515_v33  ;;  %5475 = vpow2.f32 %v5069_v32  ;;  %v5845_v50 = vadd.f32 %v5280_v34, %v5818_v24 }
  0xe6   : > { %v527_v37 = vpop.f32.mrf.mxu0 }
  0xe7   : > { %5477 = vpow2.f32 %v5067_v36  ;;  %v5834_v39 = vadd.f32 %v5818_v24, %v527_v37  ;;  %v5072_v56 = vmul.f32 -1.442695, %v5845_v50 }
  0xe8   : > { %v5281_v38 = vpop.f32.mrf.mxu0  ;;  %5479 = vpow2.f32 %v5068_v35 }
  0xe9   : > { %v5070_v43 = vmul.f32 -1.442695, %v5834_v39  ;;  %v5842_v45 = vadd.f32 %v5281_v38, %v5818_v24 }
  0xea   : > { %v530_v40 = vpop.f32.mrf.mxu0 }
  0xeb   : > { %v5837_v41 = vadd.f32 %v5818_v24, %v530_v40  ;;  %v5073_v51 = vmul.f32 -1.442695, %v5842_v45 }
  0xec   : > { %v5284_v42 = vpop.f32.mrf.mxu0 }
  0xed   : > { %v5071_v44 = vmul.f32 -1.442695, %v5837_v41  ;;  %v5861_v8 = vadd.f32 %v5284_v42, %v5818_v24 }
  0xee   : > { %v543_v46 = vpop.f32.mrf.mxu0 }
  0xef   : > { %5481 = vpow2.f32 %v5071_v44  ;;  %v5853_v62 = vadd.f32 %v5818_v24, %v543_v46  ;;  %v5076_v16 = vmul.f32 -1.442695, %v5861_v8 }
  0xf0   : > { %v5474_v47 = vpop.eup %5473  ;;  %v5285_v48 = vpop.f32.mrf.mxu0  ;;  %5483 = vpow2.f32 %v5070_v43 }
  0xf1   : > { %v734_v49 = vadd.f32 1.0, %v5474_v47  ;;  %v5074_v2 = vmul.f32 -1.442695, %v5853_v62  ;;  %v5858_v5 = vadd.f32 %v5285_v48, %v5818_v24 }
  0xf2   : > { %v5476_v52 = vpop.eup %5475  ;;  %v546_v54 = vpop.f32.mrf.mxu0 }
  0xf3   : > { %5485 = vrcp.f32 %v734_v49  ;;  %v737_v58 = vadd.f32 1.0, %v5476_v52  ;;  %v5850_v59 = vadd.f32 %v5818_v24, %v546_v54  ;;  %v5077_v11 = vmul.f32 -1.442695, %v5858_v5 }
  0xf4   : > { %v5478_v53 = vpop.eup %5477  ;;  %5487 = vpow2.f32 %v5073_v51  ;;  %v5288_v60 = vpop.f32.mrf.mxu0 }
  0xf5   : > { %v735_v55 = vadd.f32 1.0, %v5478_v53  ;;  %v5480_v57 = vpop.eup %5479  ;;  %v5075_v63 = vmul.f32 -1.442695, %v5850_v59  ;;  %v5879_v37 = vadd.f32 %v5288_v60, %v5818_v24 }
  0xf6   : > { %v736_v61 = vadd.f32 1.0, %v5480_v57  ;;  %v559_v1 = vpop.f32.mrf.mxu0 }
  0xf7   : > { %5489 = vrcp.f32 %v735_v55  ;;  %v5870_v27 = vadd.f32 %v5818_v24, %v559_v1  ;;  %v5080_v46 = vmul.f32 -1.442695, %v5879_v37 }
  0xf8   : > { %5491 = vpow2.f32 %v5072_v56  ;;  %v5289_v6 = vpop.f32.mrf.mxu0 }
  0xf9   : > { %5493 = vrcp.f32 %v737_v58  ;;  %v5078_v35 = vmul.f32 -1.442695, %v5870_v27  ;;  %v5882_v42 = vadd.f32 %v5289_v6, %v5818_v24 }
  0xfa   : > { %5495 = vrcp.f32 %v736_v61  ;;  %v562_v13 = vpop.f32.mrf.mxu0 }
  0xfb   : > { %5497 = vpow2.f32 %v5075_v63  ;;  %v5867_v20 = vadd.f32 %v5818_v24, %v562_v13  ;;  %v5081_v48 = vmul.f32 -1.442695, %v5882_v42 }
  0xfc   : > { %v5482_v0 = vpop.eup %5481  ;;  %5499 = vpow2.f32 %v5074_v2  ;;  %v5292_v23 = vpop.f32.mrf.mxu0 }
  0xfd   : > { %v5484_v3 = vpop.eup %5483  ;;  %v739_v4 = vadd.f32 1.0, %v5482_v0  ;;  %v5079_v31 = vmul.f32 -1.442695, %v5867_v20  ;;  %v5903_v6 = vadd.f32 %v5292_v23, %v5818_v24 }
  0xfe   : > { %v738_v7 = vadd.f32 1.0, %v5484_v3 }
  0xff   : > { %5501 = vrcp.f32 %v739_v4 }
 0x100   : > { %v5486_v9 = vpop.eup %5485  ;;  %5503 = vrcp.f32 %v738_v7 }
 0x101   : > { %v5488_v10 = vpop.eup %5487  ;;  %v830_v14 = vmul.f32 %v5486_v9, %v5821_v26  ;;  %5505 = vpow2.f32 %v5077_v11 }
 0x102   : > { %v741_v19 = vadd.f32 1.0, %v5488_v10  ;;  %5507 = vpow2.f32 %v5076_v16 }
 0x104   : > { %v5490_v12 = vpop.eup %5489  ;;  %5509 = vrcp.f32 %v741_v19 }
 0x105   : > { %v831_v15 = vmul.f32 %v5490_v12, %v515_v33  ;;  %v5492_v17 = vpop.eup %5491  ;;  %v575_v33 = vpop.f32.mrf.mxu0 }
 0x106   : > { %v5494_v21 = vpop.eup %5493  ;;  %v740_v25 = vadd.f32 1.0, %v5492_v17  ;;  %v5891_v54 = vadd.f32 %v5818_v24, %v575_v33 }
 0x107   : > { %v862_v18 = vpack.c.bf16 %v831_v15, %v830_v14  ;;  %v5496_v26 = vpop.eup %5495  ;;  %v833_v29 = vmul.f32 %v5494_v21, %v5828_v30  ;;  %v5293_v43 = vpop.f32.mrf.mxu0 }
 0x108   : > { %v5498_v32 = vpop.eup %5497  ;;  %v832_v34 = vmul.f32 %v5496_v26, %v5824_v28  ;;  %5511 = vrcp.f32 %v740_v25  ;;  %v5906_v10 = vadd.f32 %v5293_v43, %v5818_v24 }
 0x109   : > { %5102 = vmatmul.mubr.msk.bf16.vlgmr.msra.gmra.mxu1 %vm7910_vm0, %v862_v18  ;;  %v5500_v36 = vpop.eup %5499  ;;  %v743_v40 = vadd.f32 1.0, %v5498_v32  ;;  %5513 = vpow2.f32 %v5079_v31  ;;  %v578_v51 = vpop.f32.mrf.mxu0 }
 0x10a   : > { %992 = vmatprep.mubr.bf16.mxu1 %v7918_v22  ;;  %v863_v38 = vpack.c.bf16 %v833_v29, %v832_v34  ;;  %v742_v44 = vadd.f32 1.0, %v5500_v36  ;;  %5515 = vpow2.f32 %v5078_v35  ;;  %v5894_v57 = vadd.f32 %v5818_v24, %v578_v51 }
 0x10b   : > { %5517 = vrcp.f32 %v743_v40  ;;  %v5296_v58 = vpop.f32.mrf.mxu0  ;;  %v5085_v16 = vmul.f32 -1.442695, %v5906_v10 }
 0x10c   : > { %v5502_v30 = vpop.eup %5501  ;;  %5519 = vrcp.f32 %v742_v44  ;;  %v5083_v0 = vmul.f32 -1.442695, %v5894_v57  ;;  %v5927_v43 = vadd.f32 %v5296_v58, %v5818_v24 }
 0x10d   : > { %v5504_v28 = vpop.eup %5503  ;;  %v835_v47 = vmul.f32 %v5502_v30, %v5837_v41  ;;  %5521 = vpow2.f32 %v5080_v46  ;;  %v591_v2 = vpop.f32.mrf.mxu0 }
 0x10e   : > { %v5506_v49 = vpop.eup %5505  ;;  %v834_v52 = vmul.f32 %v5504_v28, %v5834_v39  ;;  %5523 = vpow2.f32 %v5081_v48  ;;  %v5082_v39 = vmul.f32 -1.442695, %v5891_v54  ;;  %v5915_v23 = vadd.f32 %v5818_v24, %v591_v2 }
 0x10f   : > { %v5508_v53 = vpop.eup %5507  ;;  %v745_v56 = vadd.f32 1.0, %v5506_v49  ;;  %v5297_v11 = vpop.f32.mrf.mxu0  ;;  %v5088_v49 = vmul.f32 -1.442695, %v5927_v43 }
 0x110   : > { %v864_v55 = vpack.c.bf16 %v835_v47, %v834_v52  ;;  %v744_v60 = vadd.f32 1.0, %v5508_v53  ;;  %v5930_v46 = vadd.f32 %v5297_v11, %v5818_v24 }
 0x111   : > { %5103 = vmatmul.mubr.msk.bf16.gmra.mxu1 %vm7910_vm0, %v863_v38  ;;  %v5510_v41 = vpop.eup %5509  ;;  %5525 = vrcp.f32 %v745_v56  ;;  %v594_v18 = vpop.f32.mrf.mxu0 }
 0x112   : > { %1002 = vmatprep.mubr.bf16.mxu1 %v7918_v22  ;;  %v837_v63 = vmul.f32 %v5510_v41, %v5842_v45  ;;  %5527 = vrcp.f32 %v744_v60  ;;  %v5918_v29 = vadd.f32 %v5818_v24, %v594_v18  ;;  %v5089_v52 = vmul.f32 -1.442695, %v5930_v46 }
 0x113   : > { %5529 = vpow2.f32 %v5082_v39  ;;  %v5300_v31 = vpop.f32.mrf.mxu0 }
 0x114   : > { %5531 = vpow2.f32 %v5083_v0  ;;  %v5087_v35 = vmul.f32 -1.442695, %v5918_v29  ;;  %v5951_v11 = vadd.f32 %v5300_v31, %v5818_v24 }
 0x115   : > { %v5512_v61 = vpop.eup %5511  ;;  %v607_v38 = vpop.f32.mrf.mxu0 }
 0x116   : > { %v5514_v1 = vpop.eup %5513  ;;  %v836_v3 = vmul.f32 %v5512_v61, %v5845_v50  ;;  %v5084_v50 = vmul.f32 -1.442695, %v5903_v6  ;;  %v5939_v58 = vadd.f32 %v5818_v24, %v607_v38 }
 0x117   : > { %v5516_v4 = vpop.eup %5515  ;;  %v747_v9 = vadd.f32 1.0, %v5514_v1 }
 0x118   : > { %v865_v7 = vpack.c.bf16 %v837_v63, %v836_v3  ;;  %v5518_v45 = vpop.eup %5517  ;;  %v746_v12 = vadd.f32 1.0, %v5516_v4  ;;  %v5090_v1 = vmul.f32 -1.442695, %v5939_v58 }
 0x119   : > { %5104 = vmatmul.mubr.msk.bf16.gmra.mxu1 %vm7910_vm0, %v864_v55  ;;  %v5520_v13 = vpop.eup %5519  ;;  %v839_v15 = vmul.f32 %v5518_v45, %v5850_v59  ;;  %5533 = vrcp.f32 %v747_v9 }
 0x11a   : > { %1012 = vmatprep.mubr.bf16.mxu1 %v7918_v22  ;;  %v5522_v14 = vpop.eup %5521  ;;  %v838_v19 = vmul.f32 %v5520_v13, %v5853_v62  ;;  %5535 = vrcp.f32 %v746_v12  ;;  %v5086_v62 = vmul.f32 -1.442695, %v5915_v23 }
 0x11b   : > { %v5524_v17 = vpop.eup %5523  ;;  %v748_v21 = vadd.f32 1.0, %v5522_v14  ;;  %5537 = vpow2.f32 %v5084_v50 }
 0x11c   : > { %v866_v25 = vpack.c.bf16 %v839_v15, %v838_v19  ;;  %v749_v26 = vadd.f32 1.0, %v5524_v17  ;;  %5539 = vpow2.f32 %v5085_v16 }
 0x11d   : > { %5541 = vrcp.f32 %v748_v21 }
 0x11e   : > { %v5526_v59 = vpop.eup %5525  ;;  %5543 = vrcp.f32 %v749_v26 }
 0x11f   : > { %v5528_v32 = vpop.eup %5527  ;;  %v841_v34 = vmul.f32 %v5526_v59, %v5858_v5  ;;  %5545 = vpow2.f32 %v5086_v62  ;;  %v5301_v5 = vpop.f32.mrf.mxu0 }
 0x120   : > { %v5530_v33 = vpop.eup %5529  ;;  %v840_v40 = vmul.f32 %v5528_v32, %v5861_v8  ;;  %5547 = vpow2.f32 %v5087_v35  ;;  %v5954_v15 = vadd.f32 %v5301_v5, %v5818_v24 }
 0x121   : > { %5105 = vmatmul.mubr.msk.bf16.gmra.mxu1 %vm7910_vm0, %v865_v7  ;;  %v5532_v36 = vpop.eup %5531  ;;  %v750_v30 = vadd.f32 1.0, %v5530_v33  ;;  %v610_v55 = vpop.f32.mrf.mxu0 }
 0x122   : > { %1022 = vmatprep.mubr.bf16.mxu1 %v7918_v22  ;;  %v867_v44 = vpack.c.bf16 %v841_v34, %v840_v40  ;;  %v751_v28 = vadd.f32 1.0, %v5532_v36  ;;  %v5942_v0 = vadd.f32 %v5818_v24, %v610_v55  ;;  %v5093_v21 = vmul.f32 -1.442695, %v5954_v15 }
 0x123   : > { %5549 = vrcp.f32 %v750_v30  ;;  %v5304_v60 = vpop.f32.mrf.mxu0 }
 0x124   : > { %5551 = vrcp.f32 %v751_v28  ;;  %v5091_v7 = vmul.f32 -1.442695, %v5942_v0  ;;  %v5975_v30 = vadd.f32 %v5304_v60, %v5818_v24 }
 0x125   : > { %5553 = vpow2.f32 %v5088_v49 }
 0x126   : > { %v5534_v47 = vpop.eup %5533  ;;  %5555 = vpow2.f32 %v5089_v52 }
 0x127   : > { %v5536_v48 = vpop.eup %5535  ;;  %v843_v51 = vmul.f32 %v5534_v47, %v5867_v20 }
 0x128   : > { %v5538_v8 = vpop.eup %5537  ;;  %v842_v56 = vmul.f32 %v5536_v48, %v5870_v27  ;;  %v623_v27 = vpop.f32.mrf.mxu0 }
 0x129   : > { %5106 = vmatmul.mubr.msk.bf16.gmra.mxu1 %vm7910_vm0, %v866_v25  ;;  %v5540_v53 = vpop.eup %5539  ;;  %v752_v41 = vadd.f32 1.0, %v5538_v8  ;;  %v5963_v26 = vadd.f32 %v5818_v24, %v623_v27  ;;  %v5096_v8 = vmul.f32 -1.442695, %v5975_v30 }
 0x12a   : > { %1032 = vmatprep.mubr.bf16.mxu1 %v7918_v22  ;;  %v5542_v61 = vpop.eup %5541  ;;  %v868_v39 = vpack.c.bf16 %v843_v51, %v842_v56  ;;  %v753_v63 = vadd.f32 1.0, %v5540_v53  ;;  %v5305_v12 = vpop.f32.mrf.mxu0 }
 0x12b   : > { %v5544_v20 = vpop.eup %5543  ;;  %5557 = vrcp.f32 %v752_v41  ;;  %v844_v3 = vmul.f32 %v5542_v61, %v5879_v37 }
 0x12c   : > { %v5546_v2 = vpop.eup %5545  ;;  %v845_v4 = vmul.f32 %v5544_v20, %v5882_v42  ;;  %5559 = vrcp.f32 %v753_v63  ;;  %v5092_v42 = vmul.f32 -1.442695, %v5951_v11  ;;  %v626_v16 = vpop.f32.mrf.mxu0 }
 0x12d   : > { %v5548_v9 = vpop.eup %5547  ;;  %v754_v45 = vadd.f32 1.0, %v5546_v2  ;;  %5561 = vpow2.f32 %v5090_v1  ;;  %v5966_v59 = vadd.f32 %v5818_v24, %v626_v16 }
 0x12e   : > { %v869_v50 = vpack.c.bf16 %v845_v4, %v844_v3  ;;  %v755_v14 = vadd.f32 1.0, %v5548_v9  ;;  %5563 = vpow2.f32 %v5091_v7 }
 0x12f   : > { %5565 = vrcp.f32 %v754_v45 }
 0x130   : > { %v5550_v13 = vpop.eup %5549  ;;  %5567 = vrcp.f32 %v755_v14 }
 0x131   : > { %5107 = vmatmul.mubr.msk.bf16.gmra.mxu1 %vm7910_vm0, %v867_v44  ;;  %v5552_v37 = vpop.eup %5551  ;;  %v846_v18 = vmul.f32 %v5550_v13, %v5891_v54  ;;  %5569 = vpow2.f32 %v5092_v42  ;;  %v5094_v54 = vmul.f32 -1.442695, %v5963_v26  ;;  %v5978_v44 = vadd.f32 %v5305_v12, %v5818_v24 }
 0x132   : > { %1042 = vmatprep.mubr.bf16.mxu1 %v7918_v22  ;;  %v5554_v17 = vpop.eup %5553  ;;  %v847_v19 = vmul.f32 %v5552_v37, %v5894_v57  ;;  %5571 = vpow2.f32 %v5093_v21  ;;  %v5095_v57 = vmul.f32 -1.442695, %v5966_v59 }
 0x133   : > { %v5556_v25 = vpop.eup %5555  ;;  %v756_v31 = vadd.f32 1.0, %v5554_v17 }
 0x134   : > { %v870_v62 = vpack.c.bf16 %v847_v19, %v846_v18  ;;  %v757_v33 = vadd.f32 1.0, %v5556_v25  ;;  %v7920_v25 = vlaneseq }
 0x135   : > { %5573 = vrcp.f32 %v756_v31 }
 0x136   : > { %5575 = vrcp.f32 %v757_v33 }
 0x137   : > { %5577 = vpow2.f32 %v5094_v54 }
 0x138   : > { %v5558_v32 = vpop.eup %5557  ;;  %5579 = vpow2.f32 %v5095_v57 }
 0x139   : > { %5108 = vmatmul.mubr.msk.bf16.gmra.mxu1 %vm7910_vm0, %v868_v39  ;;  %v5560_v34 = vpop.eup %5559  ;;  %v848_v36 = vmul.f32 %v5558_v32, %v5903_v6  ;;  %v5097_v6 = vmul.f32 -1.442695, %v5978_v44  ;;  %v1143_v32 = vld [vmem:[%s7907_s5] sm:$0x3] }
 0x13a   : > { %1052 = vmatprep.mubr.bf16.mxu1 %v7918_v22  ;;  %v5562_v35 = vpop.eup %5561  ;;  %v849_v38 = vmul.f32 %v5560_v34, %v5906_v10 }
 0x13b   : > { %v5564_v40 = vpop.eup %5563  ;;  %v758_v28 = vadd.f32 1.0, %v5562_v35 }
 0x13c   : > { %v5566_v47 = vpop.eup %5565  ;;  %v871_v5 = vpack.c.bf16 %v849_v38, %v848_v36  ;;  %v759_v48 = vadd.f32 1.0, %v5564_v40 }
 0x13d   : > { %v5568_v49 = vpop.eup %5567  ;;  %5581 = vrcp.f32 %v758_v28  ;;  %v850_v51 = vmul.f32 %v5566_v47, %v5915_v23 }
 0x13e   : > { %v5570_v10 = vpop.eup %5569  ;;  %v851_v24 = vmul.f32 %v5568_v49, %v5918_v29  ;;  %5583 = vrcp.f32 %v759_v48 }
 0x13f   : > { %v5572_v52 = vpop.eup %5571  ;;  %5585 = vpow2.f32 %v5096_v8  ;;  %v760_v53 = vadd.f32 1.0, %v5570_v10 }
 0x140   : > { %5587 = vpow2.f32 %v5097_v6  ;;  %v872_v56 = vpack.c.bf16 %v851_v24, %v850_v51  ;;  %v761_v41 = vadd.f32 1.0, %v5572_v52 }
 0x141   : > { %5109 = vmatmul.mubr.msk.bf16.gmra.mxu1 %vm7910_vm0, %v869_v50  ;;  %5589 = vrcp.f32 %v760_v53 }
 0x142   : > { %1062 = vmatprep.mubr.bf16.mxu1 %v7918_v22  ;;  %v5574_v55 = vpop.eup %5573  ;;  %5591 = vrcp.f32 %v761_v41 }
 0x143   : > { %v5576_v60 = vpop.eup %5575  ;;  %v852_v23 = vmul.f32 %v5574_v55, %v5927_v43 }
 0x144   : > { %v5578_v61 = vpop.eup %5577  ;;  %v853_v29 = vmul.f32 %v5576_v60, %v5930_v46 }
 0x145   : > { %v5580_v39 = vpop.eup %5579  ;;  %v762_v63 = vadd.f32 1.0, %v5578_v61 }
 0x146   : > { %v763_v20 = vadd.f32 1.0, %v5580_v39  ;;  %v873_v27 = vpack.c.bf16 %v853_v29, %v852_v23 }
 0x147   : > { %5593 = vrcp.f32 %v762_v63 }
 0x148   : > { %5595 = vrcp.f32 %v763_v20 }
 0x149   : > { %5110 = vmatmul.mubr.msk.bf16.gmra.mxu1 %vm7910_vm0, %v870_v62 }
 0x14a   : > { %1072 = vmatprep.mubr.bf16.mxu1 %v7918_v22  ;;  %v5582_v1 = vpop.eup %5581 }
 0x14b   : > { %v5584_v2 = vpop.eup %5583  ;;  %v854_v7 = vmul.f32 %v5582_v1, %v5939_v58 }
 0x14c   : > { %v5586_v3 = vpop.eup %5585  ;;  %v855_v43 = vmul.f32 %v5584_v2, %v5942_v0 }
 0x14d   : > { %v5588_v4 = vpop.eup %5587  ;;  %v764_v9 = vadd.f32 1.0, %v5586_v3 }
 0x14e   : > { %v765_v46 = vadd.f32 1.0, %v5588_v4  ;;  %v5590_v45 = vpop.eup %5589  ;;  %v874_v12 = vpack.c.bf16 %v855_v43, %v854_v7 }
 0x14f   : > { %v5592_v13 = vpop.eup %5591  ;;  %5597 = vrcp.f32 %v764_v9  ;;  %v856_v50 = vmul.f32 %v5590_v45, %v5951_v11 }
 0x150   : > { %5599 = vrcp.f32 %v765_v46  ;;  %v857_v14 = vmul.f32 %v5592_v13, %v5954_v15 }
 0x151   : > { %5111 = vmatmul.mubr.msk.bf16.gmra.mxu1 %vm7910_vm0, %v871_v5 }
 0x152   : > { %1082 = vmatprep.mubr.bf16.mxu1 %v7918_v22  ;;  %v875_v58 = vpack.c.bf16 %v857_v14, %v856_v50 }
 0x154   : > { %v5594_v37 = vpop.eup %5593 }
 0x155   : > { %v5596_v42 = vpop.eup %5595  ;;  %v858_v0 = vmul.f32 %v5594_v37, %v5963_v26  ;;  %v6008_v26 = vshrl.u32 %v7920_v25, 7 }
 0x156   : > { %v859_v16 = vmul.f32 %v5596_v42, %v5966_v59 }
 0x157   : > { %7951 = vst [vmem:[#allocation5_spill] sm:$0xff] %v6008_v26  ;;  %v6011_v59 = vsub.s32 0, %v6008_v26  ;;  %v6014_v31 = vsub.s32 1, %v6008_v26 }
 0x158   : > { %v876_v18 = vpack.c.bf16 %v859_v16, %v858_v0 }
 0x159   : > { %5112 = vmatmul.mubr.msk.bf16.gmra.mxu1 %vm7910_vm0, %v872_v56  ;;  %7952 = vst [vmem:[#allocation6_spill] sm:$0xff] %v6011_v59  ;;  %7953 = vst [vmem:[#allocation7_spill] sm:$0xff] %v6014_v31  ;;  %v6020_v34 = vrot.slane %v1143_v32, %v6011_v59  ;;  %v6023_v54 = vrot.slane %v1143_v32, %v6014_v31 }
 0x15a   : > { %1092 = vmatprep.mubr.bf16.mxu1 %v7918_v22 }
 0x15c   : > { %v5598_v17 = vpop.eup %5597 }
 0x15d   : > { %v5600_v19 = vpop.eup %5599  ;;  %v860_v21 = vmul.f32 %v5598_v17, %v5975_v30 }
 0x15e   : > { %v861_v11 = vmul.f32 %v5600_v19, %v5978_v44 }
 0x160   : > { %v877_v15 = vpack.c.bf16 %v861_v11, %v860_v21 }
 0x161   : > { %5113 = vmatmul.mubr.msk.bf16.gmra.mxu1 %vm7910_vm0, %v873_v27 }
 0x162   : > { %1102 = vmatprep.mubr.bf16.mxu1 %v7918_v22 }
 0x169   : > { %5114 = vmatmul.mubr.msk.bf16.gmra.mxu1 %vm7910_vm0, %v874_v12 }
 0x16a   : > { %1112 = vmatprep.mubr.bf16.mxu1 %v7918_v22 }
 0x171   : > { %5115 = vmatmul.mubr.msk.bf16.gmra.mxu1 %vm7910_vm0, %v875_v58 }
 0x172   : > { %1122 = vmatprep.mubr.bf16.mxu1 %v7918_v22 }
 0x179   : > { %5116 = vmatmul.mubr.msk.bf16.gmra.mxu1 %vm7910_vm0, %v876_v18 }
 0x17a   : > { %1132 = vmatprep.mubr.bf16.mxu1 %v7918_v22 }
 0x181   : > { %5117 = vmatmul.mubr.msk.bf16.gmra.mxu1 %vm7910_vm0, %v877_v15 }
 0x1c9   : > { %v984_v62 = vpop.f32.mrf.mxu1 }
 0x1ca   : > { %v1144_v33 = vmul.f32 2.0, %v984_v62 }
 0x1cb   : > { %v986_v57 = vpop.f32.mrf.mxu1 }
 0x1cc   : > { %v1145_v35 = vmul.f32 2.0, %v986_v57  ;;  %v6026_v38 = vsub.f32 %v6020_v34, %v1144_v33 }
 0x1cd   : > { %v988_v36 = vpop.f32.mrf.mxu1 }
 0x1ce   : > { %v6029_v40 = vsub.f32 %v6023_v54, %v1145_v35  ;;  %v1146_v30 = vmul.f32 2.0, %v988_v36 }
 0x1cf   : > { %v990_v44 = vpop.f32.mrf.mxu1 }
 0x1d0   : > { %v1147_v28 = vmul.f32 2.0, %v990_v44  ;;  %vm1286_vm1 = vcmp.le.f32.partialorder %v6026_v38, %v6029_v40  ;;  %v6039_v48 = vsub.f32 %v6020_v34, %v1146_v30 }
 0x1d1   : > { %v994_v47 = vpop.f32.mrf.mxu1  ;;  %v1287_v5 = vsel %vm1286_vm1, %v6026_v38, %v6029_v40 }
 0x1d2   : > { %v6042_v49 = vsub.f32 %v6023_v54, %v1147_v28  ;;  %v1148_v8 = vmul.f32 2.0, %v994_v47  ;;  %1289 = vmin.index.xlane.f32.xlu0 %v1287_v5 }
 0x1d3   : > { %v996_v6 = vpop.f32.mrf.mxu1 }
 0x1d4   : > { %v1149_v10 = vmul.f32 2.0, %v996_v6  ;;  %vm1294_vm2 = vcmp.le.f32.partialorder %v6039_v48, %v6042_v49  ;;  %v6052_v52 = vsub.f32 %v6020_v34, %v1148_v8 }
 0x1d5   : > { %v998_v51 = vpop.f32.mrf.mxu1  ;;  %v1295_v24 = vsel %vm1294_vm2, %v6039_v48, %v6042_v49 }
 0x1d6   : > { %v6055_v53 = vsub.f32 %v6023_v54, %v1149_v10  ;;  %v1150_v55 = vmul.f32 2.0, %v998_v51  ;;  %1297 = vmin.index.xlane.f32.xlu1 %v1295_v24 }
 0x1d7   : > { %v1000_v56 = vpop.f32.mrf.mxu1 }
 0x1d8   : > { %v1151_v41 = vmul.f32 2.0, %v1000_v56  ;;  %vm1302_vm3 = vcmp.le.f32.partialorder %v6052_v52, %v6055_v53  ;;  %v6065_v39 = vsub.f32 %v6020_v34, %v1150_v55 }
 0x1d9   : > { %v1004_v60 = vpop.f32.mrf.mxu1  ;;  %v1303_v61 = vsel %vm1302_vm3, %v6052_v52, %v6055_v53 }
 0x1da   : > { %v6068_v23 = vsub.f32 %v6023_v54, %v1151_v41  ;;  %v1152_v29 = vmul.f32 2.0, %v1004_v60  ;;  %1305 = vmin.index.xlane.f32.xlu1 %v1303_v61 }
 0x1db   : > { %v1006_v63 = vpop.f32.mrf.mxu1 }
 0x1dc   : > { %v1153_v20 = vmul.f32 2.0, %v1006_v63  ;;  %vm1310_vm4 = vcmp.le.f32.partialorder %v6065_v39, %v6068_v23  ;;  %v6078_v2 = vsub.f32 %v6020_v34, %v1152_v29 }
 0x1dd   : > { %v1008_v1 = vpop.f32.mrf.mxu1  ;;  %v1311_v27 = vsel %vm1310_vm4, %v6065_v39, %v6068_v23 }
 0x1de   : > { %v6081_v3 = vsub.f32 %v6023_v54, %v1153_v20  ;;  %v1154_v4 = vmul.f32 2.0, %v1008_v1  ;;  %1313 = vmin.index.xlane.f32.xlu0 %v1311_v27 }
 0x1df   : > { %v1010_v7 = vpop.f32.mrf.mxu1 }
 0x1e0   : > { %v1155_v43 = vmul.f32 2.0, %v1010_v7  ;;  %vm1318_vm5 = vcmp.le.f32.partialorder %v6078_v2, %v6081_v3  ;;  %v6091_v45 = vsub.f32 %v6020_v34, %v1154_v4 }
 0x1e1   : > { %v1014_v9 = vpop.f32.mrf.mxu1  ;;  %v1319_v46 = vsel %vm1318_vm5, %v6078_v2, %v6081_v3 }
 0x1e2   : > { %v6094_v12 = vsub.f32 %v6023_v54, %v1155_v43  ;;  %v1156_v13 = vmul.f32 2.0, %v1014_v9  ;;  %1321 = vmin.index.xlane.f32.xlu1 %v1319_v46 }
 0x1e3   : > { %v1016_v50 = vpop.f32.mrf.mxu1 }
 0x1e4   : > { %v1157_v14 = vmul.f32 2.0, %v1016_v50  ;;  %vm1326_vm6 = vcmp.le.f32.partialorder %v6091_v45, %v6094_v12  ;;  %v6104_v58 = vsub.f32 %v6020_v34, %v1156_v13 }
 0x1e5   : > { %v1018_v37 = vpop.f32.mrf.mxu1  ;;  %v1327_v42 = vsel %vm1326_vm6, %v6091_v45, %v6094_v12 }
 0x1e6   : > { %v6107_v0 = vsub.f32 %v6023_v54, %v1157_v14  ;;  %v1158_v16 = vmul.f32 2.0, %v1018_v37  ;;  %1329 = vmin.index.xlane.f32.xlu1 %v1327_v42 }
 0x1e7   : > { %v1020_v17 = vpop.f32.mrf.mxu1 }
 0x1e8   : > { %v1159_v18 = vmul.f32 2.0, %v1020_v17  ;;  %vm1334_vm7 = vcmp.le.f32.partialorder %v6104_v58, %v6107_v0  ;;  %v6117_v11 = vsub.f32 %v6020_v34, %v1158_v16 }
 0x1e9   : > { %v1024_v19 = vpop.f32.mrf.mxu1  ;;  %v1335_v21 = vsel %vm1334_vm7, %v6104_v58, %v6107_v0 }
 0x1ea   : > { %v6120_v15 = vsub.f32 %v6023_v54, %v1159_v18  ;;  %v1160_v32 = vmul.f32 2.0, %v1024_v19  ;;  %1337 = vmin.index.xlane.f32.xlu0 %v1335_v21 }
 0x1eb   : > { %v1026_v62 = vpop.f32.mrf.mxu1 }
 0x1ec   : > { %v1161_v33 = vmul.f32 2.0, %v1026_v62  ;;  %vm1342_vm8 = vcmp.le.f32.partialorder %v6117_v11, %v6120_v15  ;;  %v6130_v36 = vsub.f32 %v6020_v34, %v1160_v32 }
 0x1ed   : > { %v1028_v57 = vpop.f32.mrf.mxu1  ;;  %v1343_v35 = vsel %vm1342_vm8, %v6117_v11, %v6120_v15 }
 0x1ee   : > { %v6133_v30 = vsub.f32 %v6023_v54, %v1161_v33  ;;  %v1162_v44 = vmul.f32 2.0, %v1028_v57  ;;  %1345 = vmin.index.xlane.f32.xlu1 %v1343_v35 }
 0x1ef   : > { %v1030_v28 = vpop.f32.mrf.mxu1 }
 0x1f0   : > { %v1163_v47 = vmul.f32 2.0, %v1030_v28  ;;  %vm1350_vm9 = vcmp.le.f32.partialorder %v6130_v36, %v6133_v30  ;;  %v6143_v6 = vsub.f32 %v6020_v34, %v1162_v44 }
 0x1f1   : > { %v1034_v5 = vpop.f32.mrf.mxu1  ;;  %v1351_v8 = vsel %vm1350_vm9, %v6130_v36, %v6133_v30 }
 0x1f2   : > { %v6146_v10 = vsub.f32 %v6023_v54, %v1163_v47  ;;  %v1164_v51 = vmul.f32 2.0, %v1034_v5  ;;  %1353 = vmin.index.xlane.f32.xlu1 %v1351_v8 }
 0x1f3   : > { %v1036_v24 = vpop.f32.mrf.mxu1 }
 0x1f4   : > { %v1165_v55 = vmul.f32 2.0, %v1036_v24  ;;  %vm1358_vm10 = vcmp.le.f32.partialorder %v6143_v6, %v6146_v10  ;;  %v6156_v60 = vsub.f32 %v6020_v34, %v1164_v51 }
 0x1f5   : > { %v1038_v56 = vpop.f32.mrf.mxu1  ;;  %v1359_v41 = vsel %vm1358_vm10, %v6143_v6, %v6146_v10 }
 0x1f6   : > { %v6159_v61 = vsub.f32 %v6023_v54, %v1165_v55  ;;  %v1166_v29 = vmul.f32 2.0, %v1038_v56  ;;  %1361 = vmin.index.xlane.f32.xlu1 %v1359_v41 }
 0x1f7   : > { %v1040_v63 = vpop.f32.mrf.mxu1 }
 0x1f8   : > { %v1167_v20 = vmul.f32 2.0, %v1040_v63  ;;  %vm1366_vm11 = vcmp.le.f32.partialorder %v6156_v60, %v6159_v61  ;;  %v6169_v4 = vsub.f32 %v6020_v34, %v1166_v29 }
 0x1f9   : > { %v1044_v1 = vpop.f32.mrf.mxu1  ;;  %v1367_v27 = vsel %vm1366_vm11, %v6156_v60, %v6159_v61 }
 0x1fa   : > { %v6172_v7 = vsub.f32 %v6023_v54, %v1167_v20  ;;  %v1168_v43 = vmul.f32 2.0, %v1044_v1  ;;  %1369 = vmin.index.xlane.f32.xlu0 %v1367_v27 }
 0x1fb   : > { %v1046_v9 = vpop.f32.mrf.mxu1 }
 0x1fc   : > { %v1169_v46 = vmul.f32 2.0, %v1046_v9  ;;  %vm1374_vm12 = vcmp.le.f32.partialorder %v6169_v4, %v6172_v7  ;;  %v6182_v14 = vsub.f32 %v6020_v34, %v1168_v43 }
 0x1fd   : > { %v1048_v13 = vpop.f32.mrf.mxu1  ;;  %v1375_v50 = vsel %vm1374_vm12, %v6169_v4, %v6172_v7 }
 0x1fe   : > { %v6185_v37 = vsub.f32 %v6023_v54, %v1169_v46  ;;  %v1170_v42 = vmul.f32 2.0, %v1048_v13  ;;  %1377 = vmin.index.xlane.f32.xlu0 %v1375_v50 }
 0x1ff   : > { %v1050_v16 = vpop.f32.mrf.mxu1 }
 0x200   : > { %v1171_v17 = vmul.f32 2.0, %v1050_v16  ;;  %vm1382_vm13 = vcmp.le.f32.partialorder %v6182_v14, %v6185_v37  ;;  %v6195_v21 = vsub.f32 %v6020_v34, %v1170_v42 }
 0x201   : > { %v1054_v18 = vpop.f32.mrf.mxu1  ;;  %v1383_v19 = vsel %vm1382_vm13, %v6182_v14, %v6185_v37 }
 0x202   : > { %v6198_v32 = vsub.f32 %v6023_v54, %v1171_v17  ;;  %v1172_v62 = vmul.f32 2.0, %v1054_v18  ;;  %1385 = vmin.index.xlane.f32.xlu0 %v1383_v19 }
 0x203   : > { %v1056_v33 = vpop.f32.mrf.mxu1 }
 0x204   : > { %v1173_v57 = vmul.f32 2.0, %v1056_v33  ;;  %vm1390_vm14 = vcmp.le.f32.partialorder %v6195_v21, %v6198_v32  ;;  %v6208_v28 = vsub.f32 %v6020_v34, %v1172_v62 }
 0x205   : > { %v1058_v35 = vpop.f32.mrf.mxu1  ;;  %v1391_v44 = vsel %vm1390_vm14, %v6195_v21, %v6198_v32 }
 0x206   : > { %v6211_v47 = vsub.f32 %v6023_v54, %v1173_v57  ;;  %v1174_v5 = vmul.f32 2.0, %v1058_v35  ;;  %1393 = vmin.index.xlane.f32.xlu0 %v1391_v44 }
 0x207   : > { %v1060_v8 = vpop.f32.mrf.mxu1 }
 0x208   : > { %v1175_v51 = vmul.f32 2.0, %v1060_v8  ;;  %vm7911_vm15 = vcmp.le.f32.partialorder %v6208_v28, %v6211_v47  ;;  %v6221_v56 = vsub.f32 %v6020_v34, %v1174_v5 }
 0x209   : > { %v1064_v24 = vpop.f32.mrf.mxu1  ;;  %v1399_v55 = vsel %vm7911_vm15, %v6208_v28, %v6211_v47 }
 0x20a   : > { %v6224_v41 = vsub.f32 %v6023_v54, %v1175_v51  ;;  %v1176_v29 = vmul.f32 2.0, %v1064_v24  ;;  %1401 = vmin.index.xlane.f32.xlu0 %v1399_v55 }
 0x20b   : > { %v1066_v63 = vpop.f32.mrf.mxu1 }
 0x20c   : > { %v1177_v20 = vmul.f32 2.0, %v1066_v63  ;;  %vm7912_vm0 = vcmp.le.f32.partialorder %v6221_v56, %v6224_v41  ;;  %v6234_v43 = vsub.f32 %v6020_v34, %v1176_v29 }
 0x20d   : > { %v1068_v1 = vpop.f32.mrf.mxu1  ;;  %v1407_v27 = vsel %vm7912_vm0, %v6221_v56, %v6224_v41 }
 0x20e   : > { %v6237_v9 = vsub.f32 %v6023_v54, %v1177_v20  ;;  %v1178_v46 = vmul.f32 2.0, %v1068_v1  ;;  %1409 = vmin.index.xlane.f32.xlu0 %v1407_v27 }
 0x20f   : > { %v1070_v13 = vpop.f32.mrf.mxu1 }
 0x210   : > { %v1179_v50 = vmul.f32 2.0, %v1070_v13  ;;  %vm7913_vm15 = vcmp.le.f32.partialorder %v6234_v43, %v6237_v9  ;;  %v6247_v17 = vsub.f32 %v6020_v34, %v1178_v46  ;;  %v4645_v13 = vld [vmem:[%s7906_s4 + $0x78] sm:$0xff] }
 0x211   : > { %v1074_v42 = vpop.f32.mrf.mxu1  ;;  %v1415_v16 = vsel %vm7913_vm15, %v6234_v43, %v6237_v9 }
 0x212   : > { %v6250_v18 = vsub.f32 %v6023_v54, %v1179_v50  ;;  %v1180_v19 = vmul.f32 2.0, %v1074_v42  ;;  %1417 = vmin.index.xlane.f32.xlu0 %v1415_v16  ;;  %v5664_v16 = vmov 0.0  }
 0x213   : > { %v1076_v62 = vpop.f32.mrf.mxu1  ;;  %4662 = vmatprep.subr.mxu0 %v5664_v16  ;;  %5306 = vmatprep.subr.mxu1 %v5664_v16 }
 0x214   : > { %v1181_v33 = vmul.f32 2.0, %v1076_v62  ;;  %vm7914_vm0 = vcmp.le.f32.partialorder %v6247_v17, %v6250_v18  ;;  %v6260_v44 = vsub.f32 %v6020_v34, %v1180_v19  ;;  %4663 = vmatpush1.msra.mxu0 %v4645_v13  ;;  %5338 = vmatpush1.msra.mxu1 %v4645_v13 }
 0x215   : > { %v1078_v57 = vpop.f32.mrf.mxu1  ;;  %v1423_v35 = vsel %vm7914_vm0, %v6247_v17, %v6250_v18  ;;  %4664 = vmatprep.subr.mxu0 %v5664_v16  ;;  %5307 = vmatprep.subr.mxu1 %v5664_v16 }
 0x216   : > { %v6263_v5 = vsub.f32 %v6023_v54, %v1181_v33  ;;  %v1182_v8 = vmul.f32 2.0, %v1078_v57  ;;  %1425 = vmin.index.xlane.f32.xlu0 %v1423_v35 }
 0x217   : > { %v1080_v51 = vpop.f32.mrf.mxu1 }
 0x218   : > { %v1183_v24 = vmul.f32 2.0, %v1080_v51  ;;  %vm7938_vm15 = vcmp.le.f32.partialorder %v6260_v44, %v6263_v5  ;;  %v6273_v63 = vsub.f32 %v6020_v34, %v1182_v8  ;;  %v4644_v8 = vld [vmem:[%s7906_s4 + $0x70] sm:$0xff]  ;;  %v4643_v51 = vld [vmem:[%s7906_s4 + $0x68] sm:$0xff] }
 0x219   : > { %v1084_v55 = vpop.f32.mrf.mxu1  ;;  %v1431_v29 = vsel %vm7938_vm15, %v6260_v44, %v6263_v5  ;;  %4665 = vmatpush1.msra.mxu0 %v4644_v8  ;;  %5339 = vmatpush1.msra.mxu1 %v4644_v8 }
 0x21a   : > { %v6276_v20 = vsub.f32 %v6023_v54, %v1183_v24  ;;  %v1184_v1 = vmul.f32 2.0, %v1084_v55  ;;  %1433 = vmin.index.xlane.f32.xlu0 %v1431_v29  ;;  %4666 = vmatprep.subr.mxu0 %v5664_v16 }
 0x21b   : > { %v1086_v27 = vpop.f32.mrf.mxu1  ;;  %4667 = vmatpush1.msra.mxu0 %v4643_v51  ;;  %5308 = vmatprep.subr.mxu1 %v5664_v16 }
 0x21c   : > { %v1185_v46 = vmul.f32 2.0, %v1086_v27  ;;  %vm7915_vm0 = vcmp.le.f32.partialorder %v6273_v63, %v6276_v20  ;;  %v6291_v19 = vsub.f32 %v6020_v34, %v1184_v1  ;;  %4668 = vmatprep.subr.mxu0 %v5664_v16  ;;  %5340 = vmatpush1.msra.mxu1 %v4643_v51 }
 0x21d   : > { %v1088_v50 = vpop.f32.mrf.mxu1  ;;  %v1439_v42 = vsel %vm7915_vm0, %v6273_v63, %v6276_v20  ;;  %5309 = vmatprep.subr.mxu1 %v5664_v16 }
 0x21e   : > { %v6294_v62 = vsub.f32 %v6023_v54, %v1185_v46  ;;  %v1186_v33 = vmul.f32 2.0, %v1088_v50  ;;  %1441 = vmin.index.xlane.f32.xlu0 %v1439_v42  ;;  %v4642_v50 = vld [vmem:[%s7906_s4 + $0x60] sm:$0xff]  ;;  %v4641_v42 = vld [vmem:[%s7906_s4 + $0x58] sm:$0xff] }
 0x21f   : > { %v1090_v57 = vpop.f32.mrf.mxu1  ;;  %4669 = vmatpush1.msra.mxu0 %v4642_v50  ;;  %5341 = vmatpush1.msra.mxu1 %v4642_v50 }
 0x220   : > { %v1187_v35 = vmul.f32 2.0, %v1090_v57  ;;  %vm7916_vm0 = vcmp.le.f32.partialorder %v6291_v19, %v6294_v62  ;;  %v6312_v29 = vsub.f32 %v6020_v34, %v1186_v33  ;;  %4670 = vmatprep.subr.mxu0 %v5664_v16  ;;  %5310 = vmatprep.subr.mxu1 %v5664_v16 }
 0x221   : > { %v1094_v24 = vpop.f32.mrf.mxu1  ;;  %v1447_v55 = vsel %vm7916_vm0, %v6291_v19, %v6294_v62  ;;  %4671 = vmatpush1.msra.mxu0 %v4641_v42  ;;  %5342 = vmatpush1.msra.mxu1 %v4641_v42  ;;  %v4638_v42 = vld [vmem:[%s7906_s4 + $0x40] sm:$0xff] }
 0x222   : > { %7954 = vst [vmem:[#allocation8_spill] sm:$0xff] %v6312_v29  ;;  %v6315_v1 = vsub.f32 %v6023_v54, %v1187_v35  ;;  %v1188_v27 = vmul.f32 2.0, %v1094_v24  ;;  %1449 = vmin.index.xlane.f32.xlu0 %v1447_v55  ;;  %4672 = vmatprep.subr.mxu0 %v5664_v16 }
 0x223   : > { %v1096_v46 = vpop.f32.mrf.mxu1  ;;  %5311 = vmatprep.subr.mxu1 %v5664_v16 }
 0x224   : > { %7955 = vst [vmem:[#allocation9_spill] sm:$0xff] %v6315_v1  ;;  %v1189_v13 = vmul.f32 2.0, %v1096_v46  ;;  %vm7917_vm0 = vcmp.le.f32.partialorder %v6312_v29, %v6315_v1  ;;  %v6335_v35 = vsub.f32 %v6020_v34, %v1188_v27  ;;  %v4640_v27 = vld [vmem:[%s7906_s4 + $0x50] sm:$0xff]  ;;  %v4639_v46 = vld [vmem:[%s7906_s4 + $0x48] sm:$0xff] }
 0x225   : > { %v1098_v33 = vpop.f32.mrf.mxu1  ;;  %v1455_v57 = vsel %vm7917_vm0, %v6312_v29, %v6315_v1  ;;  %4673 = vmatpush1.msra.mxu0 %v4640_v27  ;;  %5343 = vmatpush1.msra.mxu1 %v4640_v27 }
 0x226   : > { %7956 = vst [vmem:[#allocation10_spill] sm:$0xff] %v6335_v35  ;;  %v6338_v8 = vsub.f32 %v6023_v54, %v1189_v13  ;;  %v1190_v24 = vmul.f32 2.0, %v1098_v33  ;;  %1457 = vmin.index.xlane.f32.xlu0 %v1455_v57  ;;  %4674 = vmatprep.subr.mxu0 %v5664_v16 }
 0x227   : > { %v1100_v51 = vpop.f32.mrf.mxu1  ;;  %4675 = vmatpush1.msra.mxu0 %v4639_v46  ;;  %5312 = vmatprep.subr.mxu1 %v5664_v16 }
 0x228   : > { %7957 = vst [vmem:[#allocation11_spill] sm:$0xff] %v6338_v8  ;;  %v1191_v55 = vmul.f32 2.0, %v1100_v51  ;;  %vm7922_vm0 = vcmp.le.f32.partialorder %v6335_v35, %v6338_v8  ;;  %v6357_v33 = vsub.f32 %v6020_v34, %v1190_v24  ;;  %4676 = vmatprep.subr.mxu0 %v5664_v16  ;;  %v4637_v24 = vld [vmem:[%s7906_s4 + $0x38] sm:$0xff]  ;;  %5344 = vmatpush1.msra.mxu1 %v4639_v46 }
 0x229   : > { %v1104_v13 = vpop.f32.mrf.mxu1  ;;  %v1463_v50 = vsel %vm7922_vm0, %v6335_v35, %v6338_v8  ;;  %4677 = vmatpush1.msra.mxu0 %v4638_v42  ;;  %5313 = vmatprep.subr.mxu1 %v5664_v16 }
 0x22a   : > { %7958 = vst [vmem:[#allocation12_spill] sm:$0xff] %v6357_v33  ;;  %v6360_v57 = vsub.f32 %v6023_v54, %v1191_v55  ;;  %v1192_v51 = vmul.f32 2.0, %v1104_v13  ;;  %1465 = vmin.index.xlane.f32.xlu0 %v1463_v50  ;;  %4678 = vmatprep.subr.mxu0 %v5664_v16 }
 0x22b   : > { %v1106_v22 = vpop.f32.mrf.mxu1  ;;  %4679 = vmatpush1.msra.mxu0 %v4637_v24  ;;  %5345 = vmatpush1.msra.mxu1 %v4638_v42 }
 0x22c   : > { %7959 = vst [vmem:[#allocation13_spill] sm:$0xff] %v6360_v57  ;;  %v1193_v25 = vmul.f32 2.0, %v1106_v22  ;;  %vm7925_vm0 = vcmp.le.f32.partialorder %v6357_v33, %v6360_v57  ;;  %v6380_v13 = vsub.f32 %v6020_v34, %v1192_v51  ;;  %4680 = vmatprep.subr.mxu0 %v5664_v16  ;;  %v4636_v51 = vld [vmem:[%s7906_s4 + $0x30] sm:$0xff]  ;;  %5314 = vmatprep.subr.mxu1 %v5664_v16 }
 0x22d   : > { %v1108_v55 = vpop.f32.mrf.mxu1  ;;  %v1471_v22 = vsel %vm7925_vm0, %v6357_v33, %v6360_v57  ;;  %4681 = vmatpush1.msra.mxu0 %v4636_v51  ;;  %5346 = vmatpush1.msra.mxu1 %v4637_v24 }
 0x22e   : > { %7960 = vst [vmem:[#allocation14_spill] sm:$0xff] %v6380_v13  ;;  %v6383_v50 = vsub.f32 %v6023_v54, %v1193_v25  ;;  %v1194_v8 = vmul.f32 2.0, %v1108_v55  ;;  %1473 = vmin.index.xlane.f32.xlu0 %v1471_v22  ;;  %v4635_v25 = vld [vmem:[%s7906_s4 + $0x28] sm:$0xff]  ;;  %4682 = vmatprep.subr.mxu0 %v5664_v16 }
 0x22f   : > { %v1110_v27 = vpop.f32.mrf.mxu1  ;;  %4683 = vmatpush1.msra.mxu0 %v4635_v25  ;;  %5315 = vmatprep.subr.mxu1 %v5664_v16 }
 0x230   : > { %7961 = vst [vmem:[#allocation15_spill] sm:$0xff] %v6383_v50  ;;  %v1195_v35 = vmul.f32 2.0, %v1110_v27  ;;  %vm7929_vm0 = vcmp.le.f32.partialorder %v6380_v13, %v6383_v50  ;;  %v6402_v22 = vsub.f32 %v6020_v34, %v1194_v8  ;;  %4684 = vmatprep.subr.mxu0 %v5664_v16  ;;  %v4634_v8 = vld [vmem:[%s7906_s4 + $0x20] sm:$0xff]  ;;  %5347 = vmatpush1.msra.mxu1 %v4636_v51 }
 0x231   : > { %v1114_v55 = vpop.f32.mrf.mxu1  ;;  %v1479_v46 = vsel %vm7929_vm0, %v6380_v13, %v6383_v50  ;;  %4685 = vmatpush1.msra.mxu0 %v4634_v8  ;;  %5316 = vmatprep.subr.mxu1 %v5664_v16 }
 0x232   : > { %7962 = vst [vmem:[#allocation16_spill] sm:$0xff] %v6402_v22  ;;  %v6405_v27 = vsub.f32 %v6023_v54, %v1195_v35  ;;  %v1196_v57 = vmul.f32 2.0, %v1114_v55  ;;  %1481 = vmin.index.xlane.f32.xlu0 %v1479_v46  ;;  %v4633_v35 = vld [vmem:[%s7906_s4 + $0x18] sm:$0xff]  ;;  %4686 = vmatprep.subr.mxu0 %v5664_v16 }
 0x233   : > { %v1116_v33 = vpop.f32.mrf.mxu1  ;;  %4687 = vmatpush1.msra.mxu0 %v4633_v35  ;;  %5348 = vmatpush1.msra.mxu1 %v4635_v25 }
 0x234   : > { %7963 = vst [vmem:[#allocation17_spill] sm:$0xff] %v6405_v27  ;;  %v1197_v1 = vmul.f32 2.0, %v1116_v33  ;;  %vm7932_vm0 = vcmp.le.f32.partialorder %v6402_v22, %v6405_v27  ;;  %v6425_v55 = vsub.f32 %v6020_v34, %v1196_v57  ;;  %4688 = vmatprep.subr.mxu0 %v5664_v16  ;;  %v4632_v57 = vld [vmem:[%s7906_s4 + $0x10] sm:$0xff]  ;;  %5317 = vmatprep.subr.mxu1 %v5664_v16 }
 0x235   : > { %v1118_v42 = vpop.f32.mrf.mxu1  ;;  %v1487_v33 = vsel %vm7932_vm0, %v6402_v22, %v6405_v27  ;;  %4689 = vmatpush1.msra.mxu0 %v4632_v57  ;;  %5349 = vmatpush1.msra.mxu1 %v4634_v8 }
 0x236   : > { %v6428_v46 = vsub.f32 %v6023_v54, %v1197_v1  ;;  %v1198_v50 = vmul.f32 2.0, %v1118_v42  ;;  %1489 = vmin.index.xlane.f32.xlu0 %v1487_v33  ;;  %v4631_v1 = vld [vmem:[%s7906_s4 + $0x8] sm:$0xff]  ;;  %4690 = vmatprep.subr.mxu0 %v5664_v16 }
 0x237   : > { %v1120_v24 = vpop.f32.mrf.mxu1  ;;  %4691 = vmatpush1.msra.mxu0 %v4631_v1  ;;  %5318 = vmatprep.subr.mxu1 %v5664_v16 }
 0x238   : > { %v1199_v13 = vmul.f32 2.0, %v1120_v24  ;;  %vm7942_vm0 = vcmp.le.f32.partialorder %v6425_v55, %v6428_v46  ;;  %v6447_v33 = vsub.f32 %v6020_v34, %v1198_v50  ;;  %4692 = vmatprep.subr.mxu0 %v5664_v16  ;;  %v4661_v50 = vld [vmem:[%s7906_s4 + $0xf8] sm:$0xff]  ;;  %5350 = vmatpush1.msra.mxu1 %v4633_v35 }
 0x239   : > { %v1124_v42 = vpop.f32.mrf.mxu1  ;;  %v1495_v51 = vsel %vm7942_vm0, %v6425_v55, %v6428_v46  ;;  %5319 = vmatprep.subr.mxu1 %v5664_v16 }
 0x23a   : > { %v6450_v24 = vsub.f32 %v6023_v54, %v1199_v13  ;;  %v1200_v27 = vmul.f32 2.0, %v1124_v42  ;;  %1497 = vmin.index.xlane.f32.xlu0 %v1495_v51  ;;  %v4630_v13 = vld [vmem:[%s7906_s4] sm:$0xff]  ;;  %5351 = vmatpush1.msra.mxu1 %v4632_v57 }
 0x23b   : > { %v1126_v22 = vpop.f32.mrf.mxu1  ;;  %4693 = vmatpush1.msra.mxu0 %v4630_v13  ;;  %5320 = vmatprep.subr.mxu1 %v5664_v16 }
 0x23c   : > { %v6455_v29 = vsub.f32 %v6020_v34, %v1200_v27  ;;  %v1201_v31 = vmul.f32 2.0, %v1126_v22  ;;  %vm7941_vm15 = vcmp.le.f32.partialorder %v6447_v33, %v6450_v24  ;;  %4694 = vmatprep.subr.mxu0 %v5664_v16  ;;  %5352 = vmatpush1.msra.mxu1 %v4631_v1  ;;  %v4656_v1 = vld [vmem:[%s7906_s4 + $0xd0] sm:$0xff] }
 0x23d   : > { %v1128_v25 = vpop.f32.mrf.mxu1  ;;  %v1503_v22 = vsel %vm7941_vm15, %v6447_v33, %v6450_v24  ;;  %4695 = vmatpush2.msra.mxu0 %v4661_v50  ;;  %5321 = vmatprep.subr.mxu1 %v5664_v16 }
 0x23e   : > { %7964 = vst [vmem:[#allocation18_spill] sm:$0xff] %v6455_v29  ;;  %v6473_v27 = vsub.f32 %v6023_v54, %v1201_v31  ;;  %v1202_v42 = vmul.f32 2.0, %v1128_v25  ;;  %1505 = vmin.index.xlane.f32.xlu1 %v1503_v22  ;;  %4696 = vmatprep.subr.mxu0 %v5664_v16  ;;  %v4660_v31 = vld [vmem:[%s7906_s4 + $0xf0] sm:$0xff]  ;;  %v4659_v25 = vld [vmem:[%s7906_s4 + $0xe8] sm:$0xff] }
 0x23f   : > { %v1130_v51 = vpop.f32.mrf.mxu1  ;;  %4697 = vmatpush2.msra.mxu0 %v4660_v31  ;;  %5353 = vmatpush1.msra.mxu1 %v4630_v13  ;;  %v4654_v13 = vld [vmem:[%s7906_s4 + $0xc0] sm:$0xff] }
 0x240   : > { %7965 = vst [vmem:[#allocation19_spill] sm:$0xff] %v6473_v27  ;;  %v6477_v8 = vsub.f32 %v6020_v34, %v1202_v42  ;;  %v1203_v59 = vmul.f32 2.0, %v1130_v51  ;;  %vm1510_vm15 = vcmp.le.f32.partialorder %v6455_v29, %v6473_v27  ;;  %4698 = vmatprep.subr.mxu0 %v5664_v16  ;;  %v4658_v42 = vld [vmem:[%s7906_s4 + $0xe0] sm:$0xff]  ;;  %v4655_v51 = vld [vmem:[%s7906_s4 + $0xc8] sm:$0xff]  ;;  %5322 = vmatprep.subr.mxu1 %v5664_v16 }
 0x241   : > { %v1511_v35 = vsel %vm1510_vm15, %v6455_v29, %v6473_v27  ;;  %4699 = vmatpush2.msra.mxu0 %v4659_v25  ;;  %5354 = vmatpush2.msra.mxu1 %v4661_v50  ;;  %v4652_v50 = vld [vmem:[%s7906_s4 + $0xb0] sm:$0xff]  ;;  %v4647_v27 = vld [vmem:[%s7906_s4 + $0x88] sm:$0xff]  ;;  %v1134_v30 = vpop.f32.mrf.mxu1 }
 0x242   : > { %v6495_v22 = vsub.f32 %v6023_v54, %v1203_v59  ;;  %1513 = vmin.index.xlane.f32.xlu0 %v1511_v35  ;;  %4700 = vmatprep.subr.mxu0 %v5664_v16  ;;  %v4657_v59 = vld [vmem:[%s7906_s4 + $0xd8] sm:$0xff] }
 0x243   : > { %4701 = vmatpush2.msra.mxu0 %v4658_v42  ;;  %5323 = vmatprep.subr.mxu1 %v5664_v16  ;;  %v4653_v35 = vld [vmem:[%s7906_s4 + $0xb8] sm:$0xff]  ;;  %v1136_v10 = vpop.f32.mrf.mxu1 }
 0x244   : > { %vm1518_vm0 = vcmp.le.f32.partialorder %v6477_v8, %v6495_v22  ;;  %4702 = vmatprep.subr.mxu0 %v5664_v16  ;;  %5355 = vmatpush2.msra.mxu1 %v4660_v31  ;;  %v4651_v31 = vld [vmem:[%s7906_s4 + $0xa8] sm:$0xff] }
 0x245   : > { %v1519_v57 = vsel %vm1518_vm0, %v6477_v8, %v6495_v22  ;;  %4703 = vmatpush2.msra.mxu0 %v4657_v59  ;;  %5324 = vmatprep.subr.mxu1 %v5664_v16  ;;  %v6725_v8 = vsub.s32 5, %v6008_v26  ;;  %v6728_v22 = vsub.s32 6, %v6008_v26 }
 0x246   : > { %1521 = vmin.index.xlane.f32.xlu0 %v1519_v57  ;;  %4704 = vmatprep.subr.mxu0 %v5664_v16 }
 0x247   : > { %4705 = vmatpush2.msra.mxu0 %v4656_v1  ;;  %5356 = vmatpush2.msra.mxu1 %v4659_v25  ;;  %v4650_v25 = vld [vmem:[%s7906_s4 + $0xa0] sm:$0xff] }
 0x248   : > { %4706 = vmatprep.subr.mxu0 %v5664_v16  ;;  %5325 = vmatprep.subr.mxu1 %v5664_v16 }
 0x249   : > { %4707 = vmatpush2.msra.mxu0 %v4655_v51  ;;  %5357 = vmatpush2.msra.mxu1 %v4658_v42  ;;  %v4649_v42 = vld [vmem:[%s7906_s4 + $0x98] sm:$0xff] }
 0x24a   : > { %4708 = vmatprep.subr.mxu0 %v5664_v16  ;;  %5326 = vmatprep.subr.mxu1 %v5664_v16 }
 0x24b   : > { %4709 = vmatpush2.msra.mxu0 %v4654_v13  ;;  %5358 = vmatpush2.msra.mxu1 %v4657_v59  ;;  %v7966_v59 = vlaneseq }
 0x24c   : > { %4710 = vmatprep.subr.mxu0 %v5664_v16  ;;  %5327 = vmatprep.subr.mxu1 %v5664_v16 }
 0x24d   : > { %4711 = vmatpush2.msra.mxu0 %v4653_v35  ;;  %5359 = vmatpush2.msra.mxu1 %v4656_v1  ;;  %v6556_v57 = vand.u32 127, %v7966_v59  ;;  %v4648_v1 = vld [vmem:[%s7906_s4 + $0x90] sm:$0xff]  ;;  %v4646_v59 = vld [vmem:[%s7906_s4 + $0x80] sm:$0xff] }
 0x24e   : > { %4712 = vmatprep.subr.mxu0 %v5664_v16  ;;  %5328 = vmatprep.subr.mxu1 %v5664_v16 }
 0x24f   : > { %4713 = vmatpush2.msra.mxu0 %v4652_v50  ;;  %5360 = vmatpush2.msra.mxu1 %v4655_v51 }
 0x250   : > { %4714 = vmatprep.subr.mxu0 %v5664_v16  ;;  %5329 = vmatprep.subr.mxu1 %v5664_v16 }
 0x251   : > { %4715 = vmatpush2.msra.mxu0 %v4651_v31  ;;  %5361 = vmatpush2.msra.mxu1 %v4654_v13  ;;  %v6569_v13 = vadd.s32 128, %v6556_v57 }
 0x252   : > { %4716 = vmatprep.subr.mxu0 %v5664_v16  ;;  %5330 = vmatprep.subr.mxu1 %v5664_v16 }
 0x253   : > { %4717 = vmatpush2.msra.mxu0 %v4650_v25  ;;  %5362 = vmatpush2.msra.mxu1 %v4653_v35  ;;  %v1288_v29 = vsel %vm1286_vm1, %v6556_v57, %v6569_v13  ;;  %v1304_v40 = vsel %vm1302_vm3, %v6556_v57, %v6569_v13  ;;  %v1312_v49 = vsel %vm1310_vm4, %v6556_v57, %v6569_v13 }
 0x254   : > { %4718 = vmatprep.subr.mxu0 %v5664_v16  ;;  %5331 = vmatprep.subr.mxu1 %v5664_v16  ;;  %v1320_v52 = vsel %vm1318_vm5, %v6556_v57, %v6569_v13  ;;  %v1328_v53 = vsel %vm1326_vm6, %v6556_v57, %v6569_v13  ;;  %v1336_v2 = vsel %vm1334_vm7, %v6556_v57, %v6569_v13 }
 0x255   : > { %4719 = vmatpush2.msra.mxu0 %v4649_v42  ;;  %5363 = vmatpush2.msra.mxu1 %v4652_v50  ;;  %v1344_v3 = vsel %vm1342_vm8, %v6556_v57, %v6569_v13  ;;  %v1360_v58 = vsel %vm1358_vm10, %v6556_v57, %v6569_v13  ;;  %v1368_v15 = vsel %vm1366_vm11, %v6556_v57, %v6569_v13 }
 0x256   : > { %4720 = vmatprep.subr.mxu0 %v5664_v16  ;;  %5332 = vmatprep.subr.mxu1 %v5664_v16  ;;  %v1376_v6 = vsel %vm1374_vm12, %v6556_v57, %v6569_v13  ;;  %v1384_v4 = vsel %vm1382_vm13, %v6556_v57, %v6569_v13  ;;  %v1392_v14 = vsel %vm1390_vm14, %v6556_v57, %v6569_v13 }
 0x257   : > { %4721 = vmatpush2.msra.mxu0 %v4648_v1  ;;  %5364 = vmatpush2.msra.mxu1 %v4651_v31  ;;  %v1296_v31 = vsel %vm1294_vm2, %v6556_v57, %v6569_v13  ;;  %vm7967_vm2 = vcmp.le.f32.partialorder %v6208_v28, %v6211_v47  ;;  %vm7968_vm3 = vcmp.le.f32.partialorder %v6221_v56, %v6224_v41 }
 0x258   : > { %4722 = vmatprep.subr.mxu0 %v5664_v16  ;;  %5333 = vmatprep.subr.mxu1 %v5664_v16  ;;  %v1408_v21 = vsel %vm7968_vm3, %v6556_v57, %v6569_v13  ;;  %vm7969_vm4 = vcmp.le.f32.partialorder %v6234_v43, %v6237_v9  ;;  %vm7970_vm5 = vcmp.le.f32.partialorder %v6247_v17, %v6250_v18 }
 0x259   : > { %4723 = vmatpush2.msra.mxu0 %v4647_v27  ;;  %5365 = vmatpush2.msra.mxu1 %v4650_v25  ;;  %v1416_v28 = vsel %vm7969_vm4, %v6556_v57, %v6569_v13  ;;  %v1424_v56 = vsel %vm7970_vm5, %v6556_v57, %v6569_v13  ;;  %vm7971_vm6 = vcmp.le.f32.partialorder %v6425_v55, %v6428_v46  ;;  %v5665_v46 = vmov 1966171168  }
 0x25a   : > { %4724 = vmatprep.subr.mxu0 %v5664_v16  ;;  %5334 = vmatprep.subr.mxu1 %v5664_v16  ;;  %v1496_v41 = vsel %vm7971_vm6, %v6556_v57, %v6569_v13  ;;  %vm7972_vm7 = vcmp.le.f32.partialorder %v6260_v44, %v6263_v5  ;;  %vm7973_vm8 = vcmp.le.f32.partialorder %v6273_v63, %v6276_v20  ;;  %v7974_v5 = vmov 0  }
 0x25b   : > { %v1290_v51 = vpop.xlane.xlu0 %1289  ;;  %4725 = vmatpush2.msra.mxu0 %v4646_v59  ;;  %5366 = vmatpush2.msra.mxu1 %v4649_v42  ;;  %v1204_v42 = vmul.f32 2.0, %v1134_v30  ;;  %v1432_v9 = vsel %vm7972_vm7, %v6556_v57, %v6569_v13  ;;  %v1440_v18 = vsel %vm7973_vm8, %v6556_v57, %v6569_v13  ;;  %v1520_v55 = vsel %vm1518_vm0, %v6556_v57, %v6569_v13 }
 0x25c   : > { %5415 = vset.pattern.permute.xlu0 %v1290_v51  ;;  %5335 = vmatprep.subr.mxu1 %v5664_v16  ;;  %v6719_v63 = vsub.s32 3, %v6008_v26  ;;  %v6722_v20 = vsub.s32 4, %v6008_v26  ;;  %vm7975_vm0 = vcmp.le.f32.partialorder %v6291_v19, %v6294_v62 }
 0x25d   : > { %5367 = vmatpush2.msra.mxu1 %v4648_v1  ;;  %v6642_v60 = vsub.f32 %v6020_v34, %v1204_v42 }
 0x25e   : > { %5336 = vmatprep.subr.mxu1 %v5664_v16 }
 0x25f   : > { %v1298_v35 = vpop.xlane.xlu1 %1297  ;;  %5368 = vmatpush2.msra.mxu1 %v4647_v27  ;;  %v1352_v27 = vsel %vm1350_vm9, %v6556_v57, %v6569_v13 }
 0x260   : > { %5416 = vset.pattern.permute.xlu1 %v1298_v35  ;;  %1292 = vperm.xlu0 %5415, %v1288_v29  }
 0x261   : > { %5337 = vmatprep.subr.mxu1 %v5664_v16 }
 0x262   : > { %5369 = vmatpush2.msra.mxu1 %v4646_v59  ;;  %v1205_v59 = vmul.f32 2.0, %v1136_v10 }
 0x263   : > { %v1306_v50 = vpop.xlane.xlu1 %1305 }
 0x264   : > { %1300 = vperm.xlu1 %5416, %v1296_v31   ;;  %5417 = vset.pattern.permute.xlu0 %v1306_v50  ;;  %v6645_v61 = vsub.f32 %v6023_v54, %v1205_v59 }
 0x266   : > { %vm1526_vm1 = vcmp.le.f32.partialorder %v6642_v60, %v6645_v61 }
 0x267   : > { %v1314_v38 = vpop.xlane.xlu0 %1313  ;;  %v1527_v35 = vsel %vm1526_vm1, %v6642_v60, %v6645_v61 }
 0x268   : > { %5418 = vset.pattern.permute.xlu1 %v1314_v38  ;;  %1308 = vperm.xlu0 %5417, %v1304_v40   ;;  %v1400_v38 = vsel %vm7967_vm2, %v6556_v57, %v6569_v13 }
 0x26b   : > { %v1322_v48 = vpop.xlane.xlu1 %1321 }
 0x26c   : > { %1316 = vperm.xlu1 %5418, %v1312_v49   ;;  %5419 = vset.pattern.permute.xlu0 %v1322_v48 }
 0x26f   : > { %v1330_v29 = vpop.xlane.xlu1 %1329 }
 0x270   : > { %5420 = vset.pattern.permute.xlu1 %v1330_v29  ;;  %1324 = vperm.xlu0 %5419, %v1320_v52   ;;  %v2571_v52 = vunpack.c.l.s4 %v5665_v46 }
 0x272   : > { %v2572_v44 = vunpack.c.0.s8 %v2571_v52 }
 0x273   : > { %v1338_v39 = vpop.xlane.xlu0 %1337 }
 0x274   : > { %1332 = vperm.xlu1 %5420, %v1328_v53   ;;  %v6716_v53 = vsub.s32 2, %v6008_v26 }
 0x277   : > { %v1346_v23 = vpop.xlane.xlu1 %1345 }
 0x278   : > { %5421 = vset.pattern.permute.xlu1 %v1338_v39  ;;  %5422 = vset.pattern.permute.xlu0 %v1346_v23  ;;  %v6731_v39 = vsub.s32 7, %v6008_v26 }
 0x27b   : > { %v1354_v16 = vpop.xlane.xlu1 %1353 }
 0x27c   : > { %1340 = vperm.xlu1 %5421, %v1336_v2   ;;  %1348 = vperm.xlu0 %5422, %v1344_v3   ;;  %v1448_v2 = vsel %vm7975_vm0, %v6556_v57, %v6569_v13  ;;  %v6741_v3 = vsub.s32 %v2572_v44, %v6008_v26  ;;  %v7981_v44 = vld [vmem:[#allocation10_spill] sm:$0xff] }
 0x27f   : > { %v1362_v45 = vpop.xlane.xlu1 %1361 }
 0x280   : > { %5423 = vset.pattern.permute.xlu1 %v1354_v16  ;;  %5424 = vset.pattern.permute.xlu0 %v1362_v45  ;;  %v7976_v45 = vld [vmem:[#allocation6_spill] sm:$0xff] }
 0x283   : > { %v1370_v12 = vpop.xlane.xlu0 %1369 }
 0x284   : > { %1356 = vperm.xlu1 %5423, %v1352_v27   ;;  %1364 = vperm.xlu0 %5424, %v1360_v58   ;;  %v7977_v27 = vld [vmem:[#allocation7_spill] sm:$0xff] }
 0x287   : > { %v1378_v0 = vpop.xlane.xlu0 %1377 }
 0x288   : > { %5425 = vset.pattern.permute.xlu1 %v1370_v12 }
 0x28b   : > { %v1386_v11 = vpop.xlane.xlu0 %1385 }
 0x28c   : > { %1372 = vperm.xlu1 %5425, %v1368_v15  }
 0x28f   : > { %v1394_v36 = vpop.xlane.xlu0 %1393 }
 0x290   : > { %5426 = vset.pattern.permute.xlu1 %v1378_v0  ;;  %v7945_v0 = vmov 1.0  }
 0x293   : > { %v1402_v25 = vpop.xlane.xlu0 %1401 }
 0x294   : > { %1380 = vperm.xlu1 %5426, %v1376_v6  }
 0x297   : > { %v1410_v1 = vpop.xlane.xlu0 %1409 }
 0x298   : > { %5427 = vset.pattern.permute.xlu1 %v1386_v11 }
 0x29b   : > { %v1418_v51 = vpop.xlane.xlu0 %1417 }
 0x29c   : > { %1388 = vperm.xlu1 %5427, %v1384_v4  }
 0x29f   : > { %v1426_v7 = vpop.xlane.xlu0 %1425 }
 0x2a0   : > { %5428 = vset.pattern.permute.xlu1 %v1394_v36 }
 0x2a3   : > { %v1434_v50 = vpop.xlane.xlu0 %1433  ;;  %1529 = vmin.index.xlane.f32.xlu0 %v1527_v35 }
 0x2a4   : > { %1396 = vperm.xlu1 %5428, %v1392_v14   ;;  %v7979_v14 = vld [vmem:[#allocation9_spill] sm:$0xff] }
 0x2a7   : > { %v1442_v37 = vpop.xlane.xlu0 %1441 }
 0x2a8   : > { %5429 = vset.pattern.permute.xlu1 %v1402_v25 }
 0x2ab   : > { %v1450_v31 = vpop.xlane.xlu0 %1449 }
 0x2ac   : > { %1404 = vperm.xlu1 %5429, %v1400_v38  }
 0x2af   : > { %v1458_v40 = vpop.xlane.xlu0 %1457 }
 0x2b0   : > { %5430 = vset.pattern.permute.xlu1 %v1410_v1 }
 0x2b3   : > { %v6669_v48 = vpop.xlane.xlu0 %1465 }
 0x2b4   : > { %1412 = vperm.xlu1 %5430, %v1408_v21  }
 0x2b7   : > { %v6676_v32 = vpop.xlane.xlu0 %1473 }
 0x2b8   : > { %5431 = vset.pattern.permute.xlu1 %v1418_v51 }
 0x2bb   : > { %v6678_v49 = vpop.xlane.xlu0 %1481 }
 0x2bc   : > { %1420 = vperm.xlu1 %5431, %v1416_v28  }
 0x2bf   : > { %v6685_v47 = vpop.xlane.xlu0 %1489 }
 0x2c0   : > { %5432 = vset.pattern.permute.xlu1 %v1426_v7 }
 0x2c3   : > { %v1498_v29 = vpop.xlane.xlu0 %1497 }
 0x2c4   : > { %1428 = vperm.xlu1 %5432, %v1424_v56   ;;  %5441 = vset.pattern.permute.xlu0 %v1498_v29 }
 0x2c7   : > { %v6733_v23 = vpop.xlane.xlu1 %1505 }
 0x2c8   : > { %5433 = vset.pattern.permute.xlu1 %v1434_v50  ;;  %1500 = vperm.xlu0 %5441, %v1496_v41   ;;  %v7978_v50 = vld [vmem:[#allocation8_spill] sm:$0xff] }
 0x2c9   : > { %vm7980_vm13 = vcmp.le.f32.partialorder %v7978_v50, %v7979_v14 }
 0x2cb   : > { %v6697_v43 = vpop.xlane.xlu0 %1513 }
 0x2cc   : > { %1436 = vperm.xlu1 %5433, %v1432_v9  }
 0x2cf   : > { %v1522_v17 = vpop.xlane.xlu0 %1521 }
 0x2d0   : > { %5434 = vset.pattern.permute.xlu1 %v1442_v37  ;;  %5444 = vset.pattern.permute.xlu0 %v1522_v17  ;;  %v1456_v37 = vsel %vm7980_vm13, %v6556_v57, %v6569_v13 }
 0x2d4   : > { %1444 = vperm.xlu1 %5434, %v1440_v18   ;;  %1524 = vperm.xlu0 %5444, %v1520_v55  }
 0x2d8   : > { %5435 = vset.pattern.permute.xlu1 %v1450_v31  ;;  %5447 = vset.pattern.permute.xlu0 %v7974_v5 }
 0x2db   : > { %v1293_v16 = vpop.permute.xlu0 %1292 }
 0x2dc   : > { %1452 = vperm.xlu1 %5435, %v1448_v2   ;;  %vm4439_vm9 = vcmp.eq.s32.totalorder %v6569_v13, %v1293_v16  ;;  %vm4438_vm10 = vcmp.eq.s32.totalorder %v6556_v57, %v1293_v16  ;;  %v1545_v12 = vrot.slane %v1293_v16, %v7976_v45  ;;  %v1549_v58 = vrot.slane %v1293_v16, %v7977_v27 }
 0x2dd   : > { %5182 = vmatprep.mubr.msk.f32.mxu0 %vm4439_vm9, %v7945_v0  ;;  %v1553_v11 = vrot.slane %v1293_v16, %v6716_v53  ;;  %v1557_v19 = vrot.slane %v1293_v16, %v6719_v63  ;;  %v1561_v62 = vrot.slane %v1293_v16, %v6722_v20  ;;  %v1565_v15 = vrot.slane %v1293_v16, %v6725_v8 }
 0x2de   : > { %5183 = vmatmul.mubr.msk.f32.vlgmr.msra.gmra.mxu0 %vm4438_vm10, %v7945_v0  ;;  %v1569_v36 = vrot.slane %v1293_v16, %v6728_v22  ;;  %v1573_v30 = vrot.slane %v1293_v16, %v6731_v39  ;;  %v2566_v25 = vcombine.low %v1545_v12, %v1549_v58  ;;  %v7982_v16 = vld [vmem:[#allocation11_spill] sm:$0xff] }
 0x2df   : > { %v6755_v6 = vpop.permute.xlu1 %1300  ;;  %v2567_v10 = vcombine.low %v1553_v11, %v1557_v19  ;;  %v2568_v42 = vcombine.low %v1561_v62, %v1565_v15  ;;  %vm7983_vm5 = vcmp.le.f32.partialorder %v7981_v44, %v7982_v16 }
 0x2e0   : > { %5436 = vset.pattern.permute.xlu1 %v1458_v40  ;;  %vm4441_vm11 = vcmp.eq.s32.totalorder %v6569_v13, %v6755_v6  ;;  %vm4440_vm12 = vcmp.eq.s32.totalorder %v6556_v57, %v6755_v6  ;;  %v2569_v59 = vcombine.low %v1569_v36, %v1573_v30  ;;  %v2576_v1 = vrot.slane %v2566_v25, %v6741_v3 }
 0x2e1   : > { %5184 = vmatprep.mubr.msk.f32.mxu0 %vm4441_vm11, %v7945_v0  ;;  %v2583_v51 = vrot.slane %v2567_v10, %v6741_v3  ;;  %v2590_v4 = vrot.slane %v2568_v42, %v6741_v3  ;;  %v1464_v2 = vsel %vm7983_vm5, %v6556_v57, %v6569_v13 }
 0x2e2   : > { %5185 = vmatmul.mubr.msk.f32.gmra.mxu0 %vm4440_vm12, %v7945_v0  ;;  %v2597_v7 = vrot.slane %v2569_v59, %v6741_v3 }
 0x2e3   : > { %v6767_v35 = vpop.permute.xlu0 %1308  ;;  %v2598_v31 = vcombine.low %v2576_v1, %v2583_v51 }
 0x2e4   : > { %1460 = vperm.xlu1 %5436, %v1456_v37   ;;  %vm4443_vm14 = vcmp.eq.s32.totalorder %v6569_v13, %v6767_v35  ;;  %vm4442_vm2 = vcmp.eq.s32.totalorder %v6556_v57, %v6767_v35  ;;  %v2599_v38 = vcombine.low %v2590_v4, %v2597_v7 }
 0x2e5   : > { %5186 = vmatprep.mubr.msk.f32.mxu0 %vm4443_vm14, %v7945_v0  ;;  %v2606_v40 = vrot.slane %v2598_v31, %v6741_v3  ;;  %v7984_v31 = vld [vmem:[#allocation12_spill] sm:$0xff] }
 0x2e6   : > { %5187 = vmatmul.mubr.msk.f32.gmra.mxu0 %vm4442_vm2, %v7945_v0  ;;  %v2613_v21 = vrot.slane %v2599_v38, %v6741_v3  ;;  %v7985_v38 = vld [vmem:[#allocation13_spill] sm:$0xff] }
 0x2e7   : > { %v1317_v28 = vpop.permute.xlu1 %1316  ;;  %vm7986_vm9 = vcmp.le.f32.partialorder %v7984_v31, %v7985_v38 }
 0x2e8   : > { %5437 = vset.pattern.permute.xlu1 %v6669_v48  ;;  %v2614_v29 = vcombine.low %v2606_v40, %v2613_v21  ;;  %vm4445_vm3 = vcmp.eq.s32.totalorder %v6569_v13, %v1317_v28  ;;  %vm4444_vm4 = vcmp.eq.s32.totalorder %v6556_v57, %v1317_v28  ;;  %v1641_v56 = vrot.slane %v1317_v28, %v7976_v45 }
 0x2e9   : > { %5188 = vmatprep.mubr.msk.f32.mxu0 %vm4445_vm3, %v7945_v0  ;;  %v1645_v41 = vrot.slane %v1317_v28, %v7977_v27  ;;  %v1649_v9 = vrot.slane %v1317_v28, %v6716_v53  ;;  %v1653_v17 = vrot.slane %v1317_v28, %v6719_v63  ;;  %v1657_v18 = vrot.slane %v1317_v28, %v6722_v20 }
 0x2ea   : > { %4135 = vperm.xlu0 %5447, %v2614_v29   ;;  %5189 = vmatmul.mubr.msk.f32.gmra.mxu0 %vm4444_vm4, %v7945_v0  ;;  %v1661_v48 = vrot.slane %v1317_v28, %v6725_v8  ;;  %v1665_v55 = vrot.slane %v1317_v28, %v6728_v22  ;;  %v1669_v46 = vrot.slane %v1317_v28, %v6731_v39 }
 0x2eb   : > { %v6795_v52 = vpop.permute.xlu0 %1324  ;;  %v2713_v12 = vcombine.low %v1641_v56, %v1645_v41  ;;  %v2714_v58 = vcombine.low %v1649_v9, %v1653_v17  ;;  %v1472_v40 = vsel %vm7986_vm9, %v6556_v57, %v6569_v13 }
 0x2ec   : > { %1468 = vperm.xlu1 %5437, %v1464_v2   ;;  %vm4447_vm6 = vcmp.eq.s32.totalorder %v6569_v13, %v6795_v52  ;;  %vm4446_vm7 = vcmp.eq.s32.totalorder %v6556_v57, %v6795_v52  ;;  %v2715_v11 = vcombine.low %v1657_v18, %v1661_v48  ;;  %v2716_v19 = vcombine.low %v1665_v55, %v1669_v46  ;;  %v7987_v2 = vld [vmem:[#allocation14_spill] sm:$0xff] }
 0x2ed   : > { %5190 = vmatprep.mubr.msk.f32.mxu0 %vm4447_vm6, %v7945_v0  ;;  %v2723_v62 = vrot.slane %v2713_v12, %v6741_v3  ;;  %v2730_v15 = vrot.slane %v2714_v58, %v6741_v3  ;;  %v7988_v12 = vld [vmem:[#allocation15_spill] sm:$0xff] }
 0x2ee   : > { %5191 = vmatmul.mubr.msk.f32.gmra.mxu0 %vm4446_vm7, %v7945_v0  ;;  %v2737_v36 = vrot.slane %v2715_v11, %v6741_v3  ;;  %v2744_v30 = vrot.slane %v2716_v19, %v6741_v3  ;;  %vm7989_vm13 = vcmp.le.f32.partialorder %v7987_v2, %v7988_v12 }
 0x2ef   : > { %v1333_v25 = vpop.permute.xlu1 %1332  ;;  %v2745_v10 = vcombine.low %v2723_v62, %v2730_v15  ;;  %v1480_v58 = vsel %vm7989_vm13, %v6556_v57, %v6569_v13 }
 0x2f0   : > { %5438 = vset.pattern.permute.xlu1 %v6676_v32  ;;  %vm4449_vm8 = vcmp.eq.s32.totalorder %v6569_v13, %v1333_v25  ;;  %vm4448_vm0 = vcmp.eq.s32.totalorder %v6556_v57, %v1333_v25  ;;  %v2746_v42 = vcombine.low %v2737_v36, %v2744_v30  ;;  %v1705_v59 = vrot.slane %v1333_v25, %v7976_v45 }
 0x2f1   : > { %5192 = vmatprep.mubr.msk.f32.mxu0 %vm4449_vm8, %v7945_v0  ;;  %v2753_v1 = vrot.slane %v2745_v10, %v6741_v3  ;;  %v1709_v51 = vrot.slane %v1333_v25, %v7977_v27  ;;  %v1713_v4 = vrot.slane %v1333_v25, %v6716_v53  ;;  %v1717_v7 = vrot.slane %v1333_v25, %v6719_v63 }
 0x2f2   : > { %5193 = vmatmul.mubr.msk.f32.gmra.mxu0 %vm4448_vm0, %v7945_v0  ;;  %v2760_v32 = vrot.slane %v2746_v42, %v6741_v3  ;;  %v1721_v50 = vrot.slane %v1333_v25, %v6722_v20  ;;  %v1725_v14 = vrot.slane %v1333_v25, %v6725_v8  ;;  %v1729_v37 = vrot.slane %v1333_v25, %v6728_v22 }
 0x2f3   : > { %v1733_v21 = vrot.slane %v1333_v25, %v6731_v39  ;;  %v2811_v28 = vcombine.low %v1705_v59, %v1709_v51  ;;  %v2812_v29 = vcombine.low %v1713_v4, %v1717_v7 }
 0x2f4   : > { %1476 = vperm.xlu1 %5438, %v1472_v40   ;;  %v2761_v56 = vcombine.low %v2753_v1, %v2760_v32  ;;  %v2813_v41 = vcombine.low %v1721_v50, %v1725_v14 }
 0x2f5   : > { %v2814_v9 = vcombine.low %v1729_v37, %v1733_v21  ;;  %v2821_v17 = vrot.slane %v2811_v28, %v6741_v3  ;;  %v2828_v18 = vrot.slane %v2812_v29, %v6741_v3  ;;  %v7990_v21 = vld [vmem:[#allocation16_spill] sm:$0xff]  ;;  %v7991_v28 = vld [vmem:[#allocation17_spill] sm:$0xff] }
 0x2f6   : > { %4144 = vperm.xlu0 %5447, %v2761_v56   ;;  %v2835_v48 = vrot.slane %v2813_v41, %v6741_v3  ;;  %vm7992_vm4 = vcmp.le.f32.partialorder %v7990_v21, %v7991_v28 }
 0x2f7   : > { %v6835_v55 = vpop.permute.xlu1 %1340  ;;  %v1349_v46 = vpop.permute.xlu0 %1348  ;;  %v2842_v44 = vrot.slane %v2814_v9, %v6741_v3  ;;  %v2843_v16 = vcombine.low %v2821_v17, %v2828_v18  ;;  %v1488_v29 = vsel %vm7992_vm4, %v6556_v57, %v6569_v13 }
 0x2f8   : > { %5439 = vset.pattern.permute.xlu1 %v6678_v49  ;;  %vm4451_vm10 = vcmp.eq.s32.totalorder %v6569_v13, %v6835_v55  ;;  %vm4450_vm11 = vcmp.eq.s32.totalorder %v6556_v57, %v6835_v55  ;;  %vm4453_vm12 = vcmp.eq.s32.totalorder %v6569_v13, %v1349_v46  ;;  %v1769_v49 = vrot.slane %v1349_v46, %v7976_v45 }
 0x2f9   : > { %5194 = vmatprep.mubr.msk.f32.mxu0 %vm4451_vm10, %v7945_v0  ;;  %v2844_v11 = vcombine.low %v2835_v48, %v2842_v44  ;;  %v2851_v19 = vrot.slane %v2843_v16, %v6741_v3  ;;  %v1773_v62 = vrot.slane %v1349_v46, %v7977_v27  ;;  %v1777_v15 = vrot.slane %v1349_v46, %v6716_v53 }
 0x2fa   : > { %5195 = vmatmul.mubr.msk.f32.gmra.mxu0 %vm4450_vm11, %v7945_v0  ;;  %v1781_v36 = vrot.slane %v1349_v46, %v6719_v63  ;;  %v1785_v30 = vrot.slane %v1349_v46, %v6722_v20  ;;  %v1789_v25 = vrot.slane %v1349_v46, %v6725_v8  ;;  %v1793_v42 = vrot.slane %v1349_v46, %v6728_v22 }
 0x2fb   : > { %5196 = vmatprep.mubr.msk.f32.mxu0 %vm4453_vm12, %v7945_v0  ;;  %v2858_v10 = vrot.slane %v2844_v11, %v6741_v3  ;;  %v1797_v59 = vrot.slane %v1349_v46, %v6731_v39  ;;  %v2909_v1 = vcombine.low %v1769_v49, %v1773_v62  ;;  %vm4452_vm14 = vcmp.eq.s32.totalorder %v6556_v57, %v1349_v46 }
 0x2fc   : > { %1484 = vperm.xlu1 %5439, %v1480_v58   ;;  %v2910_v51 = vcombine.low %v1777_v15, %v1781_v36  ;;  %v2911_v4 = vcombine.low %v1785_v30, %v1789_v25  ;;  %v1737_v26 = vrot.slane %v6835_v55, %v7976_v45 }
 0x2fd   : > { %v2859_v7 = vcombine.low %v2851_v19, %v2858_v10  ;;  %v2912_v32 = vcombine.low %v1793_v42, %v1797_v59  ;;  %v2919_v50 = vrot.slane %v2909_v1, %v6741_v3 }
 0x2fe   : > { %5197 = vmatmul.mubr.msk.f32.gmra.mxu0 %vm4452_vm14, %v7945_v0  ;;  %v2926_v14 = vrot.slane %v2910_v51, %v6741_v3  ;;  %v2933_v37 = vrot.slane %v2911_v4, %v6741_v3 }
 0x2ff   : > { %4150 = vperm.xlu0 %5447, %v2859_v7   ;;  %v6867_v31 = vpop.permute.xlu1 %1356  ;;  %v1365_v38 = vpop.permute.xlu0 %1364  ;;  %v2940_v40 = vrot.slane %v2912_v32, %v6741_v3 }
 0x300   : > { %5440 = vset.pattern.permute.xlu1 %v6685_v47  ;;  %vm4455_vm2 = vcmp.eq.s32.totalorder %v6569_v13, %v6867_v31  ;;  %vm4454_vm3 = vcmp.eq.s32.totalorder %v6556_v57, %v6867_v31  ;;  %v2941_v56 = vcombine.low %v2919_v50, %v2926_v14  ;;  %vm4457_vm5 = vcmp.eq.s32.totalorder %v6569_v13, %v1365_v38 }
 0x301   : > { %5198 = vmatprep.mubr.msk.f32.mxu0 %vm4455_vm2, %v7945_v0  ;;  %v2942_v41 = vcombine.low %v2933_v37, %v2940_v40  ;;  %v1833_v47 = vrot.slane %v1365_v38, %v7976_v45  ;;  %v1837_v9 = vrot.slane %v1365_v38, %v7977_v27  ;;  %v1841_v18 = vrot.slane %v1365_v38, %v6716_v53 }
 0x302   : > { %5199 = vmatmul.mubr.msk.f32.gmra.mxu0 %vm4454_vm3, %v7945_v0  ;;  %v2949_v17 = vrot.slane %v2941_v56, %v6741_v3  ;;  %v1845_v48 = vrot.slane %v1365_v38, %v6719_v63  ;;  %v1849_v46 = vrot.slane %v1365_v38, %v6722_v20  ;;  %v1853_v16 = vrot.slane %v1365_v38, %v6725_v8 }
 0x303   : > { %5200 = vmatprep.mubr.msk.f32.mxu0 %vm4457_vm5, %v7945_v0  ;;  %v2956_v44 = vrot.slane %v2942_v41, %v6741_v3  ;;  %v1857_v2 = vrot.slane %v1365_v38, %v6728_v22  ;;  %v1861_v12 = vrot.slane %v1365_v38, %v6731_v39  ;;  %v3007_v58 = vcombine.low %v1833_v47, %v1837_v9  ;;  %v1138_v41 = vpop.f32.mrf.mxu1 }
 0x304   : > { %1492 = vperm.xlu1 %5440, %v1488_v29   ;;  %v3008_v11 = vcombine.low %v1841_v18, %v1845_v48  ;;  %vm4456_vm6 = vcmp.eq.s32.totalorder %v6556_v57, %v1365_v38  ;;  %v3009_v49 = vcombine.low %v1849_v46, %v1853_v16 }
 0x305   : > { %v2957_v19 = vcombine.low %v2949_v17, %v2956_v44  ;;  %v3010_v62 = vcombine.low %v1857_v2, %v1861_v12  ;;  %v3017_v15 = vrot.slane %v3007_v58, %v6741_v3  ;;  %v1140_v16 = vpop.f32.mrf.mxu1 }
 0x306   : > { %5201 = vmatmul.mubr.msk.f32.gmra.mxu0 %vm4456_vm6, %v7945_v0  ;;  %v3024_v36 = vrot.slane %v3008_v11, %v6741_v3  ;;  %v3031_v25 = vrot.slane %v3009_v49, %v6741_v3  ;;  %v1206_v11 = vmul.f32 2.0, %v1138_v41 }
 0x307   : > { %4156 = vperm.xlu0 %5447, %v2957_v19   ;;  %v6898_v30 = vpop.permute.xlu1 %1372  ;;  %v3038_v10 = vrot.slane %v3010_v62, %v6741_v3  ;;  %v1207_v19 = vmul.f32 2.0, %v1140_v16 }
 0x308   : > { %5442 = vset.pattern.permute.xlu1 %v6733_v23  ;;  %vm4459_vm7 = vcmp.eq.s32.totalorder %v6569_v13, %v6898_v30  ;;  %vm4458_vm8 = vcmp.eq.s32.totalorder %v6556_v57, %v6898_v30  ;;  %v3039_v42 = vcombine.low %v3017_v15, %v3024_v36  ;;  %v6938_v62 = vsub.f32 %v6020_v34, %v1206_v11 }
 0x309   : > { %5202 = vmatprep.mubr.msk.f32.mxu0 %vm4459_vm7, %v7945_v0  ;;  %v3040_v59 = vcombine.low %v3031_v25, %v3038_v10  ;;  %v6941_v15 = vsub.f32 %v6023_v54, %v1207_v19  ;;  %vm7993_vm7 = vcmp.le.f32.partialorder %v6447_v33, %v6450_v24 }
 0x30a   : > { %5203 = vmatmul.mubr.msk.f32.gmra.mxu0 %vm4458_vm8, %v7945_v0  ;;  %v3047_v1 = vrot.slane %v3039_v42, %v6741_v3 }
 0x30b   : > { %v3054_v51 = vrot.slane %v3040_v59, %v6741_v3  ;;  %vm1534_vm14 = vcmp.le.f32.partialorder %v6938_v62, %v6941_v15 }
 0x30d   : > { %v3055_v4 = vcombine.low %v3047_v1, %v3054_v51 }
 0x30f   : > { %4162 = vperm.xlu0 %5447, %v3055_v4   ;;  %v1381_v7 = vpop.permute.xlu1 %1380 }
 0x310   : > { %vm4461_vm0 = vcmp.eq.s32.totalorder %v6569_v13, %v1381_v7  ;;  %vm4460_vm9 = vcmp.eq.s32.totalorder %v6556_v57, %v1381_v7  ;;  %v1897_v23 = vrot.slane %v1381_v7, %v7976_v45  ;;  %v1901_v32 = vrot.slane %v1381_v7, %v7977_v27 }
 0x311   : > { %5204 = vmatprep.mubr.msk.f32.mxu0 %vm4461_vm0, %v7945_v0  ;;  %v1905_v50 = vrot.slane %v1381_v7, %v6716_v53  ;;  %v1909_v14 = vrot.slane %v1381_v7, %v6719_v63  ;;  %v1913_v37 = vrot.slane %v1381_v7, %v6722_v20  ;;  %v1917_v38 = vrot.slane %v1381_v7, %v6725_v8 }
 0x312   : > { %5205 = vmatmul.mubr.msk.f32.gmra.mxu0 %vm4460_vm9, %v7945_v0  ;;  %v1921_v40 = vrot.slane %v1381_v7, %v6728_v22  ;;  %v1925_v21 = vrot.slane %v1381_v7, %v6731_v39  ;;  %v3105_v28 = vcombine.low %v1897_v23, %v1901_v32 }
 0x313   : > { %v3106_v29 = vcombine.low %v1905_v50, %v1909_v14  ;;  %v3107_v56 = vcombine.low %v1913_v37, %v1917_v38 }
 0x314   : > { %v3108_v47 = vcombine.low %v1921_v40, %v1925_v21  ;;  %v3115_v9 = vrot.slane %v3105_v28, %v6741_v3  ;;  %v1535_v21 = vsel %vm1534_vm14, %v6938_v62, %v6941_v15 }
 0x315   : > { %v3122_v17 = vrot.slane %v3106_v29, %v6741_v3  ;;  %v3129_v18 = vrot.slane %v3107_v56, %v6741_v3 }
 0x316   : > { %v3136_v48 = vrot.slane %v3108_v47, %v6741_v3 }
 0x317   : > { %v6927_v46 = vpop.permute.xlu1 %1388  ;;  %v3137_v44 = vcombine.low %v3115_v9, %v3122_v17 }
 0x318   : > { %vm4463_vm10 = vcmp.eq.s32.totalorder %v6569_v13, %v6927_v46  ;;  %vm4462_vm11 = vcmp.eq.s32.totalorder %v6556_v57, %v6927_v46  ;;  %v3138_v2 = vcombine.low %v3129_v18, %v3136_v48 }
 0x319   : > { %5206 = vmatprep.mubr.msk.f32.mxu0 %vm4463_vm10, %v7945_v0  ;;  %v3145_v12 = vrot.slane %v3137_v44, %v6741_v3 }
 0x31a   : > { %5207 = vmatmul.mubr.msk.f32.gmra.mxu0 %vm4462_vm11, %v7945_v0  ;;  %v3152_v58 = vrot.slane %v3138_v2, %v6741_v3 }
 0x31c   : > { %v3153_v49 = vcombine.low %v3145_v12, %v3152_v58 }
 0x31e   : > { %4168 = vperm.xlu0 %5447, %v3153_v49  }
 0x31f   : > { %v1397_v36 = vpop.permute.xlu1 %1396 }
 0x320   : > { %vm4465_vm12 = vcmp.eq.s32.totalorder %v6569_v13, %v1397_v36  ;;  %vm4464_vm13 = vcmp.eq.s32.totalorder %v6556_v57, %v1397_v36  ;;  %v1961_v25 = vrot.slane %v1397_v36, %v7976_v45  ;;  %v1965_v10 = vrot.slane %v1397_v36, %v7977_v27 }
 0x321   : > { %5208 = vmatprep.mubr.msk.f32.mxu0 %vm4465_vm12, %v7945_v0  ;;  %v1969_v42 = vrot.slane %v1397_v36, %v6716_v53  ;;  %v1973_v59 = vrot.slane %v1397_v36, %v6719_v63  ;;  %v1977_v34 = vrot.slane %v1397_v36, %v6722_v20  ;;  %v1981_v54 = vrot.slane %v1397_v36, %v6725_v8 }
 0x322   : > { %5209 = vmatmul.mubr.msk.f32.gmra.mxu0 %vm4464_vm13, %v7945_v0  ;;  %v1985_v1 = vrot.slane %v1397_v36, %v6728_v22  ;;  %v1989_v51 = vrot.slane %v1397_v36, %v6731_v39  ;;  %v3203_v4 = vcombine.low %v1961_v25, %v1965_v10 }
 0x323   : > { %v3204_v7 = vcombine.low %v1969_v42, %v1973_v59  ;;  %v3205_v23 = vcombine.low %v1977_v34, %v1981_v54 }
 0x324   : > { %v3206_v32 = vcombine.low %v1985_v1, %v1989_v51  ;;  %v3213_v50 = vrot.slane %v3203_v4, %v6741_v3  ;;  %v1504_v1 = vsel %vm7993_vm7, %v6556_v57, %v6569_v13 }
 0x325   : > { %v3220_v14 = vrot.slane %v3204_v7, %v6741_v3  ;;  %v3227_v37 = vrot.slane %v3205_v23, %v6741_v3 }
 0x326   : > { %v3234_v38 = vrot.slane %v3206_v32, %v6741_v3 }
 0x327   : > { %v6961_v40 = vpop.permute.xlu1 %1404  ;;  %v3235_v28 = vcombine.low %v3213_v50, %v3220_v14  ;;  %v1512_v50 = vsel %vm1510_vm15, %v6556_v57, %v6569_v13 }
 0x328   : > { %1537 = vmin.index.xlane.f32.xlu1 %v1535_v21  ;;  %vm4467_vm2 = vcmp.eq.s32.totalorder %v6569_v13, %v6961_v40  ;;  %vm4466_vm3 = vcmp.eq.s32.totalorder %v6556_v57, %v6961_v40  ;;  %v3236_v29 = vcombine.low %v3227_v37, %v3234_v38 }
 0x329   : > { %5210 = vmatprep.mubr.msk.f32.mxu0 %vm4467_vm2, %v7945_v0  ;;  %v3243_v56 = vrot.slane %v3235_v28, %v6741_v3 }
 0x32a   : > { %5211 = vmatmul.mubr.msk.f32.gmra.mxu0 %vm4466_vm3, %v7945_v0  ;;  %v3250_v41 = vrot.slane %v3236_v29, %v6741_v3 }
 0x32c   : > { %v3251_v47 = vcombine.low %v3243_v56, %v3250_v41 }
 0x32e   : > { %4174 = vperm.xlu0 %5447, %v3251_v47  }
 0x32f   : > { %v1413_v9 = vpop.permute.xlu1 %1412 }
 0x330   : > { %vm4469_vm4 = vcmp.eq.s32.totalorder %v6569_v13, %v1413_v9  ;;  %vm4468_vm5 = vcmp.eq.s32.totalorder %v6556_v57, %v1413_v9  ;;  %v2025_v17 = vrot.slane %v1413_v9, %v7976_v45  ;;  %v2029_v18 = vrot.slane %v1413_v9, %v7977_v27 }
 0x331   : > { %5212 = vmatprep.mubr.msk.f32.mxu0 %vm4469_vm4, %v7945_v0  ;;  %v2033_v48 = vrot.slane %v1413_v9, %v6716_v53  ;;  %v2037_v44 = vrot.slane %v1413_v9, %v6719_v63  ;;  %v2041_v16 = vrot.slane %v1413_v9, %v6722_v20  ;;  %v2045_v2 = vrot.slane %v1413_v9, %v6725_v8 }
 0x332   : > { %5213 = vmatmul.mubr.msk.f32.gmra.mxu0 %vm4468_vm5, %v7945_v0  ;;  %v2049_v12 = vrot.slane %v1413_v9, %v6728_v22  ;;  %v2053_v58 = vrot.slane %v1413_v9, %v6731_v39  ;;  %v3301_v11 = vcombine.low %v2025_v17, %v2029_v18  ;;  %v1530_v9 = vpop.xlane.xlu0 %1529 }
 0x333   : > { %v3302_v19 = vcombine.low %v2033_v48, %v2037_v44  ;;  %v3303_v49 = vcombine.low %v2041_v16, %v2045_v2 }
 0x334   : > { %v3304_v36 = vcombine.low %v2049_v12, %v2053_v58  ;;  %v3311_v25 = vrot.slane %v3301_v11, %v6741_v3  ;;  %v1528_v11 = vsel %vm1526_vm1, %v6556_v57, %v6569_v13 }
 0x335   : > { %v3318_v10 = vrot.slane %v3302_v19, %v6741_v3  ;;  %v3325_v42 = vrot.slane %v3303_v49, %v6741_v3 }
 0x336   : > { %v3332_v59 = vrot.slane %v3304_v36, %v6741_v3 }
 0x337   : > { %v6992_v34 = vpop.permute.xlu1 %1420  ;;  %v3333_v54 = vcombine.low %v3311_v25, %v3318_v10 }
 0x338   : > { %vm4471_vm6 = vcmp.eq.s32.totalorder %v6569_v13, %v6992_v34  ;;  %vm4470_vm8 = vcmp.eq.s32.totalorder %v6556_v57, %v6992_v34  ;;  %v3334_v51 = vcombine.low %v3325_v42, %v3332_v59 }
 0x339   : > { %5214 = vmatprep.mubr.msk.f32.mxu0 %vm4471_vm6, %v7945_v0  ;;  %1508 = vperm.xlu1 %5442, %v1504_v1   ;;  %v3341_v4 = vrot.slane %v3333_v54, %v6741_v3 }
 0x33a   : > { %5215 = vmatmul.mubr.msk.f32.gmra.mxu0 %vm4470_vm8, %v7945_v0  ;;  %v3348_v7 = vrot.slane %v3334_v51, %v6741_v3 }
 0x33c   : > { %v3349_v23 = vcombine.low %v3341_v4, %v3348_v7 }
 0x33d   : > { %5443 = vset.pattern.permute.xlu1 %v6697_v43 }
 0x33e   : > { %4180 = vperm.xlu0 %5447, %v3349_v23  }
 0x33f   : > { %v1429_v32 = vpop.permute.xlu1 %1428 }
 0x340   : > { %vm4473_vm0 = vcmp.eq.s32.totalorder %v6569_v13, %v1429_v32  ;;  %vm4472_vm9 = vcmp.eq.s32.totalorder %v6556_v57, %v1429_v32  ;;  %v2089_v14 = vrot.slane %v1429_v32, %v7976_v45  ;;  %v2093_v37 = vrot.slane %v1429_v32, %v7977_v27 }
 0x341   : > { %5216 = vmatprep.mubr.msk.f32.mxu0 %vm4473_vm0, %v7945_v0  ;;  %1516 = vperm.xlu1 %5443, %v1512_v50   ;;  %v2097_v43 = vrot.slane %v1429_v32, %v6716_v53  ;;  %v2101_v38 = vrot.slane %v1429_v32, %v6719_v63  ;;  %v2105_v21 = vrot.slane %v1429_v32, %v6722_v20 }
 0x342   : > { %5217 = vmatmul.mubr.msk.f32.gmra.mxu0 %vm4472_vm9, %v7945_v0  ;;  %v2109_v28 = vrot.slane %v1429_v32, %v6725_v8  ;;  %v2113_v29 = vrot.slane %v1429_v32, %v6728_v22  ;;  %v2117_v56 = vrot.slane %v1429_v32, %v6731_v39  ;;  %v3399_v41 = vcombine.low %v2089_v14, %v2093_v37 }
 0x343   : > { %v3400_v47 = vcombine.low %v2097_v43, %v2101_v38 }
 0x344   : > { %v3401_v17 = vcombine.low %v2105_v21, %v2109_v28  ;;  %v3402_v18 = vcombine.low %v2113_v29, %v2117_v56  ;;  %v3409_v48 = vrot.slane %v3399_v41, %v6741_v3 }
 0x345   : > { %5445 = vset.pattern.permute.xlu1 %v1530_v9  ;;  %v3416_v44 = vrot.slane %v3400_v47, %v6741_v3 }
 0x346   : > { %v3423_v16 = vrot.slane %v3401_v17, %v6741_v3  ;;  %v3430_v2 = vrot.slane %v3402_v18, %v6741_v3 }
 0x347   : > { %v7029_v12 = vpop.permute.xlu1 %1436  ;;  %v3431_v58 = vcombine.low %v3409_v48, %v3416_v44 }
 0x348   : > { %vm4475_vm15 = vcmp.eq.s32.totalorder %v6569_v13, %v7029_v12  ;;  %vm4474_vm10 = vcmp.eq.s32.totalorder %v6556_v57, %v7029_v12  ;;  %v3432_v19 = vcombine.low %v3423_v16, %v3430_v2 }
 0x349   : > { %5218 = vmatprep.mubr.msk.f32.mxu0 %vm4475_vm15, %v7945_v0  ;;  %1532 = vperm.xlu1 %5445, %v1528_v11   ;;  %v3439_v49 = vrot.slane %v3431_v58, %v6741_v3 }
 0x34a   : > { %5219 = vmatmul.mubr.msk.f32.gmra.mxu0 %vm4474_vm10, %v7945_v0  ;;  %v3446_v36 = vrot.slane %v3432_v19, %v6741_v3 }
 0x34c   : > { %v3447_v25 = vcombine.low %v3439_v49, %v3446_v36 }
 0x34e   : > { %4186 = vperm.xlu0 %5447, %v3447_v25  }
 0x34f   : > { %v1445_v10 = vpop.permute.xlu1 %1444 }
 0x350   : > { %vm4477_vm11 = vcmp.eq.s32.totalorder %v6569_v13, %v1445_v10  ;;  %vm4476_vm1 = vcmp.eq.s32.totalorder %v6556_v57, %v1445_v10  ;;  %v2153_v60 = vrot.slane %v1445_v10, %v7976_v45  ;;  %v2157_v61 = vrot.slane %v1445_v10, %v7977_v27 }
 0x351   : > { %5220 = vmatprep.mubr.msk.f32.mxu0 %vm4477_vm11, %v7945_v0  ;;  %v2161_v42 = vrot.slane %v1445_v10, %v6716_v53  ;;  %v2165_v59 = vrot.slane %v1445_v10, %v6719_v63  ;;  %v2169_v54 = vrot.slane %v1445_v10, %v6722_v20  ;;  %v2173_v1 = vrot.slane %v1445_v10, %v6725_v8 }
 0x352   : > { %5221 = vmatmul.mubr.msk.f32.gmra.mxu0 %vm4476_vm1, %v7945_v0  ;;  %v2177_v51 = vrot.slane %v1445_v10, %v6728_v22  ;;  %v2181_v4 = vrot.slane %v1445_v10, %v6731_v39  ;;  %v3497_v7 = vcombine.low %v2153_v60, %v2157_v61  ;;  %vm7996_vm1 = vcmask 261120  }
 0x353   : > { %v3498_v23 = vcombine.low %v2161_v42, %v2165_v59  ;;  %v3499_v32 = vcombine.low %v2169_v54, %v2173_v1 }
 0x354   : > { %v3500_v33 = vcombine.low %v2177_v51, %v2181_v4  ;;  %v3507_v24 = vrot.slane %v3497_v7, %v6741_v3 }
 0x355   : > { %v3514_v50 = vrot.slane %v3498_v23, %v6741_v3  ;;  %v3521_v14 = vrot.slane %v3499_v32, %v6741_v3 }
 0x356   : > { %v3528_v37 = vrot.slane %v3500_v33, %v6741_v3 }
 0x357   : > { %v7060_v43 = vpop.permute.xlu1 %1452  ;;  %v3529_v38 = vcombine.low %v3507_v24, %v3514_v50 }
 0x358   : > { %vm4479_vm12 = vcmp.eq.s32.totalorder %v6569_v13, %v7060_v43  ;;  %vm4478_vm13 = vcmp.eq.s32.totalorder %v6556_v57, %v7060_v43  ;;  %v3530_v21 = vcombine.low %v3521_v14, %v3528_v37 }
 0x359   : > { %5222 = vmatprep.mubr.msk.f32.mxu0 %vm4479_vm12, %v7945_v0  ;;  %v3537_v28 = vrot.slane %v3529_v38, %v6741_v3  ;;  %vm7997_vm12 = vmmov %vm7996_vm1 }
 0x35a   : > { %5223 = vmatmul.mubr.msk.f32.gmra.mxu0 %vm4478_vm13, %v7945_v0  ;;  %v3544_v29 = vrot.slane %v3530_v21, %v6741_v3  ;;  %vm7998_vm13 = vmmov %vm7996_vm1 }
 0x35c   : > { %v3545_v56 = vcombine.low %v3537_v28, %v3544_v29 }
 0x35e   : > { %4192 = vperm.xlu0 %5447, %v3545_v56  }
 0x35f   : > { %v1461_v41 = vpop.permute.xlu1 %1460 }
 0x360   : > { %vm4481_vm2 = vcmp.eq.s32.totalorder %v6569_v13, %v1461_v41  ;;  %vm4480_vm3 = vcmp.eq.s32.totalorder %v6556_v57, %v1461_v41  ;;  %v2217_v47 = vrot.slane %v1461_v41, %v7976_v45  ;;  %v2221_v9 = vrot.slane %v1461_v41, %v7977_v27 }
 0x361   : > { %5224 = vmatprep.mubr.msk.f32.mxu0 %vm4481_vm2, %v7945_v0  ;;  %v2225_v17 = vrot.slane %v1461_v41, %v6716_v53  ;;  %v2229_v18 = vrot.slane %v1461_v41, %v6719_v63  ;;  %v2233_v48 = vrot.slane %v1461_v41, %v6722_v20  ;;  %v2237_v44 = vrot.slane %v1461_v41, %v6725_v8  ;;  %vm8000_vm2 = vmmov %vm7996_vm1 }
 0x362   : > { %5225 = vmatmul.mubr.msk.f32.gmra.mxu0 %vm4480_vm3, %v7945_v0  ;;  %v2241_v16 = vrot.slane %v1461_v41, %v6728_v22  ;;  %v2245_v2 = vrot.slane %v1461_v41, %v6731_v39  ;;  %v3595_v58 = vcombine.low %v2217_v47, %v2221_v9  ;;  %vm8002_vm3 = vmmov %vm7996_vm1 }
 0x363   : > { %v3596_v11 = vcombine.low %v2225_v17, %v2229_v18  ;;  %v3597_v19 = vcombine.low %v2233_v48, %v2237_v44 }
 0x364   : > { %v3598_v49 = vcombine.low %v2241_v16, %v2245_v2  ;;  %v3605_v36 = vrot.slane %v3595_v58, %v6741_v3  ;;  %v7122_v58 = vpop.permute.xlu0 %1500 }
 0x365   : > { %v3612_v25 = vrot.slane %v3596_v11, %v6741_v3  ;;  %v3619_v10 = vrot.slane %v3597_v19, %v6741_v3  ;;  %v1577_v19 = vrot.slane %v6755_v6, %v7976_v45  ;;  %vm4491_vm10 = vcmp.eq.s32.totalorder %v6569_v13, %v7122_v58 }
 0x366   : > { %v3626_v60 = vrot.slane %v3598_v49, %v6741_v3  ;;  %v1581_v49 = vrot.slane %v6755_v6, %v7977_v27  ;;  %vm4490_vm11 = vcmp.eq.s32.totalorder %v6556_v57, %v7122_v58 }
 0x367   : > { %v7086_v61 = vpop.permute.xlu1 %1468  ;;  %v3627_v42 = vcombine.low %v3605_v36, %v3612_v25  ;;  %v1585_v36 = vrot.slane %v6755_v6, %v6716_v53  ;;  %v1589_v25 = vrot.slane %v6755_v6, %v6719_v63 }
 0x368   : > { %vm4483_vm4 = vcmp.eq.s32.totalorder %v6569_v13, %v7086_v61  ;;  %vm4482_vm5 = vcmp.eq.s32.totalorder %v6556_v57, %v7086_v61  ;;  %v3628_v59 = vcombine.low %v3619_v10, %v3626_v60 }
 0x369   : > { %5226 = vmatprep.mubr.msk.f32.mxu0 %vm4483_vm4, %v7945_v0  ;;  %v3635_v54 = vrot.slane %v3627_v42, %v6741_v3 }
 0x36a   : > { %5227 = vmatmul.mubr.msk.f32.gmra.mxu0 %vm4482_vm5, %v7945_v0  ;;  %v3642_v1 = vrot.slane %v3628_v59, %v6741_v3 }
 0x36c   : > { %v3643_v51 = vcombine.low %v3635_v54, %v3642_v1 }
 0x36e   : > { %4198 = vperm.xlu0 %5447, %v3643_v51  }
 0x36f   : > { %v1477_v4 = vpop.permute.xlu1 %1476 }
 0x370   : > { %vm4485_vm6 = vcmp.eq.s32.totalorder %v6569_v13, %v1477_v4  ;;  %vm4484_vm7 = vcmp.eq.s32.totalorder %v6556_v57, %v1477_v4  ;;  %v2281_v7 = vrot.slane %v1477_v4, %v7976_v45  ;;  %v2285_v23 = vrot.slane %v1477_v4, %v7977_v27 }
 0x371   : > { %5228 = vmatprep.mubr.msk.f32.mxu0 %vm4485_vm6, %v7945_v0  ;;  %v2289_v32 = vrot.slane %v1477_v4, %v6716_v53  ;;  %v2293_v33 = vrot.slane %v1477_v4, %v6719_v63  ;;  %v2297_v24 = vrot.slane %v1477_v4, %v6722_v20  ;;  %v2301_v50 = vrot.slane %v1477_v4, %v6725_v8  ;;  %vm8004_vm6 = vmmov %vm7996_vm1 }
 0x372   : > { %5229 = vmatmul.mubr.msk.f32.gmra.mxu0 %vm4484_vm7, %v7945_v0  ;;  %v2305_v14 = vrot.slane %v1477_v4, %v6728_v22  ;;  %v2309_v37 = vrot.slane %v1477_v4, %v6731_v39  ;;  %v3693_v38 = vcombine.low %v2281_v7, %v2285_v23 }
 0x373   : > { %v3694_v21 = vcombine.low %v2289_v32, %v2293_v33  ;;  %v3695_v28 = vcombine.low %v2297_v24, %v2301_v50  ;;  %v1593_v50 = vrot.slane %v6755_v6, %v6722_v20 }
 0x374   : > { %v3696_v29 = vcombine.low %v2305_v14, %v2309_v37  ;;  %v3703_v56 = vrot.slane %v3693_v38, %v6741_v3  ;;  %v1597_v14 = vrot.slane %v6755_v6, %v6725_v8 }
 0x375   : > { %v3710_v41 = vrot.slane %v3694_v21, %v6741_v3  ;;  %v3717_v47 = vrot.slane %v3695_v28, %v6741_v3  ;;  %v1601_v21 = vrot.slane %v6755_v6, %v6728_v22 }
 0x376   : > { %v3724_v9 = vrot.slane %v3696_v29, %v6741_v3  ;;  %v1605_v29 = vrot.slane %v6755_v6, %v6731_v39  ;;  %v1629_v6 = vrot.slane %v6767_v35, %v6725_v8 }
 0x377   : > { %v7112_v17 = vpop.permute.xlu1 %1484  ;;  %v3725_v18 = vcombine.low %v3703_v56, %v3710_v41  ;;  %v2615_v56 = vcombine.low %v1577_v19, %v1581_v49  ;;  %v2616_v41 = vcombine.low %v1585_v36, %v1589_v25  ;;  %v1633_v19 = vrot.slane %v6767_v35, %v6728_v22 }
 0x378   : > { %vm4487_vm8 = vcmp.eq.s32.totalorder %v6569_v13, %v7112_v17  ;;  %vm4486_vm0 = vcmp.eq.s32.totalorder %v6556_v57, %v7112_v17  ;;  %v3726_v48 = vcombine.low %v3717_v47, %v3724_v9  ;;  %v1609_v9 = vrot.slane %v6767_v35, %v7976_v45 }
 0x379   : > { %5230 = vmatprep.mubr.msk.f32.mxu1 %vm4487_vm8, %v7945_v0  ;;  %v3733_v44 = vrot.slane %v3725_v18, %v6741_v3  ;;  %v1613_v18 = vrot.slane %v6767_v35, %v7977_v27  ;;  %v1637_v49 = vrot.slane %v6767_v35, %v6731_v39  ;;  %v1673_v36 = vrot.slane %v6795_v52, %v7976_v45 }
 0x37a   : > { %5231 = vmatmul.mubr.msk.f32.vlgmr.msra.gmra.mxu1 %vm4486_vm0, %v7945_v0  ;;  %v3740_v16 = vrot.slane %v3726_v48, %v6741_v3  ;;  %v1617_v48 = vrot.slane %v6767_v35, %v6716_v53  ;;  %vm8005_vm0 = vmmov %vm7996_vm1 }
 0x37c   : > { %v3741_v2 = vcombine.low %v3733_v44, %v3740_v16  ;;  %v1621_v16 = vrot.slane %v6767_v35, %v6719_v63 }
 0x37e   : > { %4204 = vperm.xlu0 %5447, %v3741_v2   ;;  %v1625_v2 = vrot.slane %v6767_v35, %v6722_v20  ;;  %v1693_v35 = vrot.slane %v6795_v52, %v6725_v8 }
 0x37f   : > { %v1493_v11 = vpop.permute.xlu1 %1492 }
 0x380   : > { %vm4489_vm9 = vcmp.eq.s32.totalorder %v6569_v13, %v1493_v11  ;;  %vm4488_vm15 = vcmp.eq.s32.totalorder %v6556_v57, %v1493_v11  ;;  %v2345_v10 = vrot.slane %v1493_v11, %v7976_v45  ;;  %v2349_v60 = vrot.slane %v1493_v11, %v7977_v27 }
 0x381   : > { %5232 = vmatprep.mubr.msk.f32.mxu1 %vm4489_vm9, %v7945_v0  ;;  %v2353_v42 = vrot.slane %v1493_v11, %v6716_v53  ;;  %v2357_v59 = vrot.slane %v1493_v11, %v6719_v63  ;;  %v2361_v54 = vrot.slane %v1493_v11, %v6722_v20  ;;  %v2365_v1 = vrot.slane %v1493_v11, %v6725_v8 }
 0x382   : > { %5233 = vmatmul.mubr.msk.f32.gmra.mxu1 %vm4488_vm15, %v7945_v0  ;;  %v2369_v51 = vrot.slane %v1493_v11, %v6728_v22  ;;  %v2373_v4 = vrot.slane %v1493_v11, %v6731_v39  ;;  %v3791_v7 = vcombine.low %v2345_v10, %v2349_v60  ;;  %v1677_v10 = vrot.slane %v6795_v52, %v7977_v27 }
 0x383   : > { %5234 = vmatprep.mubr.msk.f32.mxu1 %vm4491_vm10, %v7945_v0  ;;  %v3792_v23 = vcombine.low %v2353_v42, %v2357_v59  ;;  %v3793_v32 = vcombine.low %v2361_v54, %v2365_v1  ;;  %v1681_v60 = vrot.slane %v6795_v52, %v6716_v53  ;;  %v1685_v42 = vrot.slane %v6795_v52, %v6719_v63  ;;  %vm8006_vm10 = vmmov %vm8005_vm0 }
 0x384   : > { %v3794_v33 = vcombine.low %v2369_v51, %v2373_v4  ;;  %v3801_v24 = vrot.slane %v3791_v7, %v6741_v3  ;;  %v1689_v59 = vrot.slane %v6795_v52, %v6722_v20  ;;  %v1697_v54 = vrot.slane %v6795_v52, %v6728_v22 }
 0x385   : > { %v3808_v37 = vrot.slane %v3792_v23, %v6741_v3  ;;  %v3815_v38 = vrot.slane %v3793_v32, %v6741_v3  ;;  %v1701_v1 = vrot.slane %v6795_v52, %v6731_v39  ;;  %v2617_v4 = vcombine.low %v1593_v50, %v1597_v14 }
 0x386   : > { %5235 = vmatmul.mubr.msk.f32.gmra.mxu1 %vm4490_vm11, %v7945_v0  ;;  %v3822_v28 = vrot.slane %v3794_v33, %v6741_v3  ;;  %v2618_v7 = vcombine.low %v1601_v21, %v1605_v29  ;;  %v2625_v23 = vrot.slane %v2615_v56, %v6741_v3  ;;  %v2632_v32 = vrot.slane %v2616_v41, %v6741_v3 }
 0x387   : > { %v3823_v47 = vcombine.low %v3801_v24, %v3808_v37  ;;  %v2664_v33 = vcombine.low %v1609_v9, %v1613_v18  ;;  %v2665_v24 = vcombine.low %v1617_v48, %v1621_v16  ;;  %v2666_v37 = vcombine.low %v1625_v2, %v1629_v6 }
 0x388   : > { %v3824_v44 = vcombine.low %v3815_v38, %v3822_v28  ;;  %v2667_v38 = vcombine.low %v1633_v19, %v1637_v49  ;;  %v2762_v28 = vcombine.low %v1673_v36, %v1677_v10  ;;  %v2765_v0 = vcombine.low %v1697_v54, %v1701_v1 }
 0x389   : > { %v3831_v11 = vrot.slane %v3823_v47, %v6741_v3  ;;  %v2763_v47 = vcombine.low %v1681_v60, %v1685_v42  ;;  %v1741_v52 = vrot.slane %v6835_v55, %v7977_v27  ;;  %v1745_v50 = vrot.slane %v6835_v55, %v6716_v53 }
 0x38a   : > { %v3838_v25 = vrot.slane %v3824_v44, %v6741_v3  ;;  %v2764_v44 = vcombine.low %v1689_v59, %v1693_v35  ;;  %v1749_v14 = vrot.slane %v6835_v55, %v6719_v63  ;;  %v1753_v21 = vrot.slane %v6835_v55, %v6722_v20 }
 0x38b   : > { %v1757_v29 = vrot.slane %v6835_v55, %v6725_v8  ;;  %v2639_v56 = vrot.slane %v2617_v4, %v6741_v3  ;;  %v2646_v41 = vrot.slane %v2618_v7, %v6741_v3  ;;  %v1761_v9 = vrot.slane %v6835_v55, %v6728_v22 }
 0x38c   : > { %v3839_v51 = vcombine.low %v3831_v11, %v3838_v25  ;;  %v1765_v18 = vrot.slane %v6835_v55, %v6731_v39  ;;  %v2674_v48 = vrot.slane %v2664_v33, %v6741_v3  ;;  %v2681_v16 = vrot.slane %v2665_v24, %v6741_v3 }
 0x38d   : > { %v2688_v2 = vrot.slane %v2666_v37, %v6741_v3  ;;  %v2695_v6 = vrot.slane %v2667_v38, %v6741_v3  ;;  %v2772_v11 = vrot.slane %v2762_v28, %v6741_v3  ;;  %v2779_v19 = vrot.slane %v2763_v47, %v6741_v3 }
 0x38e   : > { %4210 = vperm.xlu0 %5447, %v3839_v51   ;;  %v2786_v49 = vrot.slane %v2764_v44, %v6741_v3  ;;  %v2793_v36 = vrot.slane %v2765_v0, %v6741_v3  ;;  %v2860_v25 = vcombine.low %v1737_v26, %v1741_v52  ;;  %v2861_v10 = vcombine.low %v1745_v50, %v1749_v14 }
 0x38f   : > { %v2862_v55 = vcombine.low %v1753_v21, %v1757_v29  ;;  %v2863_v60 = vcombine.low %v1761_v9, %v1765_v18  ;;  %v7225_v42 = vcombine.low %v2625_v23, %v2632_v32  ;;  %v7227_v59 = vcombine.low %v2639_v56, %v2646_v41 }
 0x390   : > { %v7229_v35 = vcombine.low %v2674_v48, %v2681_v16  ;;  %v7231_v54 = vcombine.low %v2688_v2, %v2695_v6  ;;  %v7233_v1 = vcombine.low %v2772_v11, %v2779_v19  ;;  %v7235_v51 = vcombine.low %v2786_v49, %v2793_v36 }
 0x391   : > { %v2870_v0 = vrot.slane %v2860_v25, %v6741_v3  ;;  %v2877_v26 = vrot.slane %v2861_v10, %v6741_v3  ;;  %v2884_v4 = vrot.slane %v2862_v55, %v6741_v3  ;;  %v1801_v7 = vrot.slane %v6867_v31, %v7976_v45 }
 0x392   : > { %v2891_v23 = vrot.slane %v2863_v60, %v6741_v3  ;;  %v1805_v32 = vrot.slane %v6867_v31, %v7977_v27  ;;  %v1809_v33 = vrot.slane %v6867_v31, %v6716_v53  ;;  %v1813_v24 = vrot.slane %v6867_v31, %v6719_v63 }
 0x393   : > { %v1817_v37 = vrot.slane %v6867_v31, %v6722_v20  ;;  %v1821_v38 = vrot.slane %v6867_v31, %v6725_v8  ;;  %v1825_v28 = vrot.slane %v6867_v31, %v6728_v22  ;;  %v1829_v47 = vrot.slane %v6867_v31, %v6731_v39 }
 0x394   : > { %v1865_v44 = vrot.slane %v6898_v30, %v7976_v45  ;;  %v1869_v52 = vrot.slane %v6898_v30, %v7977_v27  ;;  %v1873_v50 = vrot.slane %v6898_v30, %v6716_v53  ;;  %v1877_v14 = vrot.slane %v6898_v30, %v6719_v63 }
 0x395   : > { %v1881_v21 = vrot.slane %v6898_v30, %v6722_v20  ;;  %v1885_v29 = vrot.slane %v6898_v30, %v6725_v8  ;;  %v1889_v31 = vrot.slane %v6898_v30, %v6728_v22  ;;  %v1893_v56 = vrot.slane %v6898_v30, %v6731_v39 }
 0x396   : > { %v2655_v41 = vrot.slane %v7225_v42, %v6741_v3  ;;  %v2662_v9 = vrot.slane %v7227_v59, %v6741_v3  ;;  %v2711_v48 = vrot.slane %v7231_v54, %v6741_v3  ;;  %v7283_v2 = vcombine.low %v2870_v0, %v2877_v26 }
 0x397   : > { %v7285_v6 = vcombine.low %v2884_v4, %v2891_v23  ;;  %v2958_v11 = vcombine.low %v1801_v7, %v1805_v32  ;;  %v2959_v19 = vcombine.low %v1809_v33, %v1813_v24  ;;  %v2960_v30 = vcombine.low %v1817_v37, %v1821_v38 }
 0x398   : > { %v2961_v49 = vcombine.low %v1825_v28, %v1829_v47  ;;  %v3056_v36 = vcombine.low %v1865_v44, %v1869_v52  ;;  %v3057_v25 = vcombine.low %v1873_v50, %v1877_v14  ;;  %v2802_v55 = vrot.slane %v7233_v1, %v6741_v3 }
 0x399   : > { %v2809_v60 = vrot.slane %v7235_v51, %v6741_v3  ;;  %v3058_v54 = vcombine.low %v1881_v21, %v1885_v29  ;;  %v3059_v0 = vcombine.low %v1889_v31, %v1893_v56  ;;  %v1929_v26 = vrot.slane %v6927_v46, %v7976_v45 }
 0x39a   : > { %v1933_v4 = vrot.slane %v6927_v46, %v7977_v27  ;;  %v1937_v7 = vrot.slane %v6927_v46, %v6716_v53  ;;  %v1941_v23 = vrot.slane %v6927_v46, %v6719_v63  ;;  %v2900_v1 = vrot.slane %v7283_v2, %v6741_v3 }
 0x39b   : > { %v2907_v51 = vrot.slane %v7285_v6, %v6741_v3  ;;  %v2968_v33 = vrot.slane %v2958_v11, %v6741_v3  ;;  %v2975_v24 = vrot.slane %v2959_v19, %v6741_v3  ;;  %v2982_v37 = vrot.slane %v2960_v30, %v6741_v3 }
 0x39c   : > { %v2989_v38 = vrot.slane %v2961_v49, %v6741_v3  ;;  %v3066_v28 = vrot.slane %v3056_v36, %v6741_v3  ;;  %v3073_v47 = vrot.slane %v3057_v25, %v6741_v3  ;;  %v3080_v52 = vrot.slane %v3058_v54, %v6741_v3 }
 0x39d   : > { %v3087_v50 = vrot.slane %v3059_v0, %v6741_v3  ;;  %v1945_v14 = vrot.slane %v6927_v46, %v6722_v20  ;;  %v1949_v21 = vrot.slane %v6927_v46, %v6725_v8  ;;  %v1953_v29 = vrot.slane %v6927_v46, %v6728_v22 }
 0x39e   : > { %v4728_v16 = vpop.f32.mrf.mxu0  ;;  %v1957_v31 = vrot.slane %v6927_v46, %v6731_v39  ;;  %v3154_v56 = vcombine.low %v1929_v26, %v1933_v4  ;;  %v1993_v6 = vrot.slane %v6961_v40, %v7976_v45  ;;  %v1997_v11 = vrot.slane %v6961_v40, %v7977_v27 }
 0x39f   : > { %4887 = vst.msk [vmem:[%s7287_s16] sm:$0xff] %vm7996_vm1, %v4728_v16  ;;  %v3155_v16 = vcombine.low %v1937_v7, %v1941_v23  ;;  %v2001_v19 = vrot.slane %v6961_v40, %v6716_v53  ;;  %v2005_v30 = vrot.slane %v6961_v40, %v6719_v63  ;;  %v2009_v46 = vrot.slane %v6961_v40, %v6722_v20 }
 0x3a0   : > { %v4730_v10 = vpop.f32.mrf.mxu0  ;;  %v2013_v49 = vrot.slane %v6961_v40, %v6725_v8  ;;  %v2017_v36 = vrot.slane %v6961_v40, %v6728_v22  ;;  %v2021_v25 = vrot.slane %v6961_v40, %v6731_v39  ;;  %v2990_v54 = vcombine.low %v2968_v33, %v2975_v24 }
 0x3a1   : > { %v2991_v0 = vcombine.low %v2982_v37, %v2989_v38  ;;  %v3088_v26 = vcombine.low %v3066_v28, %v3073_v47  ;;  %v3089_v4 = vcombine.low %v3080_v52, %v3087_v50  ;;  %v3156_v7 = vcombine.low %v1945_v14, %v1949_v21 }
 0x3a2   : > { %v4733_v32 = vpop.f32.mrf.mxu0  ;;  %v3157_v23 = vcombine.low %v1953_v29, %v1957_v31  ;;  %v1536_v18 = vsel %vm1534_vm14, %v6556_v57, %v6569_v13  ;;  %v7356_v40 = vcombine.low %v2655_v41, %v2662_v9  ;;  %v7999_v33 = vrot.slane %v7229_v35, %v6741_v3  ;;  %v7372_v9 = vpop.permute.xlu0 %1524  ;;  %vm8001_vm14 = vmmov %vm7996_vm1 }
 0x3a3   : > { %4888 = vst.msk [vmem:[%s7287_s16 + $0x8] sm:$0xff] %vm7997_vm12, %v4733_v32  ;;  %v3164_v32 = vrot.slane %v3154_v56, %v6741_v3  ;;  %v3252_v37 = vcombine.low %v1993_v6, %v1997_v11  ;;  %v7365_v38 = vcombine.low %v2802_v55, %v2809_v60  ;;  %v3253_v62 = vcombine.low %v2001_v19, %v2005_v30  ;;  %vm8007_vm12 = vmmov %vm8005_vm0 }
 0x3a4   : > { %v4735_v44 = vpop.f32.mrf.mxu0  ;;  %v7361_v24 = vcombine.low %v7999_v33, %v2711_v48  ;;  %v3254_v15 = vcombine.low %v2009_v46, %v2013_v49  ;;  %v3255_v28 = vcombine.low %v2017_v36, %v2021_v25  ;;  %v7367_v47 = vcombine.low %v2900_v1, %v2907_v51 }
 0x3a5   : > { %v3171_v44 = vrot.slane %v3155_v16, %v6741_v3  ;;  %v2998_v42 = vrot.slane %v2990_v54, %v6741_v3  ;;  %v3005_v41 = vrot.slane %v2991_v0, %v6741_v3  ;;  %v3096_v35 = vrot.slane %v3088_v26, %v6741_v3 }
 0x3a6   : > { %v4738_v2 = vpop.f32.mrf.mxu0  ;;  %v3103_v48 = vrot.slane %v3089_v4, %v6741_v3  ;;  %v3178_v55 = vrot.slane %v3156_v7, %v6741_v3  ;;  %v3185_v60 = vrot.slane %v3157_v23, %v6741_v3  ;;  %v3262_v1 = vrot.slane %v3252_v37, %v6741_v3 }
 0x3a7   : > { %4889 = vst.msk [vmem:[%s7287_s16 + $0x10] sm:$0xff] %vm7998_vm13, %v4738_v2  ;;  %v7377_v52 = vcombine.low %v3164_v32, %v3171_v44  ;;  %v2057_v51 = vrot.slane %v6992_v34, %v7976_v45  ;;  %v2061_v14 = vrot.slane %v6992_v34, %v7977_v27  ;;  %v2065_v21 = vrot.slane %v6992_v34, %v6716_v53  ;;  %vm8008_vm13 = vmmov %vm8005_vm0 }
 0x3a8   : > { %v4740_v10 = vpop.f32.mrf.mxu0  ;;  %v3269_v29 = vrot.slane %v3253_v62, %v6741_v3  ;;  %v3276_v31 = vrot.slane %v3254_v15, %v6741_v3  ;;  %v3283_v56 = vrot.slane %v3255_v28, %v6741_v3  ;;  %v2069_v16 = vrot.slane %v6992_v34, %v6719_v63 }
 0x3a9   : > { %v2473_v11 = vrot.slane %v7372_v9, %v7976_v45  ;;  %v2477_v19 = vrot.slane %v7372_v9, %v7977_v27  ;;  %v2481_v30 = vrot.slane %v7372_v9, %v6716_v53  ;;  %v2485_v46 = vrot.slane %v7372_v9, %v6719_v63 }
 0x3aa   : > { %v4743_v2 = vpop.f32.mrf.mxu0  ;;  %v2489_v36 = vrot.slane %v7372_v9, %v6722_v20  ;;  %v2493_v25 = vrot.slane %v7372_v9, %v6725_v8  ;;  %v2497_v10 = vrot.slane %v7372_v9, %v6728_v22  ;;  %v2501_v54 = vrot.slane %v7372_v9, %v6731_v39 }
 0x3ab   : > { %4890 = vst.msk [vmem:[%s7287_s16 + $0x18] sm:$0xff] %vm8000_vm2, %v4743_v2  ;;  %v7409_v26 = vcombine.low %v2998_v42, %v3005_v41  ;;  %v7411_v4 = vcombine.low %v3096_v35, %v3103_v48  ;;  %v7413_v7 = vcombine.low %v3178_v55, %v3185_v60  ;;  %v3194_v23 = vrot.slane %v7377_v52, %v6741_v3  ;;  %vm8009_vm2 = vmmov %vm8005_vm0 }
 0x3ac   : > { %v4745_v59 = vpop.f32.mrf.mxu0  ;;  %v7419_v32 = vcombine.low %v3262_v1, %v3269_v29  ;;  %v2073_v44 = vrot.slane %v6992_v34, %v6722_v20  ;;  %v2077_v2 = vrot.slane %v6992_v34, %v6725_v8  ;;  %v2081_v33 = vrot.slane %v6992_v34, %v6728_v22 }
 0x3ad   : > { %v7427_v62 = vcombine.low %v3276_v31, %v3283_v56  ;;  %v2085_v15 = vrot.slane %v6992_v34, %v6731_v39  ;;  %v7431_v28 = vcombine.low %v2057_v51, %v2061_v14  ;;  %v7433_v59 = vcombine.low %v2065_v21, %v2069_v16 }
 0x3ae   : > { %v4748_v50 = vpop.f32.mrf.mxu0  ;;  %v3987_v41 = vcombine.low %v2473_v11, %v2477_v19  ;;  %v3988_v35 = vcombine.low %v2481_v30, %v2485_v46  ;;  %v3989_v48 = vcombine.low %v2489_v36, %v2493_v25  ;;  %v3990_v55 = vcombine.low %v2497_v10, %v2501_v54 }
 0x3af   : > { %4891 = vst.msk [vmem:[%s7287_s16 + $0x20] sm:$0xff] %vm8001_vm14, %v4748_v50  ;;  %v8003_v1 = vmov 1.0   ;;  %v7447_v56 = vcombine.low %v2073_v44, %v2077_v2  ;;  %v7462_v44 = vcombine.low %v2081_v33, %v2085_v15  ;;  %v3367_v33 = vrot.slane %v7433_v59, %v6741_v3  ;;  %vm8010_vm14 = vmmov %vm8005_vm0 }
 0x3b0   : > { %v4750_v6 = vpop.f32.mrf.mxu0  ;;  %v3997_v11 = vrot.slane %v3987_v41, %v6741_v3  ;;  %v4004_v19 = vrot.slane %v3988_v35, %v6741_v3  ;;  %v4011_v36 = vrot.slane %v3989_v48, %v6741_v3  ;;  %v4018_v25 = vrot.slane %v3990_v55, %v6741_v3 }
 0x3b1   : > { %v1538_v49 = vpop.xlane.xlu1 %1537  ;;  %v3360_v41 = vrot.slane %v7431_v28, %v6741_v3  ;;  %vm4497_vm9 = vcmp.eq.s32.totalorder %v6569_v13, %v7372_v9  ;;  %v3381_v59 = vrot.slane %v7462_v44, %v6741_v3  ;;  %vm4496_vm15 = vcmp.eq.s32.totalorder %v6556_v57, %v7372_v9 }
 0x3b2   : > { %v4753_v0 = vpop.f32.mrf.mxu0  ;;  %5446 = vset.pattern.permute.xlu1 %v1538_v49  ;;  %v4019_v35 = vcombine.low %v3997_v11, %v4004_v19  ;;  %v4020_v48 = vcombine.low %v4011_v36, %v4018_v25  ;;  %v2185_v11 = vrot.slane %v7060_v43, %v7976_v45  ;;  %v2189_v19 = vrot.slane %v7060_v43, %v7977_v27 }
 0x3b3   : > { %4892 = vst.msk [vmem:[%s7287_s16 + $0x28] sm:$0xff] %vm8002_vm3, %v4753_v0  ;;  %v3201_v0 = vrot.slane %v7413_v7, %v6741_v3  ;;  %v2209_v36 = vrot.slane %v7060_v43, %v6728_v22  ;;  %v2213_v25 = vrot.slane %v7060_v43, %v6731_v39  ;;  %vm8011_vm3 = vmmov %vm8005_vm0 }
 0x3b4   : > { %v4755_v37 = vpop.f32.mrf.mxu0 }
 0x3b5   : > { %v1509_v42 = vpop.permute.xlu1 %1508  ;;  %v3202_v44 = vcombine.low %v3194_v23, %v3201_v0 }
 0x3b6   : > { %1540 = vperm.xlu1 %5446, %v1536_v18   ;;  %vm4493_vm4 = vcmp.eq.s32.totalorder %v6569_v13, %v1509_v42  ;;  %vm4492_vm5 = vcmp.eq.s32.totalorder %v6556_v57, %v1509_v42  ;;  %v2409_v60 = vrot.slane %v1509_v42, %v7976_v45  ;;  %v2413_v50 = vrot.slane %v1509_v42, %v7977_v27 }
 0x3b7   : > { %5236 = vmatprep.mubr.msk.f32.mxu1 %vm4493_vm4, %v8003_v1  ;;  %v2417_v34 = vrot.slane %v1509_v42, %v6716_v53  ;;  %v2421_v51 = vrot.slane %v1509_v42, %v6719_v63  ;;  %v2425_v14 = vrot.slane %v1509_v42, %v6722_v20  ;;  %v2429_v21 = vrot.slane %v1509_v42, %v6725_v8  ;;  %vm8012_vm4 = vmmov %vm8005_vm0 }
 0x3b8   : > { %5237 = vmatmul.mubr.msk.f32.gmra.mxu1 %vm4492_vm5, %v8003_v1  ;;  %v2433_v18 = vrot.slane %v1509_v42, %v6728_v22  ;;  %v2437_v29 = vrot.slane %v1509_v42, %v6731_v39  ;;  %v3889_v31 = vcombine.low %v2409_v60, %v2413_v50  ;;  %v3292_v42 = vrot.slane %v7419_v32, %v6741_v3  ;;  %vm8013_vm5 = vmmov %vm8005_vm0 }
 0x3b9   : > { %v3890_v16 = vcombine.low %v2417_v34, %v2421_v51  ;;  %v3891_v6 = vcombine.low %v2425_v14, %v2429_v21  ;;  %v2121_v50 = vrot.slane %v7029_v12, %v7976_v45  ;;  %v2129_v34 = vrot.slane %v7029_v12, %v6716_v53 }
 0x3ba   : > { %v4758_v30 = vpop.f32.mrf.mxu0  ;;  %5448 = vset.pattern.permute.xlu1 %v7974_v5  ;;  %v3892_v46 = vcombine.low %v2433_v18, %v2437_v29  ;;  %v3899_v49 = vrot.slane %v3889_v31, %v6741_v3  ;;  %v2133_v51 = vrot.slane %v7029_v12, %v6719_v63  ;;  %v2137_v14 = vrot.slane %v7029_v12, %v6722_v20 }
 0x3bb   : > { %4893 = vst.msk [vmem:[%s7287_s16 + $0x30] sm:$0xff] %vm8004_vm6, %v4758_v30  ;;  %4138 = vperm.xlu1 %5448, %v7356_v40   ;;  %v3906_v10 = vrot.slane %v3890_v16, %v6741_v3  ;;  %v3913_v54 = vrot.slane %v3891_v6, %v6741_v3  ;;  %v3299_v40 = vrot.slane %v7427_v62, %v6741_v3  ;;  %vm8014_vm6 = vmmov %vm8005_vm0 }
 0x3bc   : > { %v4760_v5 = vpop.f32.mrf.mxu0  ;;  %v7464_v2 = vpop.permute.xlu1 %1516  ;;  %v3920_v37 = vrot.slane %v3892_v46, %v6741_v3  ;;  %v3374_v62 = vrot.slane %v7447_v56, %v6741_v3  ;;  %v2141_v21 = vrot.slane %v7029_v12, %v6725_v8  ;;  %v2145_v18 = vrot.slane %v7029_v12, %v6728_v22 }
 0x3bd   : > { %vm4495_vm7 = vcmp.eq.s32.totalorder %v6569_v13, %v7464_v2  ;;  %vm4494_vm8 = vcmp.eq.s32.totalorder %v6556_v57, %v7464_v2  ;;  %v3921_v7 = vcombine.low %v3899_v49, %v3906_v10  ;;  %v4027_v56 = vrot.slane %v4019_v35, %v6741_v3 }
 0x3be   : > { %v4763_v15 = vpop.f32.mrf.mxu0  ;;  %5238 = vmatprep.mubr.msk.f32.mxu1 %vm4495_vm7, %v8003_v1  ;;  %v3922_v32 = vcombine.low %v3913_v54, %v3920_v37  ;;  %v4034_v16 = vrot.slane %v4020_v48, %v6741_v3  ;;  %v2149_v6 = vrot.slane %v7029_v12, %v6731_v39  ;;  %v2193_v46 = vrot.slane %v7060_v43, %v6716_v53  ;;  %vm8015_vm7 = vmmov %vm8005_vm0 }
 0x3bf   : > { %4894 = vst.msk [vmem:[%s7287_s16 + $0x38] sm:$0xff] %vm8005_vm0, %v4763_v15  ;;  %4141 = vperm.xlu1 %5448, %v7361_v24   ;;  %5239 = vmatmul.mubr.msk.f32.gmra.mxu1 %vm4494_vm8, %v8003_v1  ;;  %v3929_v28 = vrot.slane %v3921_v7, %v6741_v3  ;;  %v2125_v24 = vrot.slane %v7029_v12, %v7977_v27  ;;  %vm8016_vm8 = vmmov %vm8005_vm0 }
 0x3c0   : > { %v4765_v55 = vpop.f32.mrf.mxu0  ;;  %5240 = vmatprep.mubr.msk.f32.mxu1 %vm4497_vm9, %v8003_v1  ;;  %v3936_v60 = vrot.slane %v3922_v32, %v6741_v3  ;;  %v2201_v12 = vrot.slane %v7060_v43, %v6722_v20  ;;  %v2205_v49 = vrot.slane %v7060_v43, %v6725_v8  ;;  %v4035_v54 = vcombine.low %v4027_v56, %v4034_v16  ;;  %vm8017_vm9 = vmmov %vm8005_vm0 }
 0x3c1   : > { %v7543_v5 = vcombine.low %v3292_v42, %v3299_v40  ;;  %v2377_v37 = vrot.slane %v7122_v58, %v7976_v45  ;;  %v7553_v7 = vcombine.low %v3374_v62, %v3381_v59  ;;  %v2381_v15 = vrot.slane %v7122_v58, %v7977_v27 }
 0x3c2   : > { %v4768_v29 = vpop.f32.mrf.mxu0  ;;  %v3937_v31 = vcombine.low %v3929_v28, %v3936_v60  ;;  %v3448_v23 = vcombine.low %v2121_v50, %v2125_v24  ;;  %v3449_v0 = vcombine.low %v2129_v34, %v2133_v51  ;;  %v3450_v42 = vcombine.low %v2137_v14, %v2141_v21 }
 0x3c3   : > { %4895 = vst.msk [vmem:[%s7287_s16 + $0x40] sm:$0xff] %vm8006_vm10, %v4768_v29  ;;  %4147 = vperm.xlu1 %5448, %v7365_v38   ;;  %5241 = vmatmul.mubr.msk.f32.gmra.mxu1 %vm4496_vm15, %v8003_v1  ;;  %v2197_v38 = vrot.slane %v7060_v43, %v6719_v63  ;;  %v7551_v43 = vcombine.low %v3360_v41, %v3367_v33  ;;  %vm8018_vm15 = vmmov %vm8005_vm0 }
 0x3c4   : > { %4216 = vperm.xlu0 %5447, %v3937_v31   ;;  %v4770_v9 = vpop.f32.mrf.mxu0  ;;  %v7521_v30 = vpop.permute.xlu1 %1532  ;;  %v3451_v40 = vcombine.low %v2145_v18, %v2149_v6  ;;  %v3546_v32 = vcombine.low %v2185_v11, %v2189_v19  ;;  %v3548_v48 = vcombine.low %v2201_v12, %v2205_v49  ;;  %v2249_v41 = vrot.slane %v7086_v61, %v7976_v45  ;;  %vm8019_vm10 = vmmov %vm8005_vm0 }
 0x3c5   : > { %vm4499_vm11 = vcmp.eq.s32.totalorder %v6569_v13, %v7521_v30  ;;  %vm4498_vm1 = vcmp.eq.s32.totalorder %v6556_v57, %v7521_v30  ;;  %v3547_v35 = vcombine.low %v2193_v46, %v2197_v38  ;;  %v2253_v33 = vrot.slane %v7086_v61, %v7977_v27 }
 0x3c6   : > { %v4773_v10 = vpop.f32.mrf.mxu0  ;;  %5242 = vmatprep.mubr.msk.f32.mxu1 %vm4499_vm11, %v8003_v1  ;;  %v2257_v62 = vrot.slane %v7086_v61, %v6716_v53  ;;  %v2261_v59 = vrot.slane %v7086_v61, %v6719_v63  ;;  %v2265_v55 = vrot.slane %v7086_v61, %v6722_v20  ;;  %v2269_v60 = vrot.slane %v7086_v61, %v6725_v8 }
 0x3c7   : > { %4896 = vst.msk [vmem:[%s7287_s16 + $0x48] sm:$0xff] %vm8007_vm12, %v4773_v10  ;;  %4153 = vperm.xlu1 %5448, %v7367_v47   ;;  %5243 = vmatmul.mubr.msk.f32.gmra.mxu1 %vm4498_vm1, %v8003_v1  ;;  %v3549_v47 = vcombine.low %v2209_v36, %v2213_v25  ;;  %v2273_v50 = vrot.slane %v7086_v61, %v6728_v22  ;;  %vm8020_vm12 = vmmov %vm8005_vm0 }
 0x3c8   : > { %4222 = vperm.xlu0 %5447, %v4035_v54   ;;  %v4775_v52 = vpop.f32.mrf.mxu0  ;;  %v2277_v24 = vrot.slane %v7086_v61, %v6731_v39  ;;  %v3390_v51 = vrot.slane %v7551_v43, %v6741_v3  ;;  %v3397_v14 = vrot.slane %v7553_v7, %v6741_v3  ;;  %v2389_v21 = vrot.slane %v7122_v58, %v6719_v63 }
 0x3c9   : > { %v3458_v18 = vrot.slane %v3448_v23, %v6741_v3  ;;  %v3465_v29 = vrot.slane %v3449_v0, %v6741_v3  ;;  %v3472_v31 = vrot.slane %v3450_v42, %v6741_v3  ;;  %v3479_v61 = vrot.slane %v3451_v40, %v6741_v3 }
 0x3ca   : > { %v4778_v28 = vpop.f32.mrf.mxu0  ;;  %v3556_v56 = vrot.slane %v3546_v32, %v6741_v3  ;;  %v3563_v16 = vrot.slane %v3547_v35, %v6741_v3  ;;  %v3570_v6 = vrot.slane %v3548_v48, %v6741_v3  ;;  %v3577_v11 = vrot.slane %v3549_v47, %v6741_v3 }
 0x3cb   : > { %4897 = vst.msk [vmem:[%s7287_s16 + $0x50] sm:$0xff] %vm8008_vm13, %v4778_v28  ;;  %4159 = vperm.xlu1 %5448, %v7409_v26   ;;  %v2385_v26 = vrot.slane %v7122_v58, %v6716_v53  ;;  %v3644_v19 = vcombine.low %v2249_v41, %v2253_v33  ;;  %v3645_v9 = vcombine.low %v2257_v62, %v2261_v59  ;;  %vm8021_vm13 = vmmov %vm8005_vm0 }
 0x3cc   : > { %v4780_v34 = vpop.f32.mrf.mxu0  ;;  %v3646_v46 = vcombine.low %v2265_v55, %v2269_v60  ;;  %v3647_v38 = vcombine.low %v2273_v50, %v2277_v24  ;;  %v2313_v12 = vrot.slane %v7112_v17, %v7976_v45  ;;  %v2317_v49 = vrot.slane %v7112_v17, %v7977_v27 }
 0x3cd   : > { %v2321_v36 = vrot.slane %v7112_v17, %v6716_v53  ;;  %v2325_v25 = vrot.slane %v7112_v17, %v6719_v63  ;;  %v2333_v10 = vrot.slane %v7112_v17, %v6725_v8  ;;  %v2337_v54 = vrot.slane %v7112_v17, %v6728_v22 }
 0x3ce   : > { %v2341_v43 = vrot.slane %v7112_v17, %v6731_v39  ;;  %v3480_v52 = vcombine.low %v3458_v18, %v3465_v29  ;;  %v3481_v23 = vcombine.low %v3472_v31, %v3479_v61  ;;  %v2393_v0 = vrot.slane %v7122_v58, %v6722_v20 }
 0x3cf   : > { %4165 = vperm.xlu1 %5448, %v7411_v4   ;;  %v2329_v4 = vrot.slane %v7112_v17, %v6722_v20  ;;  %v2397_v42 = vrot.slane %v7122_v58, %v6725_v8  ;;  %v3578_v40 = vcombine.low %v3556_v56, %v3563_v16  ;;  %v3579_v32 = vcombine.low %v3570_v6, %v3577_v11 }
 0x3d0   : > { %v2401_v35 = vrot.slane %v7122_v58, %v6728_v22  ;;  %v2405_v17 = vrot.slane %v7122_v58, %v6731_v39  ;;  %v3654_v47 = vrot.slane %v3644_v19, %v6741_v3  ;;  %v3661_v28 = vrot.slane %v3645_v9, %v6741_v3 }
 0x3d1   : > { %v3668_v41 = vrot.slane %v3646_v46, %v6741_v3  ;;  %v3675_v33 = vrot.slane %v3647_v38, %v6741_v3  ;;  %v3742_v62 = vcombine.low %v2313_v12, %v2317_v49  ;;  %v3743_v59 = vcombine.low %v2321_v36, %v2325_v25 }
 0x3d2   : > { %v4783_v7 = vpop.f32.mrf.mxu0  ;;  %v3745_v55 = vcombine.low %v2337_v54, %v2341_v43  ;;  %v3398_v60 = vcombine.low %v3390_v51, %v3397_v14  ;;  %v3488_v50 = vrot.slane %v3480_v52, %v6741_v3  ;;  %v3495_v24 = vrot.slane %v3481_v23, %v6741_v3 }
 0x3d3   : > { %4898 = vst.msk [vmem:[%s7287_s16 + $0x58] sm:$0xff] %vm8009_vm2, %v4783_v7  ;;  %4171 = vperm.xlu1 %5448, %v3202_v44   ;;  %v3744_v44 = vcombine.low %v2329_v4, %v2333_v10  ;;  %v3586_v34 = vrot.slane %v3578_v40, %v6741_v3  ;;  %v3593_v18 = vrot.slane %v3579_v32, %v6741_v3  ;;  %vm8022_vm2 = vmmov %vm8005_vm0 }
 0x3d4   : > { %v4785_v48 = vpop.f32.mrf.mxu0  ;;  %v3840_v29 = vcombine.low %v2377_v37, %v2381_v15  ;;  %v3841_v31 = vcombine.low %v2385_v26, %v2389_v21  ;;  %v3676_v51 = vcombine.low %v3654_v47, %v3661_v28  ;;  %v3677_v14 = vcombine.low %v3668_v41, %v3675_v33 }
 0x3d5   : > { %v3842_v61 = vcombine.low %v2393_v0, %v2397_v42  ;;  %v3843_v56 = vcombine.low %v2401_v35, %v2405_v17  ;;  %v3752_v16 = vrot.slane %v3742_v62, %v6741_v3  ;;  %v3766_v6 = vrot.slane %v3744_v44, %v6741_v3 }
 0x3d6   : > { %v3773_v11 = vrot.slane %v3745_v55, %v6741_v3  ;;  %v2441_v9 = vrot.slane %v7464_v2, %v7976_v45  ;;  %v2445_v58 = vrot.slane %v7464_v2, %v7977_v27  ;;  %v2449_v37 = vrot.slane %v7464_v2, %v6716_v53 }
 0x3d7   : > { %4177 = vperm.xlu1 %5448, %v7543_v5   ;;  %v3759_v5 = vrot.slane %v3743_v59, %v6741_v3  ;;  %v2453_v15 = vrot.slane %v7464_v2, %v6719_v63  ;;  %v2457_v26 = vrot.slane %v7464_v2, %v6722_v20  ;;  %v2461_v21 = vrot.slane %v7464_v2, %v6725_v8 }
 0x3d8   : > { %v2465_v46 = vrot.slane %v7464_v2, %v6728_v22  ;;  %v2469_v38 = vrot.slane %v7464_v2, %v6731_v39  ;;  %v3496_v49 = vcombine.low %v3488_v50, %v3495_v24  ;;  %v3594_v36 = vcombine.low %v3586_v34, %v3593_v18 }
 0x3d9   : > { %v3850_v25 = vrot.slane %v3840_v29, %v6741_v3  ;;  %v3857_v4 = vrot.slane %v3841_v31, %v6741_v3  ;;  %v3864_v10 = vrot.slane %v3842_v61, %v6741_v3  ;;  %v3871_v54 = vrot.slane %v3843_v56, %v6741_v3 }
 0x3da   : > { %v4788_v19 = vpop.f32.mrf.mxu0  ;;  %v3684_v43 = vrot.slane %v3676_v51, %v6741_v3  ;;  %v3691_v7 = vrot.slane %v3677_v14, %v6741_v3  ;;  %v3774_v52 = vcombine.low %v3752_v16, %v3759_v5  ;;  %v3775_v23 = vcombine.low %v3766_v6, %v3773_v11 }
 0x3db   : > { %4899 = vst.msk [vmem:[%s7287_s16 + $0x60] sm:$0xff] %vm8010_vm14, %v4788_v19  ;;  %4183 = vperm.xlu1 %5448, %v3398_v60   ;;  %v3938_v2 = vcombine.low %v2441_v9, %v2445_v58  ;;  %v3939_v0 = vcombine.low %v2449_v37, %v2453_v15  ;;  %v3940_v42 = vcombine.low %v2457_v26, %v2461_v21  ;;  %vm8023_vm14 = vmmov %vm8005_vm0 }
 0x3dc   : > { %v4790_v12 = vpop.f32.mrf.mxu0  ;;  %v3941_v40 = vcombine.low %v2465_v46, %v2469_v38  ;;  %v2505_v32 = vrot.slane %v7521_v30, %v7976_v45  ;;  %v2509_v35 = vrot.slane %v7521_v30, %v7977_v27  ;;  %v2513_v17 = vrot.slane %v7521_v30, %v6716_v53 }
 0x3dd   : > { %v2517_v48 = vrot.slane %v7521_v30, %v6719_v63  ;;  %v2521_v47 = vrot.slane %v7521_v30, %v6722_v20  ;;  %v2525_v28 = vrot.slane %v7521_v30, %v6725_v8  ;;  %v2529_v41 = vrot.slane %v7521_v30, %v6728_v22 }
 0x3de   : > { %v2533_v33 = vrot.slane %v7521_v30, %v6731_v39  ;;  %v3872_v59 = vcombine.low %v3850_v25, %v3857_v4  ;;  %v3692_v44 = vcombine.low %v3684_v43, %v3691_v7  ;;  %v3782_v55 = vrot.slane %v3774_v52, %v6741_v3 }
 0x3df   : > { %4189 = vperm.xlu1 %5448, %v3496_v49   ;;  %v3789_v60 = vrot.slane %v3775_v23, %v6741_v3  ;;  %v3873_v50 = vcombine.low %v3864_v10, %v3871_v54  ;;  %v3948_v34 = vrot.slane %v3938_v2, %v6741_v3  ;;  %v3955_v18 = vrot.slane %v3939_v0, %v6741_v3 }
 0x3e0   : > { %v3962_v29 = vrot.slane %v3940_v42, %v6741_v3  ;;  %v3969_v30 = vrot.slane %v3941_v40, %v6741_v3  ;;  %v4036_v31 = vcombine.low %v2505_v32, %v2509_v35  ;;  %v4037_v51 = vcombine.low %v2513_v17, %v2517_v48 }
 0x3e1   : > { %v4038_v14 = vcombine.low %v2521_v47, %v2525_v28  ;;  %v4039_v61 = vcombine.low %v2529_v41, %v2533_v33  ;;  %v3880_v56 = vrot.slane %v3872_v59, %v6741_v3  ;;  %v3790_v16 = vcombine.low %v3782_v55, %v3789_v60 }
 0x3e2   : > { %v4793_v62 = vpop.f32.mrf.mxu0  ;;  %v3887_v5 = vrot.slane %v3873_v50, %v6741_v3  ;;  %v3970_v6 = vcombine.low %v3948_v34, %v3955_v18  ;;  %v3971_v11 = vcombine.low %v3962_v29, %v3969_v30  ;;  %v4046_v19 = vrot.slane %v4036_v31, %v6741_v3 }
 0x3e3   : > { %4900 = vst.msk [vmem:[%s7287_s16 + $0x68] sm:$0xff] %vm8011_vm3, %v4793_v62  ;;  %4195 = vperm.xlu1 %5448, %v3594_v36   ;;  %v4053_v9 = vrot.slane %v4037_v51, %v6741_v3  ;;  %v4060_v58 = vrot.slane %v4038_v14, %v6741_v3  ;;  %v4067_v37 = vrot.slane %v4039_v61, %v6741_v3  ;;  %vm8024_vm3 = vmmov %vm8005_vm0 }
 0x3e4   : > { %v4795_v24 = vpop.f32.mrf.mxu0  ;;  %v3888_v21 = vcombine.low %v3880_v56, %v3887_v5  ;;  %v3978_v46 = vrot.slane %v3970_v6, %v6741_v3  ;;  %v3985_v38 = vrot.slane %v3971_v11, %v6741_v3 }
 0x3e5   : > { %v4068_v12 = vcombine.low %v4046_v19, %v4053_v9  ;;  %v4069_v49 = vcombine.low %v4060_v58, %v4067_v37 }
 0x3e6   : > { %v3986_v36 = vcombine.low %v3978_v46, %v3985_v38  ;;  %v4136_v46 = vpop.permute.xlu0 %4135 }
 0x3e7   : > { %4201 = vperm.xlu1 %5448, %v3692_v44   ;;  %v4076_v25 = vrot.slane %v4068_v12, %v6741_v3  ;;  %v4083_v4 = vrot.slane %v4069_v49, %v6741_v3 }
 0x3e9   : > { %v4084_v43 = vcombine.low %v4076_v25, %v4083_v4 }
 0x3ea   : > { %v4798_v15 = vpop.f32.mrf.mxu0  ;;  %v4145_v49 = vpop.permute.xlu0 %4144 }
 0x3eb   : > { %4901 = vst.msk [vmem:[%s7287_s16 + $0x70] sm:$0xff] %vm8012_vm4, %v4798_v15  ;;  %4207 = vperm.xlu1 %5448, %v3790_v16   ;;  %vm8025_vm4 = vmmov %vm8005_vm0 }
 0x3ec   : > { %v4800_v26 = vpop.f32.mrf.mxu0 }
 0x3ee   : > { %v7756_v4 = vpop.permute.xlu0 %4150 }
 0x3ef   : > { %4213 = vperm.xlu1 %5448, %v3888_v21  }
 0x3f2   : > { %v4803_v10 = vpop.f32.mrf.mxu0 }
 0x3f3   : > { %4902 = vst.msk [vmem:[%s7287_s16 + $0x78] sm:$0xff] %vm8013_vm5, %v4803_v10  ;;  %4219 = vperm.xlu1 %5448, %v3986_v36   ;;  %vm8026_vm5 = vmmov %vm8005_vm0 }
 0x3f4   : > { %v4805_v54 = vpop.f32.mrf.mxu0 }
 0x3f7   : > { %4225 = vperm.xlu1 %5448, %v4084_v43  }
 0x3fa   : > { %v4808_v7 = vpop.f32.mrf.mxu0 }
 0x3fb   : > { %4903 = vst.msk [vmem:[%s7287_s16 + $0x80] sm:$0xff] %vm8014_vm6, %v4808_v7  ;;  %vm8027_vm6 = vmmov %vm8005_vm0  ;;  %v7762_v7 = vpop.permute.xlu0 %4156 }
 0x3fc   : > { %v4810_v52 = vpop.f32.mrf.mxu0 }
 0x402   : > { %v4813_v23 = vpop.f32.mrf.mxu0 }
 0x403   : > { %4904 = vst.msk [vmem:[%s7287_s16 + $0x88] sm:$0xff] %vm8015_vm7, %v4813_v23  ;;  %vm4239_vm7 = vcmask 130112  }
 0x404   : > { %v4815_v2 = vpop.f32.mrf.mxu0 }
 0x405   : > { %v7764_v2 = vpop.permute.xlu0 %4162 }
 0x40a   : > { %v4818_v0 = vpop.f32.mrf.mxu0 }
 0x40b   : > { %4905 = vst.msk [vmem:[%s7287_s16 + $0x90] sm:$0xff] %vm8016_vm8, %v4818_v0  ;;  %v7766_v0 = vpop.permute.xlu0 %4168  ;;  %vm4246_vm8 = vcmask 195712  }
 0x40c   : > { %v4820_v42 = vpop.f32.mrf.mxu0 }
 0x412   : > { %v4823_v40 = vpop.f32.mrf.mxu0 }
 0x413   : > { %4906 = vst.msk [vmem:[%s7287_s16 + $0x98] sm:$0xff] %vm8005_vm0, %v4823_v40  ;;  %v7768_v40 = vpop.permute.xlu0 %4174  ;;  %vm4253_vm0 = vcmask 261312  }
 0x414   : > { %v4825_v32 = vpop.f32.mrf.mxu0 }
 0x415   : > { %v4241_v32 = vadd.s32 4294967280, %v6556_v57 }
 0x41a   : > { %v4828_v35 = vpop.f32.mrf.mxu0 }
 0x41b   : > { %4907 = vst.msk [vmem:[%s7287_s16 + $0xa0] sm:$0xff] %vm8017_vm9, %v4828_v35  ;;  %v4234_v35 = vadd.s32 4294967288, %v6556_v57  ;;  %vm4260_vm9 = vcmask 326912  }
 0x41c   : > { %v4830_v17 = vpop.f32.mrf.mxu0 }
 0x422   : > { %v4833_v48 = vpop.f32.mrf.mxu0 }
 0x423   : > { %4908 = vst.msk [vmem:[%s7287_s16 + $0xa8] sm:$0xff] %vm8018_vm15, %v4833_v48  ;;  %v7772_v48 = vpop.permute.xlu0 %4180  ;;  %vm4267_vm15 = vcmask 392512  }
 0x424   : > { %v4835_v47 = vpop.f32.mrf.mxu0 }
 0x425   : > { %v8028_v47 = vld [vmem:[#allocation5_spill] sm:$0xff] }
 0x42a   : > { %v4838_v28 = vpop.f32.mrf.mxu0 }
 0x42b   : > { %4909 = vst.msk [vmem:[%s7287_s16 + $0xb0] sm:$0xff] %vm8019_vm10, %v4838_v28  ;;  %v4244_v28 = vsub.s32 %v4241_v32, %v8028_v47  ;;  %vm4274_vm10 = vcmask 458112  }
 0x42c   : > { %v4840_v41 = vpop.f32.mrf.mxu0 }
 0x42d   : > { %v4255_v41 = vadd.s32 4294967264, %v6556_v57 }
 0x431   : > { %v1541_v33 = vpop.permute.xlu1 %1540 }
 0x432   : > { %v4843_v62 = vpop.f32.mrf.mxu0  ;;  %vm4501_vm11 = vcmp.eq.s32.totalorder %v6569_v13, %v1541_v33  ;;  %vm4500_vm1 = vcmp.eq.s32.totalorder %v6556_v57, %v1541_v33  ;;  %v2537_v59 = vrot.slane %v1541_v33, %v7976_v45  ;;  %v2541_v44 = vrot.slane %v1541_v33, %v7977_v27 }
 0x433   : > { %4910 = vst.msk [vmem:[%s7287_s16 + $0xb8] sm:$0xff] %vm8020_vm12, %v4843_v62  ;;  %5244 = vmatprep.mubr.msk.f32.mxu1 %vm4501_vm11, %v8003_v1  ;;  %v2545_v55 = vrot.slane %v1541_v33, %v6716_v53  ;;  %v2549_v60 = vrot.slane %v1541_v33, %v6719_v63  ;;  %v2553_v50 = vrot.slane %v1541_v33, %v6722_v20  ;;  %v4248_v62 = vadd.s32 4294967272, %v6556_v57 }
 0x434   : > { %v2557_v24 = vrot.slane %v1541_v33, %v6725_v8  ;;  %v4845_v13 = vpop.f32.mrf.mxu0  ;;  %5245 = vmatmul.mubr.msk.f32.gmra.mxu1 %vm4500_vm1, %v8003_v1  ;;  %v2561_v45 = vrot.slane %v1541_v33, %v6728_v22  ;;  %v2565_v27 = vrot.slane %v1541_v33, %v6731_v39  ;;  %v4085_v34 = vcombine.low %v2537_v59, %v2541_v44  ;;  %v4187_v44 = vpop.permute.xlu0 %4186 }
 0x435   : > { %v4086_v18 = vcombine.low %v2545_v55, %v2549_v60  ;;  %v4232_v33 = vsub.s32 %v6556_v57, %v8028_v47  ;;  %v4237_v59 = vsub.s32 %v4234_v35, %v8028_v47  ;;  %v4262_v55 = vadd.s32 4294967256, %v6556_v57 }
 0x436   : > { %v4087_v29 = vcombine.low %v2553_v50, %v2557_v24  ;;  %v4088_v30 = vcombine.low %v2561_v45, %v2565_v27  ;;  %v4095_v53 = vrot.slane %v4085_v34, %v6741_v3  ;;  %v4139_v11 = vpop.permute.xlu1 %4138  ;;  %v4258_v13 = vsub.s32 %v4255_v41, %v8028_v47 }
 0x437   : > { %v4102_v63 = vrot.slane %v4086_v18, %v6741_v3  ;;  %v4238_v60 = vrot.slane %v4139_v11, %v4237_v59  ;;  %v4269_v45 = vadd.s32 4294967248, %v6556_v57  ;;  %v4233_v27 = vrot.slane %v4136_v46, %v4232_v33 }
 0x438   : > { %v4109_v20 = vrot.slane %v4087_v29, %v6741_v3  ;;  %v4116_v8 = vrot.slane %v4088_v30, %v6741_v3  ;;  %v4251_v34 = vsub.s32 %v4248_v62, %v8028_v47  ;;  %v4193_v29 = vpop.permute.xlu0 %4192  ;;  %v4297_v46 = vadd.s32 4294967216, %v6556_v57 }
 0x439   : > { %v4117_v31 = vcombine.low %v4095_v53, %v4102_v63  ;;  %v4265_v53 = vsub.s32 %v4262_v55, %v8028_v47  ;;  %v4346_v63 = vrot.slane %v4187_v44, %v4237_v59  ;;  %vm4281_vm11 = vcmask 523712  }
 0x43a   : > { %v4848_v1 = vpop.f32.mrf.mxu1  ;;  %v4118_v51 = vcombine.low %v4109_v20, %v4116_v8  ;;  %v4142_v19 = vpop.permute.xlu1 %4141  ;;  %v4240_v20 = vsel %vm4239_vm7, %v4238_v60, %v4233_v27  ;;  %v4356_v11 = vrot.slane %v4193_v29, %v4251_v34  ;;  %v4300_v35 = vsub.s32 %v4297_v46, %v8028_v47 }
 0x43b   : > { %4911 = vst.msk [vmem:[%s7287_s16 + $0xc0] sm:$0xff] %vm8021_vm13, %v4848_v1  ;;  %v4125_v22 = vrot.slane %v4117_v31, %v6741_v3  ;;  %v4245_v24 = vrot.slane %v4142_v19, %v4244_v28  ;;  %v4272_v1 = vsub.s32 %v4269_v45, %v8028_v47  ;;  %v4304_v41 = vadd.s32 4294967208, %v6556_v57 }
 0x43c   : > { %v4850_v39 = vpop.f32.mrf.mxu1  ;;  %v4132_v14 = vrot.slane %v4118_v51, %v6741_v3  ;;  %v4283_v51 = vadd.s32 4294967232, %v6556_v57  ;;  %vm4288_vm1 = vcmask 589312   ;;  %v4318_v55 = vadd.s32 4294967192, %v6556_v57 }
 0x43d   : > { %v4247_v8 = vsel %vm4246_vm8, %v4245_v24, %v4240_v20  ;;  %v4276_v39 = vadd.s32 4294967240, %v6556_v57  ;;  %vm4295_vm12 = vcmask 654912   ;;  %v4307_v27 = vsub.s32 %v4304_v41, %v8028_v47 }
 0x43e   : > { %v4133_v61 = vcombine.low %v4125_v22, %v4132_v14  ;;  %v7740_v9 = vpop.permute.xlu1 %4147  ;;  %v4252_v22 = vrot.slane %v4145_v49, %v4251_v34  ;;  %vm4302_vm13 = vcmask 720512  }
 0x43f   : > { %v4259_v31 = vrot.slane %v7740_v9, %v4258_v13  ;;  %v4279_v49 = vsub.s32 %v4276_v39, %v8028_v47 }
 0x440   : > { %4228 = vperm.xlu0 %5447, %v4133_v61   ;;  %v4254_v19 = vsel %vm4253_vm0, %v4252_v22, %v4247_v8 }
 0x441   : > { %v4261_v9 = vsel %vm4260_vm9, %v4259_v31, %v4254_v19 }
 0x442   : > { %v4853_v56 = vpop.f32.mrf.mxu1  ;;  %v7742_v58 = vpop.permute.xlu1 %4153 }
 0x443   : > { %4912 = vst.msk [vmem:[%s7287_s16 + $0xc8] sm:$0xff] %vm8022_vm2, %v4853_v56  ;;  %v4199_v56 = vpop.permute.xlu0 %4198  ;;  %vm4309_vm2 = vcmask 786112  }
 0x444   : > { %v4855_v16 = vpop.f32.mrf.mxu1 }
 0x446   : > { %v4858_v5 = vpop.f32.mrf.mxu1  ;;  %v7744_v37 = vpop.permute.xlu1 %4159 }
 0x447   : > { %4913 = vst.msk [vmem:[%s7287_s16 + $0xd0] sm:$0xff] %vm8023_vm14, %v4858_v5  ;;  %vm4316_vm14 = vcmask 851712  }
 0x448   : > { %v4860_v6 = vpop.f32.mrf.mxu1 }
 0x449   : > { %v4290_v6 = vadd.s32 4294967224, %v6556_v57 }
 0x44a   : > { %v7748_v26 = vpop.permute.xlu1 %4165 }
 0x44b   : > { %v4301_v24 = vrot.slane %v7748_v26, %v4300_v35 }
 0x44e   : > { %v7750_v12 = vpop.permute.xlu1 %4171 }
 0x452   : > { %v7758_v54 = vpop.permute.xlu1 %4177 }
 0x456   : > { %v4184_v23 = vpop.permute.xlu1 %4183 }
 0x457   : > { %v4342_v18 = vrot.slane %v4184_v23, %v4232_v33  ;;  %v4366_v23 = vrot.slane %v4199_v56, %v4265_v53 }
 0x459   : > { %v4347_v14 = vsel %vm4239_vm7, %v4346_v63, %v4342_v18  ;;  %v4321_v63 = vsub.s32 %v4318_v55, %v8028_v47  ;;  %vm8030_vm7 = vcmask 261120  }
 0x45a   : > { %v4190_v42 = vpop.permute.xlu1 %4189 }
 0x45b   : > { %v4351_v30 = vrot.slane %v4190_v42, %v4244_v28  ;;  %v4280_v28 = vrot.slane %v7762_v7, %v4279_v49 }
 0x45d   : > { %v4352_v16 = vsel %vm4246_vm8, %v4351_v30, %v4347_v14 }
 0x45e   : > { %v4196_v17 = vpop.permute.xlu1 %4195 }
 0x45f   : > { %v4361_v5 = vrot.slane %v4196_v17, %v4258_v13  ;;  %v4311_v17 = vadd.s32 4294967200, %v6556_v57  ;;  %v4325_v13 = vadd.s32 4294967184, %v6556_v57 }
 0x461   : > { %v4314_v7 = vsub.s32 %v4311_v17, %v8028_v47  ;;  %v4328_v31 = vsub.s32 %v4325_v13, %v8028_v47 }
 0x462   : > { %v4202_v50 = vpop.permute.xlu1 %4201 }
 0x466   : > { %v4208_v61 = vpop.permute.xlu1 %4207 }
 0x46a   : > { %v4214_v42 = vpop.permute.xlu1 %4213 }
 0x46e   : > { %v4220_v18 = vpop.permute.xlu1 %4219 }
 0x46f   : > { %v4401_v14 = vrot.slane %v4220_v18, %v4314_v7 }
 0x478   : > { %v4863_v15 = vpop.f32.mrf.mxu1 }
 0x479   : > { %4914 = vst.msk [vmem:[%s7287_s16 + $0xd8] sm:$0xff] %vm8024_vm3, %v4863_v15  ;;  %v4273_v15 = vrot.slane %v7742_v58, %v4272_v1  ;;  %vm4323_vm3 = vcmask 917312  }
 0x47a   : > { %v4865_v21 = vpop.f32.mrf.mxu1 }
 0x47b   : > { %v4286_v21 = vsub.s32 %v4283_v51, %v8028_v47  ;;  %v4332_v51 = vadd.s32 4294967176, %v6556_v57 }
 0x47d   : > { %v4381_v44 = vrot.slane %v4208_v61, %v4286_v21  ;;  %v4335_v57 = vsub.s32 %v4332_v51, %v8028_v47 }
 0x47f   : > { %v4868_v38 = vpop.f32.mrf.mxu1 }
 0x480   : > { %4915 = vst.msk [vmem:[%s7287_s16 + $0xe0] sm:$0xff] %vm8025_vm4, %v4868_v38  ;;  %v4266_v38 = vrot.slane %v7756_v4, %v4265_v53  ;;  %v4287_v4 = vrot.slane %v7744_v37, %v4286_v21  ;;  %v4391_v53 = vrot.slane %v4214_v42, %v4300_v35  ;;  %vm4330_vm4 = vcmask 982912  }
 0x481   : > { %v4870_v36 = vpop.f32.mrf.mxu1 }
 0x482   : > { %v4357_v36 = vsel %vm4253_vm0, %v4356_v11, %v4352_v16  ;;  %v4268_v58 = vsel %vm4267_vm15, %v4266_v38, %v4261_v9  ;;  %v4226_v16 = vpop.permute.xlu1 %4225  ;;  %v4336_v38 = vrot.slane %v7772_v48, %v4335_v57 }
 0x483   : > { %v4873_v25 = vpop.f32.mrf.mxu1  ;;  %v4275_v32 = vsel %vm4274_vm10, %v4273_v15, %v4268_v58  ;;  %v4411_v9 = vrot.slane %v4226_v16, %v4328_v31 }
 0x484   : > { %4916 = vst.msk [vmem:[%s7287_s16 + $0xe8] sm:$0xff] %vm8026_vm5, %v4873_v25  ;;  %v4205_v25 = vpop.permute.xlu0 %4204  ;;  %v4282_v37 = vsel %vm4281_vm11, %v4280_v28, %v4275_v32  ;;  %vm4337_vm5 = vcmask 1048512  }
 0x485   : > { %v4875_v10 = vpop.f32.mrf.mxu1  ;;  %v4376_v60 = vrot.slane %v4205_v25, %v4279_v49 }
 0x486   : > { %v4362_v10 = vsel %vm4260_vm9, %v4361_v5, %v4357_v36 }
 0x487   : > { %v4878_v43 = vpop.f32.mrf.mxu1  ;;  %v4367_v33 = vsel %vm4267_vm15, %v4366_v23, %v4362_v10 }
 0x488   : > { %4917 = vst.msk [vmem:[%s7287_s16 + $0xf0] sm:$0xff] %vm8027_vm6, %v4878_v43  ;;  %v4371_v43 = vrot.slane %v4202_v50, %v4272_v1  ;;  %v4211_v62 = vpop.permute.xlu0 %4210  ;;  %v4289_v50 = vsel %vm4288_vm1, %v4287_v4, %v4282_v37  ;;  %v4308_v1 = vrot.slane %v7766_v0, %v4307_v27  ;;  %v4322_v0 = vrot.slane %v7768_v40, %v4321_v63 }
 0x489   : > { %v4880_v52 = vpop.f32.mrf.mxu1 }
 0x48a   : > { %v4293_v52 = vsub.s32 %v4290_v6, %v8028_v47  ;;  %v4372_v59 = vsel %vm4274_vm10, %v4371_v43, %v4367_v33 }
 0x48b   : > { %v4377_v34 = vsel %vm4281_vm11, %v4376_v60, %v4372_v59 }
 0x48c   : > { %v4294_v45 = vrot.slane %v7764_v2, %v4293_v52  ;;  %v4217_v29 = vpop.permute.xlu0 %4216  ;;  %v4382_v30 = vsel %vm4288_vm1, %v4381_v44, %v4377_v34  ;;  %v4386_v20 = vrot.slane %v4211_v62, %v4293_v52  ;;  %v4315_v2 = vrot.slane %v7750_v12, %v4314_v7 }
 0x48d   : > { %v4396_v61 = vrot.slane %v4217_v29, %v4307_v27  ;;  %v4329_v12 = vrot.slane %v7758_v54, %v4328_v31  ;;  %v8029_v52 = vlaneseq }
 0x48e   : > { %v4296_v26 = vsel %vm4295_vm12, %v4294_v45, %v4289_v50  ;;  %v4387_v22 = vsel %vm4295_vm12, %v4386_v20, %v4382_v30 }
 0x48f   : > { %v4303_v8 = vsel %vm4302_vm13, %v4301_v24, %v4296_v26  ;;  %v4392_v39 = vsel %vm4302_vm13, %v4391_v53, %v4387_v22  ;;  %vm4435_vm6 = vcmp.lt.s32.totalorder %v8029_v52, 256 }
 0x490   : > { %v4310_v56 = vsel %vm4309_vm2, %v4308_v1, %v4303_v8  ;;  %v4223_v5 = vpop.permute.xlu0 %4222  ;;  %v4397_v11 = vsel %vm4309_vm2, %v4396_v61, %v4392_v39 }
 0x491   : > { %v4317_v6 = vsel %vm4316_vm14, %v4315_v2, %v4310_v56  ;;  %v4402_v19 = vsel %vm4316_vm14, %v4401_v14, %v4397_v11  ;;  %v4406_v15 = vrot.slane %v4223_v5, %v4321_v63 }
 0x492   : > { %v4324_v21 = vsel %vm4323_vm3, %v4322_v0, %v4317_v6 }
 0x493   : > { %v4331_v46 = vsel %vm4330_vm4, %v4329_v12, %v4324_v21  ;;  %v4407_v40 = vsel %vm4323_vm3, %v4406_v15, %v4402_v19 }
 0x494   : > { %v4412_v49 = vsel %vm4330_vm4, %v4411_v9, %v4407_v40  ;;  %v4338_v36 = vsel %vm4337_vm5, %v4336_v38, %v4331_v46 }
 0x4bb   : > { %v4229_v54 = vpop.permute.xlu0 %4228 }
 0x4bc   : > { %v4416_v47 = vrot.slane %v4229_v54, %v4335_v57 }
 0x4be   : > { %v4417_v25 = vsel %vm4337_vm5, %v4416_v47, %v4412_v49 }
 0x4bf   : > { %v4418_v10 = vcombine.low %v4338_v36, %v4417_v25 }
 0x4c1   : > { %v4425_v43 = vrot.slane %v4418_v10, %v6741_v3 }
 0x4c3   : > { %v4432_v48 = vrot.slane %v4425_v43, %v6741_v3 }
 0x4c5   : > { %4437 = vst.msk [vmem:[%s290_s20] sm:$0x3] %vm4435_vm6, %v4432_v48 }
 0x4f4   : > { %v4883_v23 = vpop.f32.mrf.mxu1 }
 0x4f5   : > { %4918 = vst.msk [vmem:[%s7287_s16 + $0xf8] sm:$0xff] %vm8030_vm7, %v4883_v23 }
 0x4f6   : > { %v4885_v58 = vpop.f32.mrf.mxu1 }
 0x4f7   : > { %5614 = shalt.err (!%p5611_p4)
}
 0x4f8   : > { %s5615_s14 = scalar_lea.hbm %s7854_s8, 4096  ;;  %s5619_s19 = scalar_lea.hbm %s7908_s6, 8192 }
 0x4f9   : > { %p5616_p7 = scmp.ne.s32.totalorder %s7854_s8, %s5615_s14  ;;  %p5620_p10 = scmp.lt.s32.totalorder %s7854_s8, %s7908_s6 }
 0x4fa   : > { %p5621_p11 = scmp.lt.s32.totalorder %s5619_s19, %s5615_s14 }
 0x4fb   : > { %p5617_p8 = pnand %p5616_p7, %p5748_p5 }
 0x4fc   : > { %p5622_p12 = por %p5621_p11, %p5620_p10 }
 0x4fd   : > { %p5618_p9 = pneg %p5617_p8 }
 0x4ff   : > { %p5623_p13 = pnand %p5622_p12, %p5618_p9 }
 0x501   : > { %5626 = shalt.err (!%p5623_p13)
}
 0x502   : > { %s5668_s23 = smov 128   ;;  %s5669_s29 = smov 8  }
 0x503   : > { %5370 = dma.vmem_to_hbm [thread:$0]  (%p5748_p5), %s7856_s22, 4096, %s7854_s8, %s7862_s9, %s5668_s23, %s5668_s23, %s5669_s29  }
 0x504 PF: > { %p5376_p0 = scmp.ge.s32.totalorder %s5661_s27, 2  ;;  %s4956_s13 = sand.u32 1, %s5649_s24  }
 0x505   : > { %s4957_s28 = scalar_lea.sflag [#allocation3], %s4956_s13 }
 0x506   : > { %p5373_p1 = pnand %p5376_p0, %p5752_p6 }
 0x508   : > { %p5374_p2 = pneg %p5373_p1 }
 0x50a   : > { %5644 = dma.done.wait (%p5374_p2), %s4957_s28, 4096  }
 0x50b   : > { %5646 = vsyncadd (%p5374_p2), %s4957_s28, 4294963200  ;;  %p18_p3 = scmp.ge.s32.totalorder %s5735_s30, 4   ;;  %s8031_s24 = smov %s5653_s25 }
 0x50c   : > { %s8032_s25 = smov %s5657_s26  ;;  %s8033_s26 = smov %s5746_s10 }
 0x50d   : > { %s8034_s27 = smov %s5735_s30  ;;  %20 = sbr.rel (!%p18_p3) target bundleno = 3 (0x3), region = 91 }
 0x512   :  { %4969 = vsyncpa [#allocation3], 1 }
 0x513   :  { %4971 = vsyncpa [#allocation3 + $0x1], 1 }

</bundles_post_ra>
